<compile_context>
chip_gen: v7x
topology: tpu7x:2x2x1
jax: 0.10.0
libtpu: 0.0.40
codegen_flags: <defaults>
</compile_context>

<pallas_src>
from types import SimpleNamespace

import jax
import jax.numpy as jnp
import numpy as np
from jax import lax
from jax.experimental import pallas as pl
from jax.experimental.pallas import tpu as pltpu

K = 3            # kernel_size
STRIDE = 2
PADDING = 1
IN_CHANNELS = 3
OUT_CHANNELS = 16


def _round_up(v, m):
    return ((v + m - 1) // m) * m


def _geometry(N, Ci, D, H, W, Co):
    S = STRIDE
    pad = K - 1 - PADDING
    Ds, Hs, Ws = (D - 1) * S + 1, (H - 1) * S + 1, (W - 1) * S + 1
    Do = Ds + 2 * pad - K + 1
    Ho = Hs + 2 * pad - K + 1
    Wo = Ws + 2 * pad - K + 1
    Hg = _round_up(Ho, 8)                 # sublane-friendly oh grid
    Wg = _round_up(Wo, 8)                 # ow grid folded into lanes
    Dp = Ds + 2 * pad
    Hp = Hg + K - 1
    Wp = Ws + 2 * pad
    WPCI = Wp * Ci
    ROWS = N * Do * Hg
    LN = Wg * Co
    Pd, Ph, Pw = Do // 4, Ho // 4, Wo // 4
    GR = N * Pd * Ph
    PC = Pw * Co
    OUT_LANES = _round_up(max(PC, Co, 128), 128)
    return SimpleNamespace(N=N, Ci=Ci, Co=Co, Ds=Ds, Hs=Hs, Ws=Ws,
                           Do=Do, Ho=Ho, Wo=Wo, Hg=Hg, Wg=Wg,
                           Dp=Dp, Hp=Hp, Wp=Wp, WPCI=WPCI, ROWS=ROWS,
                           LN=LN, Pd=Pd, Ph=Ph, Pw=Pw, GR=GR, PC=PC,
                           OUT_LANES=OUT_LANES)


# ----------------------------------------------------------------------------
# Host-side (once per weight): banded bf16 weight slabs.  kw is folded into the
# band, so slab t = kd*K + kh maps (w*Ci + ci) -> (ow*Co + co).
# ----------------------------------------------------------------------------
def pack_conv_weight(conv_w, x_shape):
    N, Ci, D, H, W = x_shape
    Co = conv_w.shape[1]
    g = _geometry(N, Ci, D, H, W, Co)
    w = np.asarray(conv_w, np.float32)               # (Ci, Co, K, K, K)
    wf = w[:, :, ::-1, ::-1, ::-1]                   # spatially flipped
    wband = np.zeros((K * K, g.WPCI, g.LN), np.float32)
    for kd in range(K):
        for kh in range(K):
            t = kd * K + kh
            for kw in range(K):
                blk = wf[:, :, kd, kh, kw]           # (Ci, Co)
                for ow in range(g.Wo):               # ow >= Wo lanes stay zero
                    w_in = ow + kw
                    wband[t, w_in * Ci:(w_in + 1) * Ci,
                          ow * Co:(ow + 1) * Co] = blk
    return jnp.asarray(wband, jnp.bfloat16)


# Shape-only constants (trace-time numpy -> embedded constants).
def _pool_constants(g):
    poolr = np.zeros((g.GR, g.ROWS), np.float32)
    for n in range(g.N):
        for od in range(4 * g.Pd):
            for oh in range(4 * g.Ph):
                r = (n * g.Do + od) * g.Hg + oh
                gg = (n * g.Pd + od // 4) * g.Ph + oh // 4
                poolr[gg, r] = 1.0 / 16.0
    poolw = np.zeros((g.LN, g.OUT_LANES), np.float32)
    selco = np.zeros((g.LN, g.OUT_LANES), np.float32)
    for ow in range(g.Wo):
        for co in range(g.Co):
            selco[ow * g.Co + co, co] = 1.0
            if ow < 4 * g.Pw:
                poolw[ow * g.Co + co, (ow // 4) * g.Co + co] = 0.25
    return (jnp.asarray(poolr, jnp.bfloat16),     # 1/16 is bf16-exact
            jnp.asarray(poolw, jnp.bfloat16),     # 1/4 is bf16-exact
            jnp.asarray(selco, jnp.float32))


# ----------------------------------------------------------------------------
# Fused kernel: conv-transpose matmuls + BN batch stats + 4^3 pooling.
# ----------------------------------------------------------------------------
def _make_kernel(g):
    def kernel(x_ref, w_ref, poolr_ref, poolw_ref, selco_ref, out_ref):
        # --- transposed conv (bias-free): 9 accumulating (kd,kh)-tap matmuls
        y = None
        for kd in range(K):
            for kh in range(K):
                t = kd * K + kh
                tap = x_ref[:, kd:kd + g.Do, kh:kh + g.Hg, :]     # (N,Do,Hg,WpCi)
                tap = tap.reshape(g.ROWS, g.WPCI).astype(jnp.bfloat16)
                contrib = jnp.dot(tap, w_ref[t],
                                  preferred_element_type=jnp.float32)
                y = contrib if y is None else y + contrib          # (ROWS, LN) f32

        # --- BN batch statistics: exact-f32 VPU/XLU reductions over rows -----
        oh_idx = lax.broadcasted_iota(jnp.int32, (g.N, g.Do, g.Hg, 1), 2)
        oh_idx = oh_idx.reshape(g.ROWS, 1)
        ym = jnp.where(oh_idx < g.Ho, y, 0.0)                      # mask pad rows
        lane_sum = jnp.sum(ym, axis=0, keepdims=True)              # (1, LN)
        lane_sq = jnp.sum(ym * y, axis=0, keepdims=True)           # (1, LN)
        stats2 = jnp.concatenate([lane_sum, lane_sq], axis=0)      # (2, LN)
        stats = jnp.dot(stats2, selco_ref[...],
                        precision=lax.Precision.HIGHEST,
                        preferred_element_type=jnp.float32)        # (2, OUT_LANES)

        # --- 4x4x4 average pooling as two small single-pass bf16 matmuls -----
        y_bf = y.astype(jnp.bfloat16)
        pr = jnp.dot(poolr_ref[...], y_bf,
                     preferred_element_type=jnp.float32)           # (GR, LN)
        pooled = jnp.dot(pr.astype(jnp.bfloat16), poolw_ref[...],
                         preferred_element_type=jnp.float32)       # (GR, OUT_LANES)

        # single lane-dense writeback: pooled rows + 2 stats rows
        out_ref[0:g.GR, :] = pooled
        out_ref[g.GR:g.GR + 2, :] = stats

    return kernel


# ----------------------------------------------------------------------------
# Forward pass
# ----------------------------------------------------------------------------
def model_forward(x, wband, conv_b, bn_w, bn_b, bn_eps):
    N, Ci, D, H, W = x.shape
    Co = OUT_CHANNELS
    g = _geometry(N, Ci, D, H, W, Co)
    S, pad = STRIDE, K - 1 - PADDING

    # Tiny XLA prologue: channels-last + zero-stuff (interior pad) + edge pad.
    xl = jnp.transpose(x, (0, 2, 3, 4, 1)).astype(jnp.float32)     # N,D,H,W,Ci
    xp = lax.pad(xl, jnp.float32(0.0),
                 ((0, 0, 0),
                  (pad, pad, S - 1),
                  (pad, pad + (g.Hp - (g.Hs + 2 * pad)), S - 1),
                  (pad, pad, S - 1),
                  (0, 0, 0)))                                      # N,Dp,Hp,Wp,Ci
    xpm = xp.reshape(N, g.Dp, g.Hp, g.WPCI)

    poolr, poolw, selco = _pool_constants(g)

    flops = (2 * g.ROWS * (K * K * g.WPCI) * g.LN
             + 2 * g.GR * g.ROWS * g.LN
             + 2 * g.GR * g.LN * g.OUT_LANES
             + 6 * g.ROWS * g.LN)
    bytes_accessed = (xpm.size * 4 + wband.size * 2 + poolr.size * 2
                      + poolw.size * 2 + selco.size * 4
                      + (g.GR + 2) * g.OUT_LANES * 4)

    res = pl.pallas_call(
        _make_kernel(g),
        out_shape=jax.ShapeDtypeStruct((g.GR + 2, g.OUT_LANES), jnp.float32),
        in_specs=[pl.BlockSpec(memory_space=pltpu.MemorySpace.VMEM)] * 5,
        out_specs=pl.BlockSpec(memory_space=pltpu.MemorySpace.VMEM),
        cost_estimate=pl.CostEstimate(flops=int(flops), transcendentals=0,
                                      bytes_accessed=int(bytes_accessed)),
    )(xpm, wband, poolr, poolw, selco)

    # ---- tiny epilogue: BN affine on the pooled tensor ---------------------
    # (pooling commutes with the per-channel affine; conv bias folded back in)
    conv_b = conv_b.astype(jnp.float32)
    cnt = float(g.N * g.Do * g.Ho * g.Wo)
    sum_c = res[g.GR, :Co]
    sq_c = res[g.GR + 1, :Co]
    mean_nb = sum_c / cnt
    var = sq_c / cnt - mean_nb * mean_nb          # biased batch variance
    mean = mean_nb + conv_b
    scale = bn_w.astype(jnp.float32) / jnp.sqrt(var + bn_eps)
    shift = bn_b.astype(jnp.float32) - mean * scale
    pooled = res[:g.GR, :g.PC].reshape(g.N, g.Pd, g.Ph, g.Pw, Co)
    out = (pooled + conv_b) * scale + shift
    return jnp.transpose(out, (0, 4, 1, 2, 3))    # (N, Co, Pd, Ph, Pw)


# ----------------------------------------------------------------------------
# Pure-JAX reference (independent path via lax.conv_general_dilated)
# ----------------------------------------------------------------------------
def reference_forward(x, conv_w, conv_b, bn_w, bn_b, eps):
    w_conv = jnp.flip(conv_w, axis=(2, 3, 4))
    w_conv = jnp.transpose(w_conv, (1, 0, 2, 3, 4))     # (Co, Ci, K, K, K)
    dn = lax.conv_dimension_numbers(x.shape, w_conv.shape,
                                    ("NCDHW", "OIDHW", "NCDHW"))
    pad = K - 1 - PADDING
    y = lax.conv_general_dilated(
        x, w_conv, window_strides=(1, 1, 1), padding=[(pad, pad)] * 3,
        lhs_dilation=(STRIDE,) * 3, rhs_dilation=(1, 1, 1),
        dimension_numbers=dn, precision=lax.Precision.HIGHEST)
    y = y + conv_b.reshape(1, -1, 1, 1, 1)

    mean = y.mean(axis=(0, 2, 3, 4), keepdims=True)
    var = ((y - mean) ** 2).mean(axis=(0, 2, 3, 4), keepdims=True)
    y = (y - mean) / jnp.sqrt(var + eps)
    y = y * bn_w.reshape(1, -1, 1, 1, 1) + bn_b.reshape(1, -1, 1, 1, 1)

    def pool2(z):
        n, c, d, h, w = z.shape
        z = z[:, :, :d // 2 * 2, :h // 2 * 2, :w // 2 * 2]
        z = z.reshape(n, c, d // 2, 2, h // 2, 2, w // 2, 2)
        return z.mean(axis=(3, 5, 7))

    return pool2(pool2(y))


if __name__ == "__main__":
    key = jax.random.PRNGKey(0)
    kx, kw, kb, kg, kbt = jax.random.split(key, 5)

    N, Ci, D, H, W = 2, IN_CHANNELS, 8, 8, 8
    Co = OUT_CHANNELS

    x = jax.random.normal(kx, (N, Ci, D, H, W), jnp.float32)
    conv_w = 0.1 * jax.random.normal(kw, (Ci, Co, K, K, K), jnp.float32)
    conv_b = 0.1 * jax.random.normal(kb, (Co,), jnp.float32)
    bn_w = 1.0 + 0.02 * jax.random.normal(kg, (Co,), jnp.float32)
    bn_b = 0.02 * jax.random.normal(kbt, (Co,), jnp.float32)
    bn_eps = 1e-5
    # bn_running_mean / bn_running_var / bn_momentum only drive the
    # (unreturned) running-stat side-effect in training mode; not needed here.

    # Hoisted once per weight (depends only on conv_w and static shapes).
    wband = pack_conv_weight(conv_w, x.shape)

    fwd = jax.jit(model_forward)
    out = jax.block_until_ready(fwd(x, wband, conv_b, bn_w, bn_b, bn_eps))

    ref = reference_forward(x, conv_w, conv_b, bn_w, bn_b, bn_eps)
    assert out.shape == ref.shape, (out.shape, ref.shape)
    np.testing.assert_allclose(np.asarray(out), np.asarray(ref),
                               rtol=2e-2, atol=2e-2)
    print("KERNEL_OK")
</pallas_src>

<mosaic_0001>
module attributes {stable_mosaic.version = 11 : i64} {
  func.func @kernel(%arg0: memref<2x17x18x51xf32, #tpu.memory_space<vmem>>, %arg1: memref<9x51x256xbf16, #tpu.memory_space<vmem>>, %arg2: memref<18x480xbf16, #tpu.memory_space<vmem>>, %arg3: memref<256x128xbf16, #tpu.memory_space<vmem>>, %arg4: memref<256x128xf32, #tpu.memory_space<vmem>>, %arg5: memref<20x128xf32, #tpu.memory_space<vmem>>) attributes {dimension_semantics = [], scalar_prefetch = 0 : i64, scratch_operands = 0 : i64, tpu.core_type = #tpu.core_type<tc>} {
    %c0 = arith.constant 0 : index
    %c0_0 = arith.constant 0 : index
    %c0_1 = arith.constant 0 : index
    %c0_2 = arith.constant 0 : index
    %0 = vector.load %arg0[%c0, %c0_0, %c0_1, %c0_2] : memref<2x17x18x51xf32, #tpu.memory_space<vmem>>, vector<2x15x16x51xf32>
    %1 = vector.shape_cast %0 : vector<2x15x16x51xf32> to vector<480x51xf32>
    %2 = arith.truncf %1 : vector<480x51xf32> to vector<480x51xbf16>
    %c0_3 = arith.constant 0 : index
    %c0_4 = arith.constant 0 : index
    %c0_5 = arith.constant 0 : index
    %3 = vector.load %arg1[%c0_3, %c0_4, %c0_5] : memref<9x51x256xbf16, #tpu.memory_space<vmem>>, vector<1x51x256xbf16>
    %4 = vector.shape_cast %3 : vector<1x51x256xbf16> to vector<51x256xbf16>
    %cst = arith.constant dense<0.000000e+00> : vector<480x256xf32>
    %5 = tpu.matmul %2, %4, %cst {dimension_numbers = #tpu.dot_dimension_numbers<[1], [0], [0], [1], [0, 0, 1, 1], [], []>} : vector<480x51xbf16>, vector<51x256xbf16>, vector<480x256xf32> -> vector<480x256xf32>
    %c0_6 = arith.constant 0 : index
    %c0_7 = arith.constant 0 : index
    %c1 = arith.constant 1 : index
    %c0_8 = arith.constant 0 : index
    %6 = vector.load %arg0[%c0_6, %c0_7, %c1, %c0_8] : memref<2x17x18x51xf32, #tpu.memory_space<vmem>>, vector<2x15x16x51xf32>
    %7 = vector.shape_cast %6 : vector<2x15x16x51xf32> to vector<480x51xf32>
    %8 = arith.truncf %7 : vector<480x51xf32> to vector<480x51xbf16>
    %c1_9 = arith.constant 1 : index
    %c0_10 = arith.constant 0 : index
    %c0_11 = arith.constant 0 : index
    %9 = vector.load %arg1[%c1_9, %c0_10, %c0_11] : memref<9x51x256xbf16, #tpu.memory_space<vmem>>, vector<1x51x256xbf16>
    %10 = vector.shape_cast %9 : vector<1x51x256xbf16> to vector<51x256xbf16>
    %cst_12 = arith.constant dense<0.000000e+00> : vector<480x256xf32>
    %11 = tpu.matmul %8, %10, %cst_12 {dimension_numbers = #tpu.dot_dimension_numbers<[1], [0], [0], [1], [0, 0, 1, 1], [], []>} : vector<480x51xbf16>, vector<51x256xbf16>, vector<480x256xf32> -> vector<480x256xf32>
    %12 = arith.addf %5, %11 : vector<480x256xf32>
    %c0_13 = arith.constant 0 : index
    %c0_14 = arith.constant 0 : index
    %c2 = arith.constant 2 : index
    %c0_15 = arith.constant 0 : index
    %13 = vector.load %arg0[%c0_13, %c0_14, %c2, %c0_15] : memref<2x17x18x51xf32, #tpu.memory_space<vmem>>, vector<2x15x16x51xf32>
    %14 = vector.shape_cast %13 : vector<2x15x16x51xf32> to vector<480x51xf32>
    %15 = arith.truncf %14 : vector<480x51xf32> to vector<480x51xbf16>
    %c2_16 = arith.constant 2 : index
    %c0_17 = arith.constant 0 : index
    %c0_18 = arith.constant 0 : index
    %16 = vector.load %arg1[%c2_16, %c0_17, %c0_18] : memref<9x51x256xbf16, #tpu.memory_space<vmem>>, vector<1x51x256xbf16>
    %17 = vector.shape_cast %16 : vector<1x51x256xbf16> to vector<51x256xbf16>
    %cst_19 = arith.constant dense<0.000000e+00> : vector<480x256xf32>
    %18 = tpu.matmul %15, %17, %cst_19 {dimension_numbers = #tpu.dot_dimension_numbers<[1], [0], [0], [1], [0, 0, 1, 1], [], []>} : vector<480x51xbf16>, vector<51x256xbf16>, vector<480x256xf32> -> vector<480x256xf32>
    %19 = arith.addf %12, %18 : vector<480x256xf32>
    %c0_20 = arith.constant 0 : index
    %c1_21 = arith.constant 1 : index
    %c0_22 = arith.constant 0 : index
    %c0_23 = arith.constant 0 : index
    %20 = vector.load %arg0[%c0_20, %c1_21, %c0_22, %c0_23] : memref<2x17x18x51xf32, #tpu.memory_space<vmem>>, vector<2x15x16x51xf32>
    %21 = vector.shape_cast %20 : vector<2x15x16x51xf32> to vector<480x51xf32>
    %22 = arith.truncf %21 : vector<480x51xf32> to vector<480x51xbf16>
    %c3 = arith.constant 3 : index
    %c0_24 = arith.constant 0 : index
    %c0_25 = arith.constant 0 : index
    %23 = vector.load %arg1[%c3, %c0_24, %c0_25] : memref<9x51x256xbf16, #tpu.memory_space<vmem>>, vector<1x51x256xbf16>
    %24 = vector.shape_cast %23 : vector<1x51x256xbf16> to vector<51x256xbf16>
    %cst_26 = arith.constant dense<0.000000e+00> : vector<480x256xf32>
    %25 = tpu.matmul %22, %24, %cst_26 {dimension_numbers = #tpu.dot_dimension_numbers<[1], [0], [0], [1], [0, 0, 1, 1], [], []>} : vector<480x51xbf16>, vector<51x256xbf16>, vector<480x256xf32> -> vector<480x256xf32>
    %26 = arith.addf %19, %25 : vector<480x256xf32>
    %c0_27 = arith.constant 0 : index
    %c1_28 = arith.constant 1 : index
    %c1_29 = arith.constant 1 : index
    %c0_30 = arith.constant 0 : index
    %27 = vector.load %arg0[%c0_27, %c1_28, %c1_29, %c0_30] : memref<2x17x18x51xf32, #tpu.memory_space<vmem>>, vector<2x15x16x51xf32>
    %28 = vector.shape_cast %27 : vector<2x15x16x51xf32> to vector<480x51xf32>
    %29 = arith.truncf %28 : vector<480x51xf32> to vector<480x51xbf16>
    %c4 = arith.constant 4 : index
    %c0_31 = arith.constant 0 : index
    %c0_32 = arith.constant 0 : index
    %30 = vector.load %arg1[%c4, %c0_31, %c0_32] : memref<9x51x256xbf16, #tpu.memory_space<vmem>>, vector<1x51x256xbf16>
    %31 = vector.shape_cast %30 : vector<1x51x256xbf16> to vector<51x256xbf16>
    %cst_33 = arith.constant dense<0.000000e+00> : vector<480x256xf32>
    %32 = tpu.matmul %29, %31, %cst_33 {dimension_numbers = #tpu.dot_dimension_numbers<[1], [0], [0], [1], [0, 0, 1, 1], [], []>} : vector<480x51xbf16>, vector<51x256xbf16>, vector<480x256xf32> -> vector<480x256xf32>
    %33 = arith.addf %26, %32 : vector<480x256xf32>
    %c0_34 = arith.constant 0 : index
    %c1_35 = arith.constant 1 : index
    %c2_36 = arith.constant 2 : index
    %c0_37 = arith.constant 0 : index
    %34 = vector.load %arg0[%c0_34, %c1_35, %c2_36, %c0_37] : memref<2x17x18x51xf32, #tpu.memory_space<vmem>>, vector<2x15x16x51xf32>
    %35 = vector.shape_cast %34 : vector<2x15x16x51xf32> to vector<480x51xf32>
    %36 = arith.truncf %35 : vector<480x51xf32> to vector<480x51xbf16>
    %c5 = arith.constant 5 : index
    %c0_38 = arith.constant 0 : index
    %c0_39 = arith.constant 0 : index
    %37 = vector.load %arg1[%c5, %c0_38, %c0_39] : memref<9x51x256xbf16, #tpu.memory_space<vmem>>, vector<1x51x256xbf16>
    %38 = vector.shape_cast %37 : vector<1x51x256xbf16> to vector<51x256xbf16>
    %cst_40 = arith.constant dense<0.000000e+00> : vector<480x256xf32>
    %39 = tpu.matmul %36, %38, %cst_40 {dimension_numbers = #tpu.dot_dimension_numbers<[1], [0], [0], [1], [0, 0, 1, 1], [], []>} : vector<480x51xbf16>, vector<51x256xbf16>, vector<480x256xf32> -> vector<480x256xf32>
    %40 = arith.addf %33, %39 : vector<480x256xf32>
    %c0_41 = arith.constant 0 : index
    %c2_42 = arith.constant 2 : index
    %c0_43 = arith.constant 0 : index
    %c0_44 = arith.constant 0 : index
    %41 = vector.load %arg0[%c0_41, %c2_42, %c0_43, %c0_44] : memref<2x17x18x51xf32, #tpu.memory_space<vmem>>, vector<2x15x16x51xf32>
    %42 = vector.shape_cast %41 : vector<2x15x16x51xf32> to vector<480x51xf32>
    %43 = arith.truncf %42 : vector<480x51xf32> to vector<480x51xbf16>
    %c6 = arith.constant 6 : index
    %c0_45 = arith.constant 0 : index
    %c0_46 = arith.constant 0 : index
    %44 = vector.load %arg1[%c6, %c0_45, %c0_46] : memref<9x51x256xbf16, #tpu.memory_space<vmem>>, vector<1x51x256xbf16>
    %45 = vector.shape_cast %44 : vector<1x51x256xbf16> to vector<51x256xbf16>
    %cst_47 = arith.constant dense<0.000000e+00> : vector<480x256xf32>
    %46 = tpu.matmul %43, %45, %cst_47 {dimension_numbers = #tpu.dot_dimension_numbers<[1], [0], [0], [1], [0, 0, 1, 1], [], []>} : vector<480x51xbf16>, vector<51x256xbf16>, vector<480x256xf32> -> vector<480x256xf32>
    %47 = arith.addf %40, %46 : vector<480x256xf32>
    %c0_48 = arith.constant 0 : index
    %c2_49 = arith.constant 2 : index
    %c1_50 = arith.constant 1 : index
    %c0_51 = arith.constant 0 : index
    %48 = vector.load %arg0[%c0_48, %c2_49, %c1_50, %c0_51] : memref<2x17x18x51xf32, #tpu.memory_space<vmem>>, vector<2x15x16x51xf32>
    %49 = vector.shape_cast %48 : vector<2x15x16x51xf32> to vector<480x51xf32>
    %50 = arith.truncf %49 : vector<480x51xf32> to vector<480x51xbf16>
    %c7 = arith.constant 7 : index
    %c0_52 = arith.constant 0 : index
    %c0_53 = arith.constant 0 : index
    %51 = vector.load %arg1[%c7, %c0_52, %c0_53] : memref<9x51x256xbf16, #tpu.memory_space<vmem>>, vector<1x51x256xbf16>
    %52 = vector.shape_cast %51 : vector<1x51x256xbf16> to vector<51x256xbf16>
    %cst_54 = arith.constant dense<0.000000e+00> : vector<480x256xf32>
    %53 = tpu.matmul %50, %52, %cst_54 {dimension_numbers = #tpu.dot_dimension_numbers<[1], [0], [0], [1], [0, 0, 1, 1], [], []>} : vector<480x51xbf16>, vector<51x256xbf16>, vector<480x256xf32> -> vector<480x256xf32>
    %54 = arith.addf %47, %53 : vector<480x256xf32>
    %c0_55 = arith.constant 0 : index
    %c2_56 = arith.constant 2 : index
    %c2_57 = arith.constant 2 : index
    %c0_58 = arith.constant 0 : index
    %55 = vector.load %arg0[%c0_55, %c2_56, %c2_57, %c0_58] : memref<2x17x18x51xf32, #tpu.memory_space<vmem>>, vector<2x15x16x51xf32>
    %56 = vector.shape_cast %55 : vector<2x15x16x51xf32> to vector<480x51xf32>
    %57 = arith.truncf %56 : vector<480x51xf32> to vector<480x51xbf16>
    %c8 = arith.constant 8 : index
    %c0_59 = arith.constant 0 : index
    %c0_60 = arith.constant 0 : index
    %58 = vector.load %arg1[%c8, %c0_59, %c0_60] : memref<9x51x256xbf16, #tpu.memory_space<vmem>>, vector<1x51x256xbf16>
    %59 = vector.shape_cast %58 : vector<1x51x256xbf16> to vector<51x256xbf16>
    %cst_61 = arith.constant dense<0.000000e+00> : vector<480x256xf32>
    %60 = tpu.matmul %57, %59, %cst_61 {dimension_numbers = #tpu.dot_dimension_numbers<[1], [0], [0], [1], [0, 0, 1, 1], [], []>} : vector<480x51xbf16>, vector<51x256xbf16>, vector<480x256xf32> -> vector<480x256xf32>
    %61 = arith.addf %54, %60 : vector<480x256xf32>
    %62 = tpu.iota {dimensions = array<i32: 2>} : vector<2x15x16x1xi32>
    %63 = vector.shape_cast %62 : vector<2x15x16x1xi32> to vector<480x1xi32>
    %c15_i32 = arith.constant 15 : i32
    %64 = vector.broadcast %c15_i32 : i32 to vector<480x1xi32>
    %65 = arith.cmpi slt, %63, %64 : vector<480x1xi32>
    %cst_62 = arith.constant 0.000000e+00 : f32
    %66 = vector.shape_cast %65 : vector<480x1xi1> to vector<480x1xi1>
    %67 = vector.broadcast %66 : vector<480x1xi1> to vector<480x256xi1>
    %68 = vector.broadcast %cst_62 : f32 to vector<480x256xf32>
    %69 = arith.select %67, %61, %68 : vector<480x256xi1>, vector<480x256xf32>
    %cst_63 = arith.constant dense<0.000000e+00> : vector<256xf32>
    %70 = vector.multi_reduction <add>, %69, %cst_63 [0] : vector<480x256xf32> to vector<256xf32>
    %71 = vector.shape_cast %70 : vector<256xf32> to vector<1x256xf32>
    %72 = arith.mulf %69, %61 : vector<480x256xf32>
    %cst_64 = arith.constant dense<0.000000e+00> : vector<256xf32>
    %73 = vector.multi_reduction <add>, %72, %cst_64 [0] : vector<480x256xf32> to vector<256xf32>
    %74 = vector.shape_cast %73 : vector<256xf32> to vector<1x256xf32>
    %75 = tpu.concatenate %71, %74 in 0 : vector<1x256xf32>, vector<1x256xf32> -> vector<2x256xf32>
    %c0_65 = arith.constant 0 : index
    %c0_66 = arith.constant 0 : index
    %76 = vector.load %arg4[%c0_65, %c0_66] : memref<256x128xf32, #tpu.memory_space<vmem>>, vector<256x128xf32>
    %cst_67 = arith.constant dense<0.000000e+00> : vector<2x128xf32>
    %77 = tpu.matmul %75, %76, %cst_67 {dimension_numbers = #tpu.dot_dimension_numbers<[1], [0], [0], [1], [0, 0, 1, 1], [], []>, precision = #tpu.contract_precision<fp32>} : vector<2x256xf32>, vector<256x128xf32>, vector<2x128xf32> -> vector<2x128xf32>
    %78 = arith.truncf %61 : vector<480x256xf32> to vector<480x256xbf16>
    %c0_68 = arith.constant 0 : index
    %c0_69 = arith.constant 0 : index
    %79 = vector.load %arg2[%c0_68, %c0_69] : memref<18x480xbf16, #tpu.memory_space<vmem>>, vector<18x480xbf16>
    %cst_70 = arith.constant dense<0.000000e+00> : vector<18x256xf32>
    %80 = tpu.matmul %79, %78, %cst_70 {dimension_numbers = #tpu.dot_dimension_numbers<[1], [0], [0], [1], [0, 0, 1, 1], [], []>} : vector<18x480xbf16>, vector<480x256xbf16>, vector<18x256xf32> -> vector<18x256xf32>
    %81 = arith.truncf %80 : vector<18x256xf32> to vector<18x256xbf16>
    %c0_71 = arith.constant 0 : index
    %c0_72 = arith.constant 0 : index
    %82 = vector.load %arg3[%c0_71, %c0_72] : memref<256x128xbf16, #tpu.memory_space<vmem>>, vector<256x128xbf16>
    %cst_73 = arith.constant dense<0.000000e+00> : vector<18x128xf32>
    %83 = tpu.matmul %81, %82, %cst_73 {dimension_numbers = #tpu.dot_dimension_numbers<[1], [0], [0], [1], [0, 0, 1, 1], [], []>} : vector<18x256xbf16>, vector<256x128xbf16>, vector<18x128xf32> -> vector<18x128xf32>
    %c0_74 = arith.constant 0 : index
    %c0_75 = arith.constant 0 : index
    %84 = vector.load %arg5[%c0_74, %c0_75] : memref<20x128xf32, #tpu.memory_space<vmem>>, vector<18x128xf32>
    tpu.vector_store %arg5[%c0_74, %c0_75], %83 {strides = array<i32>} : memref<20x128xf32, #tpu.memory_space<vmem>>, vector<18x128xf32>,
    %c18 = arith.constant 18 : index
    %c0_76 = arith.constant 0 : index
    %85 = vector.load %arg5[%c18, %c0_76] : memref<20x128xf32, #tpu.memory_space<vmem>>, vector<2x128xf32>
    tpu.vector_store %arg5[%c18, %c0_76], %77 {strides = array<i32>} : memref<20x128xf32, #tpu.memory_space<vmem>>, vector<2x128xf32>,
    return
  }
}

</mosaic_0001>

<bundles_post_ra>
// kernel: model_forward.1
= control target key start
LH: loop header
LB: loop body
LE: loop exit
PB: predicated region body
PF: predicated region fallthrough
CT: control target
= control target key end

     0   :  { %v14191_v1 = vmov 0   ;;  %vm342_vm0 = vcmask 1040384   ;;  %vm343_vm1 = vcmask 1041408   ;;  %v10049_v8 = vmov 65535   ;;  %s14185_s1 = inlined_call_operand.vmem [shape: bf16[9,51,256], index: 1, kind: input, shape index: {}]   ;;  %s14186_s0 = inlined_call_operand.vmem [shape: f32[2,17,18,51], index: 0, kind: input, shape index: {}]   ;;  %s14187_s4 = inlined_call_operand.vmem [shape: f32[256,128], index: 4, kind: input, shape index: {}]   ;;  %s14188_s2 = inlined_call_operand.vmem [shape: bf16[18,480], index: 2, kind: input, shape index: {}]   ;;  %s14189_s3 = inlined_call_operand.vmem [shape: bf16[256,128], index: 3, kind: input, shape index: {}]   ;;  %s14190_s5 = inlined_call_operand.vmem [shape: f32[20,128], index: 5, kind: output, shape index: {}]  }
   0x1   :  { %v9917_v0 = vld [vmem:[%s14185_s1 + $0x3c] ss:$8 sps:$4 sm:$0xff]   ;;  %384 = vmatprep.mubr.bf16.mxu1 %v14191_v1  ;;  %2093 = vmatprep.mubr.bf16.mxu0 %v14191_v1  ;;  %v9919_v2 = vld [vmem:[%s14185_s1 + $0xac] ss:$8 sps:$4 sm:$0xff]   ;;  %v9921_v3 = vld [vmem:[%s14185_s1 + $0x38] ss:$8 sps:$4 sm:$0xff]  }
   0x2   :  { %352 = vmatprep.subr.bf16.mxu1 %v9917_v0  ;;  %v9922_v4 = vld [vmem:[%s14185_s1 + $0xa8] ss:$8 sps:$4 sm:$0xff]   ;;  %2061 = vmatprep.subr.bf16.mxu0 %v9919_v2  ;;  %v9923_v5 = vld [vmem:[%s14185_s1 + $0x4c] ss:$8 sps:$4 sm:$0xff]   ;;  %v9925_v6 = vld [vmem:[%s14185_s1 + $0xbc] ss:$8 sps:$4 sm:$0xff]  }
   0x3   :  { %353 = vmatpush1.bf16.msra.mxu1 %v9921_v3  ;;  %2062 = vmatpush1.bf16.msra.mxu0 %v9922_v4  ;;  %v9927_v7 = vld [vmem:[%s14185_s1 + $0x48] ss:$8 sps:$4 sm:$0xff]   ;;  %v344_v9 = vsel %vm342_vm0, 4294967295, %v10049_v8  ;;  %v9928_v10 = vld [vmem:[%s14185_s1 + $0xb8] ss:$8 sps:$4 sm:$0xff]   ;;  %vm251_vm2 = vcmask 416768  }
   0x4   :  { %354 = vmatprep.subr.bf16.mxu1 %v9923_v5  ;;  %2063 = vmatprep.subr.bf16.mxu0 %v9925_v6  ;;  %v9929_v11 = vld [vmem:[%s14185_s1 + $0x5c] ss:$8 sps:$4 sm:$0xff]   ;;  %v9931_v12 = vld [vmem:[%s14185_s1 + $0xcc] ss:$8 sps:$4 sm:$0xff]   ;;  %v9933_v13 = vld [vmem:[%s14185_s1 + $0x58] ss:$8 sps:$4 sm:$0xff]  }
   0x5   :  { %v10116_v14 = vsel %vm343_vm1, %v344_v9, 0  ;;  %v9934_v15 = vld [vmem:[%s14185_s1 + $0xc8] ss:$8 sps:$4 sm:$0xff]   ;;  %v7919_v17 = vld [vmem:[%s14185_s1 + $0xd8] sm:$0x33]  ;;  %v7854_v29 = vld [vmem:[%s14186_s0 + $0x20] sm:$0xff] }
   0x6   :  { %v7731_v16 = vld [vmem:[%s14185_s1 + $0x68] sm:$0x33]  ;;  %v7927_v19 = vcombine.high %v7919_v17, %v7919_v17  ;;  %v7926_v21 = vcombine.low %v7919_v17, %v7919_v17  ;;  %v7853_v28 = vld [vmem:[%s14186_s0 + $0x18] sm:$0xff]  ;;  %v8024_v37 = vld [vmem:[%s14185_s1 + $0x110] sm:$0x33]  ;;  %vm7428_vm4 = vcmask 785408  }
   0x7   :  { %355 = vmatpush1.bf16.msra.mxu1 %v9927_v7  ;;  %2064 = vmatpush1.bf16.msra.mxu0 %v9928_v10  ;;  %v7739_v18 = vcombine.high %v7731_v16, %v7731_v16  ;;  %v7738_v20 = vcombine.low %v7731_v16, %v7731_v16  ;;  %v118_v24 = vld [vmem:[%s14186_s0 + $0x1] sm:$0xff]  ;;  %v119_v25 = vld [vmem:[%s14186_s0 + $0x9] sm:$0xff]  ;;  %v10151_v32 = vpack.c.bf16 %v7854_v29, %v7853_v28  ;;  %v9944_v34 = vld [vmem:[%s14185_s1 + $0xf4] ss:$8 sps:$4 sm:$0xff]  }
   0x8   :  { %356 = vmatprep.subr.bf16.mxu1 %v9929_v11  ;;  %2065 = vmatprep.subr.bf16.mxu0 %v9931_v12  ;;  %v10129_v23 = vand.u32 %v7927_v19, %v10116_v14  ;;  %v10139_v27 = vand.u32 %v7926_v21, %v10116_v14  ;;  %v9941_v30 = vld [vmem:[%s14185_s1 + $0xe4] ss:$8 sps:$4 sm:$0xff]   ;;  %v178_v31 = vpack.c.bf16 %v119_v25, %v118_v24  ;;  %v9939_v33 = vld [vmem:[%s14185_s1 + $0xe0] ss:$8 sps:$4 sm:$0xff]   ;;  %v7855_v38 = vld [vmem:[%s14186_s0 + $0x30] sm:$0xff] }
   0x9   :  { %v350_v22 = vand.u32 %v7739_v18, %v10116_v14  ;;  %v347_v26 = vand.u32 %v7738_v20, %v10116_v14  ;;  %v120_v35 = vld [vmem:[%s14186_s0 + $0x19] sm:$0xff]  ;;  %v121_v36 = vld [vmem:[%s14186_s0 + $0x21] sm:$0xff]  ;;  %v8032_v42 = vcombine.high %v8024_v37, %v8024_v37  ;;  %v8031_v46 = vcombine.low %v8024_v37, %v8024_v37  ;;  %v122_v48 = vld [vmem:[%s14186_s0 + $0x31] sm:$0xff] }
   0xa   :  { %v7856_v39 = vld [vmem:[%s14186_s0 + $0x38] sm:$0xff]  ;;  %v9947_v41 = vld [vmem:[%s14185_s1 + $0x104] ss:$8 sps:$4 sm:$0xff]   ;;  %v10186_v43 = vpack.c.bf16 %v121_v36, %v120_v35  ;;  %v9945_v45 = vld [vmem:[%s14185_s1 + $0x100] ss:$8 sps:$4 sm:$0xff]  }
   0xb   :  { %357 = vmatpush1.bf16.msra.mxu1 %v9933_v13  ;;  %2066 = vmatpush1.bf16.msra.mxu0 %v9934_v15  ;;  %v9942_v40 = vld [vmem:[%s14185_s1 + $0xf0] ss:$8 sps:$4 sm:$0xff]   ;;  %v10188_v44 = vpack.c.bf16 %v7856_v39, %v7855_v38  ;;  %v2741_v47 = vand.u32 %v8032_v42, %v10116_v14  ;;  %v7857_v50 = vld [vmem:[%s14186_s0 + $0x48] sm:$0xff]  ;;  %v2738_v52 = vand.u32 %v8031_v46, %v10116_v14  ;;  %v9952_v53 = vld [vmem:[%s14185_s1 + $0x11c] ss:$8 sps:$4 sm:$0xff]  }
   0xc   :  { %358 = vmatprep.subr.bf16.mxu1 %v350_v22  ;;  %2067 = vmatprep.subr.bf16.mxu0 %v10129_v23  ;;  %v123_v49 = vld [vmem:[%s14186_s0 + $0x39] sm:$0xff]  ;;  %v7858_v51 = vld [vmem:[%s14186_s0 + $0x50] sm:$0xff]  ;;  %v7860_v59 = vld [vmem:[%s14186_s0 + $0x68] sm:$0xff] }
   0xd   :  { %v180_v54 = vpack.c.bf16 %v123_v49, %v122_v48  ;;  %v10216_v55 = vpack.c.bf16 %v7858_v51, %v7857_v50  ;;  %v124_v56 = vld [vmem:[%s14186_s0 + $0x49] sm:$0xff]  ;;  %v125_v57 = vld [vmem:[%s14186_s0 + $0x51] sm:$0xff]  ;;  %v7859_v58 = vld [vmem:[%s14186_s0 + $0x60] sm:$0xff] }
   0xe   :  { %v181_v60 = vpack.c.bf16 %v125_v57, %v124_v56  ;;  %v10235_v61 = vpack.c.bf16 %v7860_v59, %v7859_v58  ;;  %v126_v62 = vld [vmem:[%s14186_s0 + $0x61] sm:$0xff]  ;;  %v127_v63 = vld [vmem:[%s14186_s0 + $0x69] sm:$0xff]  ;;  %v7861_v0 = vld [vmem:[%s14186_s0 + $0x78] sm:$0xff] }
   0xf   :  { %359 = vmatpush1.bf16.msra.mxu1 %v347_v26  ;;  %2068 = vmatpush1.bf16.msra.mxu0 %v10139_v27  ;;  %v7862_v2 = vld [vmem:[%s14186_s0 + $0x80] sm:$0xff]  ;;  %v182_v3 = vpack.c.bf16 %v127_v63, %v126_v62  ;;  %v7863_v7 = vld [vmem:[%s14186_s0 + $0x90] sm:$0xff]  ;;  %v7864_v8 = vld [vmem:[%s14186_s0 + $0x98] sm:$0xff] }
  0x10   :  { %2743 = vmatprep.subr.bf16.mxu0 %v9941_v30  ;;  %v10254_v4 = vpack.c.bf16 %v7862_v2, %v7861_v0  ;;  %v128_v5 = vld [vmem:[%s14186_s0 + $0x79] sm:$0xff]  ;;  %v129_v6 = vld [vmem:[%s14186_s0 + $0x81] sm:$0xff]  ;;  %v10273_v10 = vpack.c.bf16 %v7864_v8, %v7863_v7  ;;  %v130_v11 = vld [vmem:[%s14186_s0 + $0x91] sm:$0xff] }
  0x11   :  { %v183_v9 = vpack.c.bf16 %v129_v6, %v128_v5  ;;  %v131_v12 = vld [vmem:[%s14186_s0 + $0x99] sm:$0xff]  ;;  %v9955_v16 = vld [vmem:[%s14185_s1 + $0x12c] ss:$8 sps:$4 sm:$0xff]   ;;  %v9953_v19 = vld [vmem:[%s14185_s1 + $0x128] ss:$8 sps:$4 sm:$0xff]  }
  0x12   :  { %7740 = vmatmul.mubr.msk.bf16.vlgmr.msra.gmra.mrb[0].mxu1 %vm251_vm2, %v178_v31  ;;  %7928 = vmatmul.mubr.msk.bf16.vlgmr.msra.gmra.mrb[0].mxu0 %vm251_vm2, %v10151_v32  ;;  %v184_v13 = vpack.c.bf16 %v131_v12, %v130_v11  ;;  %v9950_v15 = vld [vmem:[%s14185_s1 + $0x118] ss:$8 sps:$4 sm:$0xff]   ;;  %v132_v17 = vld [vmem:[%s14186_s0 + $0xa9] sm:$0xff]  ;;  %v9958_v20 = vld [vmem:[%s14185_s1 + $0x13c] ss:$8 sps:$4 sm:$0xff]  }
  0x13   :  { %2744 = vmatpush1.bf16.msra.mxu0 %v9939_v33  ;;  %394 = vmatprep.mubr.bf16.mxu1 %v14191_v1  ;;  %v133_v18 = vld [vmem:[%s14186_s0 + $0xb1] sm:$0xff]  ;;  %v134_v24 = vld [vmem:[%s14186_s0 + $0xc1] sm:$0xff]  ;;  %v135_v25 = vld [vmem:[%s14186_s0 + $0xc9] sm:$0xff] }
  0x14   :  { %2103 = vmatprep.mubr.bf16.mxu0 %v14191_v1  ;;  %2745 = vmatprep.subr.bf16.mxu0 %v9944_v34  ;;  %v185_v21 = vpack.c.bf16 %v133_v18, %v132_v17  ;;  %v9956_v22 = vld [vmem:[%s14185_s1 + $0x138] ss:$8 sps:$4 sm:$0xff]   ;;  %v186_v26 = vpack.c.bf16 %v135_v25, %v134_v24  ;;  %v140_v35 = vld [vmem:[%s14186_s0 + $0x109] sm:$0xff] }
  0x15   :  { %v136_v28 = vld [vmem:[%s14186_s0 + $0xd9] sm:$0xff]  ;;  %v137_v29 = vld [vmem:[%s14186_s0 + $0xe1] sm:$0xff]  ;;  %v138_v31 = vld [vmem:[%s14186_s0 + $0xf1] sm:$0xff] }
  0x16   :  { %v10332_v30 = vpack.c.bf16 %v137_v29, %v136_v28  ;;  %v139_v33 = vld [vmem:[%s14186_s0 + $0xf9] sm:$0xff]  ;;  %v141_v36 = vld [vmem:[%s14186_s0 + $0x111] sm:$0xff]  ;;  %v142_v38 = vld [vmem:[%s14186_s0 + $0x121] sm:$0xff] }
  0x17   :  { %2746 = vmatpush1.bf16.msra.mxu0 %v9942_v40  ;;  %v10345_v34 = vpack.c.bf16 %v139_v33, %v138_v31  ;;  %v10358_v37 = vpack.c.bf16 %v141_v36, %v140_v35  ;;  %v143_v39 = vld [vmem:[%s14186_s0 + $0x129] sm:$0xff]  ;;  %v144_v46 = vld [vmem:[%s14186_s0 + $0x139] sm:$0xff]  ;;  %v149_v5 = vld [vmem:[%s14186_s0 + $0x1a1] sm:$0xff] }
  0x18   :  { %2747 = vmatprep.subr.bf16.mxu0 %v9947_v41  ;;  %v10371_v40 = vpack.c.bf16 %v143_v39, %v142_v38  ;;  %v9961_v41 = vld [vmem:[%s14185_s1 + $0x4] ss:$8 sps:$4 sm:$0xff]   ;;  %v9959_v42 = vld [vmem:[%s14185_s1] ss:$8 sps:$4 sm:$0xff]   ;;  %v9962_v50 = vld [vmem:[%s14185_s1 + $0x10] ss:$8 sps:$4 sm:$0xff]  }
  0x19   :  { %816 = vmatprep.subr.bf16.mxu1 %v9961_v41  ;;  %v9967_v56 = vld [vmem:[%s14185_s1 + $0x20] ss:$8 sps:$4 sm:$0xff]   ;;  %v117_v57 = vld [vmem:[%s14185_s1 + $0x30] sm:$0x33] }
  0x1a   :  { %7741 = vmatmul.mubr.msk.bf16.gmra.mrb[4].mxu1 %vm251_vm2, %v10186_v43  ;;  %7929 = vmatmul.mubr.msk.bf16.gmra.mrb[4].mxu0 %vm251_vm2, %v10188_v44  ;;  %v7776_v58 = vcombine.low %v117_v57, %v117_v57  ;;  %v7777_v59 = vcombine.high %v117_v57, %v117_v57  ;;  %v147_v62 = vld [vmem:[%s14186_s0 + $0x159] sm:$0xff]  ;;  %v150_v7 = vld [vmem:[%s14186_s0 + $0x1b1] sm:$0xff]  ;;  %v152_v11 = vld [vmem:[%s14186_s0 + $0x1c9] sm:$0xff] }
  0x1b   :  { %404 = vmatprep.mubr.bf16.mxu1 %v14191_v1  ;;  %2113 = vmatprep.mubr.bf16.mxu0 %v14191_v1  ;;  %v151_v8 = vld [vmem:[%s14186_s0 + $0x1b9] sm:$0xff]  ;;  %v153_v12 = vld [vmem:[%s14186_s0 + $0x1d1] sm:$0xff]  ;;  %v7986_v24 = vld [vmem:[%s14186_s0 + $0x169] sm:$0xff] }
  0x1c   :  { %2748 = vmatpush1.bf16.msra.mxu0 %v9945_v45  ;;  %v8129_v45 = vld [vmem:[%s14185_s1 + $0x148] sm:$0x33]  ;;  %817 = vmatpush1.bf16.msra.mxu1 %v9959_v42  ;;  %v814_v63 = vand.u32 %v7777_v59, %v10116_v14  ;;  %v811_v0 = vand.u32 %v7776_v58, %v10116_v14  ;;  %v156_v18 = vld [vmem:[%s14186_s0 + $0x1f9] sm:$0xff]  ;;  %v7987_v25 = vld [vmem:[%s14186_s0 + $0x171] sm:$0xff] }
  0x1d   :  { %2749 = vmatprep.subr.bf16.mxu0 %v2741_v47  ;;  %v145_v47 = vld [vmem:[%s14186_s0 + $0x141] sm:$0xff]  ;;  %v8136_v48 = vcombine.low %v8129_v45, %v8129_v45  ;;  %v8137_v49 = vcombine.high %v8129_v45, %v8129_v45  ;;  %v2588_v28 = vpack.c.bf16 %v7987_v25, %v7986_v24  ;;  %v9974_v29 = vld [vmem:[%s14185_s1 + $0x154] ss:$8 sps:$4 sm:$0xff]   ;;  %v163_v35 = vld [vmem:[%s14186_s0 + $0x249] sm:$0xff] }
  0x1e   :  { %v161_v31 = vld [vmem:[%s14186_s0 + $0x231] sm:$0xff]  ;;  %v165_v38 = vld [vmem:[%s14186_s0 + $0x261] sm:$0xff]  ;;  %v167_v41 = vld [vmem:[%s14186_s0 + $0x279] sm:$0xff] }
  0x1f   :  { %v3423_v51 = vand.u32 %v8137_v49, %v10116_v14  ;;  %v169_v45 = vld [vmem:[%s14186_s0 + $0x291] sm:$0xff]  ;;  %v176_v57 = vld [vmem:[%s14186_s0 + $0x2e9] sm:$0xff] }
  0x20   :  { %2750 = vmatpush1.bf16.msra.mxu0 %v2738_v52  ;;  %v3420_v52 = vand.u32 %v8136_v48, %v10116_v14  ;;  %v171_v48 = vld [vmem:[%s14186_s0 + $0x2a9] sm:$0xff]  ;;  %v177_v58 = vld [vmem:[%s14186_s0 + $0x2f1] sm:$0xff] }
  0x21   :  { %3425 = vmatprep.subr.bf16.mxu0 %v9952_v53  ;;  %v191_v53 = vpack.c.bf16 %v145_v47, %v144_v46  ;;  %v170_v47 = vld [vmem:[%s14186_s0 + $0x2a1] sm:$0xff]  ;;  %v207_v59 = vpack.c.bf16 %v177_v58, %v176_v57  ;;  %v8070_v25 = vld [vmem:[%s14186_s0 + $0x6a] sm:$0xff] }
  0x22   :  { %7742 = vmatmul.mubr.msk.bf16.gmra.mrb[8].mxu1 %vm251_vm2, %v180_v54  ;;  %7930 = vmatmul.mubr.msk.bf16.gmra.mrb[8].mxu0 %vm251_vm2, %v10216_v55  ;;  %v204_v49 = vpack.c.bf16 %v171_v48, %v170_v47  ;;  %v8069_v24 = vld [vmem:[%s14186_s0 + $0x62] sm:$0xff]  ;;  %v8078_v57 = vld [vmem:[%s14186_s0 + $0xca] sm:$0xff] }
  0x23   :  { %414 = vmatprep.mubr.bf16.mxu1 %v14191_v1  ;;  %2123 = vmatprep.mubr.bf16.mxu0 %v14191_v1 }
  0x2a   :  { %7743 = vmatmul.mubr.msk.bf16.gmra.mrb[12].mxu1 %vm251_vm2, %v181_v60  ;;  %7931 = vmatmul.mubr.msk.bf16.gmra.mrb[12].mxu0 %vm251_vm2, %v10235_v61 }
  0x2b   :  { %424 = vmatprep.mubr.bf16.mxu1 %v14191_v1  ;;  %2133 = vmatprep.mubr.bf16.mxu0 %v14191_v1 }
  0x32   :  { %7744 = vmatmul.mubr.msk.bf16.gmra.mrb[16].mxu1 %vm251_vm2, %v182_v3  ;;  %7932 = vmatmul.mubr.msk.bf16.gmra.mrb[16].mxu0 %vm251_vm2, %v10254_v4 }
  0x33   :  { %434 = vmatprep.mubr.bf16.mxu1 %v14191_v1  ;;  %2143 = vmatprep.mubr.bf16.mxu0 %v14191_v1 }
  0x3a   :  { %7745 = vmatmul.mubr.msk.bf16.gmra.mrb[20].mxu1 %vm251_vm2, %v183_v9  ;;  %7933 = vmatmul.mubr.msk.bf16.gmra.mrb[20].mxu0 %vm251_vm2, %v10273_v10 }
  0x3b   :  { %444 = vmatprep.mubr.bf16.mxu1 %v14191_v1  ;;  %2775 = vmatprep.mubr.bf16.mxu0 %v14191_v1 }
  0x42   :  { %7746 = vmatmul.mubr.msk.bf16.gmra.mrb[24].mxu1 %vm251_vm2, %v184_v13  ;;  %8033 = vmatmul.mubr.msk.bf16.vlgmr.msra.gmra.mrb[0].mxu0 %vm251_vm2, %v10186_v43  ;;  %v9964_v43 = vld [vmem:[%s14185_s1 + $0x14] ss:$8 sps:$4 sm:$0xff]  }
  0x43   :  { %3426 = vmatpush1.bf16.msra.mxu0 %v9950_v15  ;;  %454 = vmatprep.mubr.bf16.mxu1 %v14191_v1  ;;  %v154_v15 = vld [vmem:[%s14186_s0 + $0x1e1] sm:$0xff] }
  0x44   :  { %2785 = vmatprep.mubr.bf16.mxu0 %v14191_v1  ;;  %3427 = vmatprep.subr.bf16.mxu0 %v9955_v16  ;;  %v155_v16 = vld [vmem:[%s14186_s0 + $0x1e9] sm:$0xff] }
  0x45   :  { %818 = vmatprep.subr.bf16.mxu1 %v9964_v43  ;;  %v196_v17 = vpack.c.bf16 %v155_v16, %v154_v15  ;;  %v168_v43 = vld [vmem:[%s14186_s0 + $0x289] sm:$0xff]  ;;  %v37_v15 = vld [vmem:[%s14186_s0 + $0xc0] sm:$0xff] }
  0x46   :  { %819 = vmatpush1.bf16.msra.mxu1 %v9962_v50  ;;  %v203_v46 = vpack.c.bf16 %v169_v45, %v168_v43  ;;  %v172_v50 = vld [vmem:[%s14186_s0 + $0x2b9] sm:$0xff]  ;;  %v38_v16 = vld [vmem:[%s14186_s0 + $0xc8] sm:$0xff] }
  0x47   :  { %3428 = vmatpush1.bf16.msra.mxu0 %v9953_v19  ;;  %v157_v19 = vld [vmem:[%s14186_s0 + $0x201] sm:$0xff]  ;;  %v8075_v45 = vld [vmem:[%s14186_s0 + $0xaa] sm:$0xff] }
  0x48   :  { %3429 = vmatprep.subr.bf16.mxu0 %v9958_v20  ;;  %v197_v20 = vpack.c.bf16 %v157_v19, %v156_v18  ;;  %v8068_v18 = vld [vmem:[%s14186_s0 + $0x52] sm:$0xff]  ;;  %v10693_v19 = vpack.c.bf16 %v38_v16, %v37_v15  ;;  %v46_v43 = vld [vmem:[%s14186_s0 + $0x128] sm:$0xff] }
  0x49   :  { %v51_v16 = vld [vmem:[%s14186_s0 + $0x198] sm:$0xff] }
  0x4a   :  { %7747 = vmatmul.mubr.msk.bf16.gmra.mrb[28].mxu1 %vm251_vm2, %v185_v21  ;;  %8034 = vmatmul.mubr.msk.bf16.gmra.mrb[4].mxu0 %vm251_vm2, %v180_v54  ;;  %v9969_v54 = vld [vmem:[%s14185_s1 + $0x24] ss:$8 sps:$4 sm:$0xff]  }
  0x4b   :  { %464 = vmatprep.mubr.bf16.mxu1 %v14191_v1  ;;  %2795 = vmatprep.mubr.bf16.mxu0 %v14191_v1 }
  0x4c   :  { %3430 = vmatpush1.bf16.msra.mxu0 %v9956_v22  ;;  %820 = vmatprep.subr.bf16.mxu1 %v9969_v54  ;;  %v159_v22 = vld [vmem:[%s14186_s0 + $0x219] sm:$0xff] }
  0x4d   :  { %3431 = vmatprep.subr.bf16.mxu0 %v3423_v51  ;;  %821 = vmatpush1.bf16.msra.mxu1 %v9967_v56  ;;  %v173_v51 = vld [vmem:[%s14186_s0 + $0x2c1] sm:$0xff]  ;;  %v175_v54 = vld [vmem:[%s14186_s0 + $0x2d9] sm:$0xff] }
  0x4e   :  { %822 = vmatprep.subr.bf16.mxu1 %v814_v63 }
  0x50   :  { %3432 = vmatpush1.bf16.msra.mxu0 %v3420_v52  ;;  %v205_v52 = vpack.c.bf16 %v173_v51, %v172_v50  ;;  %v9981_v50 = vld [vmem:[%s14185_s1 + $0x70] ss:$8 sps:$4 sm:$0xff]  }
  0x51   :  { %823 = vmatpush1.bf16.msra.mxu1 %v811_v0  ;;  %4108 = vmatprep.subr.bf16.mxu0 %v9974_v29  ;;  %v8064_v0 = vld [vmem:[%s14186_s0 + $0x22] sm:$0xff]  ;;  %v41_v29 = vld [vmem:[%s14186_s0 + $0xf0] sm:$0xff]  ;;  %v47_v51 = vld [vmem:[%s14186_s0 + $0x138] sm:$0xff] }
  0x52   :  { %7748 = vmatmul.mubr.msk.bf16.gmra.mrb[32].mxu1 %vm251_vm2, %v186_v26  ;;  %8035 = vmatmul.mubr.msk.bf16.gmra.mrb[8].mxu0 %vm251_vm2, %v181_v60  ;;  %v146_v60 = vld [vmem:[%s14186_s0 + $0x151] sm:$0xff] }
  0x53   :  { %474 = vmatprep.mubr.bf16.mxu1 %v14191_v1  ;;  %2805 = vmatprep.mubr.bf16.mxu0 %v14191_v1  ;;  %v192_v2 = vpack.c.bf16 %v147_v62, %v146_v60  ;;  %v21_v60 = vld [vmem:[%s14186_s0] sm:$0xff]  ;;  %v22_v62 = vld [vmem:[%s14186_s0 + $0x8] sm:$0xff] }
  0x54   :  { %v81_v63 = vpack.c.bf16 %v22_v62, %v21_v60  ;;  %v9984_v60 = vld [vmem:[%s14185_s1 + $0x80] ss:$8 sps:$4 sm:$0xff]  }
  0x5a   :  { %7749 = vmatmul.mubr.msk.bf16.gmra.mrb[36].mxu1 %vm251_vm2, %v10332_v30  ;;  %8036 = vmatmul.mubr.msk.bf16.gmra.mrb[12].mxu0 %vm251_vm2, %v182_v3  ;;  %v148_v3 = vld [vmem:[%s14186_s0 + $0x199] sm:$0xff] }
  0x5b   :  { %484 = vmatprep.mubr.bf16.mxu1 %v14191_v1  ;;  %2815 = vmatprep.mubr.bf16.mxu0 %v14191_v1  ;;  %v193_v6 = vpack.c.bf16 %v149_v5, %v148_v3  ;;  %v9977_v3 = vld [vmem:[%s14185_s1 + $0x164] ss:$8 sps:$4 sm:$0xff]  }
  0x5c   :  { %v35_v5 = vld [vmem:[%s14186_s0 + $0xa8] sm:$0xff] }
  0x62   :  { %7750 = vmatmul.mubr.msk.bf16.gmra.mrb[40].mxu1 %vm251_vm2, %v10345_v34  ;;  %8037 = vmatmul.mubr.msk.bf16.gmra.mrb[16].mxu0 %vm251_vm2, %v183_v9  ;;  %v194_v9 = vpack.c.bf16 %v151_v8, %v150_v7  ;;  %v8065_v7 = vld [vmem:[%s14186_s0 + $0x32] sm:$0xff]  ;;  %v9975_v8 = vld [vmem:[%s14185_s1 + $0x160] ss:$8 sps:$4 sm:$0xff]  }
  0x63   :  { %494 = vmatprep.mubr.bf16.mxu1 %v14191_v1  ;;  %2825 = vmatprep.mubr.bf16.mxu0 %v14191_v1 }
  0x6a   :  { %7751 = vmatmul.mubr.msk.bf16.gmra.mrb[44].mxu1 %vm251_vm2, %v10358_v37  ;;  %8038 = vmatmul.mubr.msk.bf16.gmra.mrb[20].mxu0 %vm251_vm2, %v184_v13  ;;  %v195_v13 = vpack.c.bf16 %v153_v12, %v152_v11 }
  0x6b   :  { %504 = vmatprep.mubr.bf16.mxu1 %v14191_v1  ;;  %2835 = vmatprep.mubr.bf16.mxu0 %v14191_v1 }
  0x72   :  { %7752 = vmatmul.mubr.msk.bf16.gmra.mrb[48].mxu1 %vm251_vm2, %v10371_v40  ;;  %8039 = vmatmul.mubr.msk.bf16.gmra.mrb[24].mxu0 %vm251_vm2, %v185_v21  ;;  %v158_v21 = vld [vmem:[%s14186_s0 + $0x211] sm:$0xff] }
  0x73   :  { %514 = vmatprep.mubr.bf16.mxu1 %v14191_v1  ;;  %2845 = vmatprep.mubr.bf16.mxu0 %v14191_v1 }
  0x7a   :  { %7753 = vmatmul.mubr.msk.bf16.gmra.mrb[52].mxu1 %vm251_vm2, %v191_v53  ;;  %8040 = vmatmul.mubr.msk.bf16.gmra.mrb[28].mxu0 %vm251_vm2, %v186_v26  ;;  %v198_v26 = vpack.c.bf16 %v159_v22, %v158_v21  ;;  %v39_v21 = vld [vmem:[%s14186_s0 + $0xd8] sm:$0xff]  ;;  %v40_v22 = vld [vmem:[%s14186_s0 + $0xe0] sm:$0xff] }
  0x7b   :  { %524 = vmatprep.mubr.bf16.mxu1 %v14191_v1  ;;  %2855 = vmatprep.mubr.bf16.mxu0 %v14191_v1 }
  0x82   :  { %7754 = vmatmul.mubr.msk.bf16.gmra.mrb[56].mxu1 %vm251_vm2, %v192_v2  ;;  %8041 = vmatmul.mubr.msk.bf16.gmra.mrb[32].mxu0 %vm251_vm2, %v10332_v30  ;;  %v160_v30 = vld [vmem:[%s14186_s0 + $0x229] sm:$0xff] }
  0x83   :  { %534 = vmatprep.mubr.bf16.mxu1 %v14191_v1  ;;  %2865 = vmatprep.mubr.bf16.mxu0 %v14191_v1  ;;  %v199_v33 = vpack.c.bf16 %v161_v31, %v160_v30  ;;  %v42_v30 = vld [vmem:[%s14186_s0 + $0xf8] sm:$0xff] }
  0x84   :  { %v8071_v31 = vld [vmem:[%s14186_s0 + $0x7a] sm:$0xff] }
  0x8a   :  { %7755 = vmatmul.mubr.msk.bf16.gmra.mrb[60].mxu1 %vm251_vm2, %v193_v6  ;;  %8042 = vmatmul.mubr.msk.bf16.gmra.mrb[36].mxu0 %vm251_vm2, %v10345_v34  ;;  %v162_v34 = vld [vmem:[%s14186_s0 + $0x241] sm:$0xff]  ;;  %v36_v6 = vld [vmem:[%s14186_s0 + $0xb0] sm:$0xff] }
  0x8b   :  { %544 = vmatprep.mubr.bf16.mxu1 %v14191_v1  ;;  %2875 = vmatprep.mubr.bf16.mxu0 %v14191_v1  ;;  %v200_v36 = vpack.c.bf16 %v163_v35, %v162_v34  ;;  %v10668_v11 = vpack.c.bf16 %v36_v6, %v35_v5  ;;  %v10737_v34 = vpack.c.bf16 %v42_v30, %v41_v29  ;;  %v50_v6 = vld [vmem:[%s14186_s0 + $0x158] sm:$0xff]  ;;  %v53_v29 = vld [vmem:[%s14186_s0 + $0x1b0] sm:$0xff] }
  0x8c   :  { %v54_v30 = vld [vmem:[%s14186_s0 + $0x1b8] sm:$0xff] }
  0x92   :  { %7756 = vmatmul.mubr.msk.bf16.gmra.mrb[64].mxu1 %vm251_vm2, %v194_v9  ;;  %8043 = vmatmul.mubr.msk.bf16.gmra.mrb[40].mxu0 %vm251_vm2, %v10358_v37  ;;  %v164_v37 = vld [vmem:[%s14186_s0 + $0x259] sm:$0xff] }
  0x93   :  { %554 = vmatprep.mubr.bf16.mxu1 %v14191_v1  ;;  %2885 = vmatprep.mubr.bf16.mxu0 %v14191_v1  ;;  %v201_v39 = vpack.c.bf16 %v165_v38, %v164_v37  ;;  %v44_v37 = vld [vmem:[%s14186_s0 + $0x110] sm:$0xff] }
  0x94   :  { %v8073_v38 = vld [vmem:[%s14186_s0 + $0x92] sm:$0xff] }
  0x9a   :  { %7757 = vmatmul.mubr.msk.bf16.gmra.mrb[68].mxu1 %vm251_vm2, %v195_v13  ;;  %8044 = vmatmul.mubr.msk.bf16.gmra.mrb[44].mxu0 %vm251_vm2, %v10371_v40  ;;  %v166_v40 = vld [vmem:[%s14186_s0 + $0x271] sm:$0xff] }
  0x9b   :  { %564 = vmatprep.mubr.bf16.mxu1 %v14191_v1  ;;  %2895 = vmatprep.mubr.bf16.mxu0 %v14191_v1  ;;  %v202_v42 = vpack.c.bf16 %v167_v41, %v166_v40 }
  0xa2   :  { %7758 = vmatmul.mubr.msk.bf16.gmra.mrb[72].mxu1 %vm251_vm2, %v196_v17  ;;  %8045 = vmatmul.mubr.msk.bf16.gmra.mrb[48].mxu0 %vm251_vm2, %v191_v53  ;;  %v174_v53 = vld [vmem:[%s14186_s0 + $0x2d1] sm:$0xff] }
  0xa3   :  { %574 = vmatprep.mubr.bf16.mxu1 %v14191_v1  ;;  %2905 = vmatprep.mubr.bf16.mxu0 %v14191_v1  ;;  %v206_v56 = vpack.c.bf16 %v175_v54, %v174_v53  ;;  %v8234_v53 = vld [vmem:[%s14185_s1 + $0x180] sm:$0x33] }
  0xa4   :  { %v48_v54 = vld [vmem:[%s14186_s0 + $0x140] sm:$0xff]  ;;  %v8241_v58 = vcombine.low %v8234_v53, %v8234_v53 }
  0xaa   :  { %7759 = vmatmul.mubr.msk.bf16.gmra.mrb[76].mxu1 %vm251_vm2, %v197_v20  ;;  %8046 = vmatmul.mubr.msk.bf16.gmra.mrb[52].mxu0 %vm251_vm2, %v192_v2 }
  0xab   :  { %584 = vmatprep.mubr.bf16.mxu1 %v14191_v1  ;;  %2915 = vmatprep.mubr.bf16.mxu0 %v14191_v1 }
  0xb2   :  { %7760 = vmatmul.mubr.msk.bf16.gmra.mrb[80].mxu1 %vm251_vm2, %v198_v26  ;;  %8047 = vmatmul.mubr.msk.bf16.gmra.mrb[56].mxu0 %vm251_vm2, %v2588_v28  ;;  %v10717_v28 = vpack.c.bf16 %v8070_v25, %v8069_v24 }
  0xb3   :  { %594 = vmatprep.mubr.bf16.mxu1 %v14191_v1  ;;  %2925 = vmatprep.mubr.bf16.mxu0 %v14191_v1 }
  0xba   :  { %7761 = vmatmul.mubr.msk.bf16.gmra.mrb[84].mxu1 %vm251_vm2, %v199_v33  ;;  %8048 = vmatmul.mubr.msk.bf16.gmra.mrb[60].mxu0 %vm251_vm2, %v194_v9  ;;  %v9980_v9 = vld [vmem:[%s14185_s1 + $0x174] ss:$8 sps:$4 sm:$0xff]  }
  0xbb   :  { %604 = vmatprep.mubr.bf16.mxu1 %v14191_v1  ;;  %2935 = vmatprep.mubr.bf16.mxu0 %v14191_v1 }
  0xc2   :  { %7762 = vmatmul.mubr.msk.bf16.gmra.mrb[88].mxu1 %vm251_vm2, %v200_v36  ;;  %8049 = vmatmul.mubr.msk.bf16.gmra.mrb[64].mxu0 %vm251_vm2, %v195_v13  ;;  %v9978_v13 = vld [vmem:[%s14185_s1 + $0x170] ss:$8 sps:$4 sm:$0xff]  }
  0xc3   :  { %614 = vmatprep.mubr.bf16.mxu1 %v14191_v1  ;;  %2945 = vmatprep.mubr.bf16.mxu0 %v14191_v1 }
  0xca   :  { %7763 = vmatmul.mubr.msk.bf16.gmra.mrb[92].mxu1 %vm251_vm2, %v201_v39  ;;  %8050 = vmatmul.mubr.msk.bf16.gmra.mrb[68].mxu0 %vm251_vm2, %v196_v17  ;;  %v8067_v17 = vld [vmem:[%s14186_s0 + $0x4a] sm:$0xff] }
  0xcb   :  { %624 = vmatprep.mubr.bf16.mxu1 %v14191_v1  ;;  %2955 = vmatprep.mubr.bf16.mxu0 %v14191_v1 }
  0xd2   :  { %7764 = vmatmul.mubr.msk.bf16.gmra.mrb[96].mxu1 %vm251_vm2, %v202_v42  ;;  %8051 = vmatmul.mubr.msk.bf16.gmra.mrb[72].mxu0 %vm251_vm2, %v197_v20  ;;  %v10695_v20 = vpack.c.bf16 %v8068_v18, %v8067_v17  ;;  %v52_v17 = vld [vmem:[%s14186_s0 + $0x1a0] sm:$0xff]  ;;  %v8081_v18 = vld [vmem:[%s14186_s0 + $0xf2] sm:$0xff] }
  0xd3   :  { %634 = vmatprep.mubr.bf16.mxu1 %v14191_v1  ;;  %2965 = vmatprep.mubr.bf16.mxu0 %v14191_v1  ;;  %v96_v24 = vpack.c.bf16 %v52_v17, %v51_v16  ;;  %v65_v17 = vld [vmem:[%s14186_s0 + $0x240] sm:$0xff] }
  0xda   :  { %7765 = vmatmul.mubr.msk.bf16.gmra.mrb[100].mxu1 %vm251_vm2, %v203_v46  ;;  %8052 = vmatmul.mubr.msk.bf16.gmra.mrb[76].mxu0 %vm251_vm2, %v198_v26  ;;  %v10715_v26 = vpack.c.bf16 %v40_v22, %v39_v21  ;;  %v8082_v21 = vld [vmem:[%s14186_s0 + $0xfa] sm:$0xff]  ;;  %v10042_v22 = vld [vmem:[%s14185_s1 + $0xac] ss:$8 sps:$4 sm:$0xff]  }
  0xdb   :  { %644 = vmatprep.mubr.bf16.mxu1 %v14191_v1  ;;  %2975 = vmatprep.mubr.bf16.mxu0 %v14191_v1  ;;  %v10878_v25 = vpack.c.bf16 %v8082_v21, %v8081_v18  ;;  %v66_v18 = vld [vmem:[%s14186_s0 + $0x248] sm:$0xff] }
  0xdc   :  { %v8095_v21 = vld [vmem:[%s14186_s0 + $0x1ca] sm:$0xff] }
  0xe2   :  { %7766 = vmatmul.mubr.msk.bf16.gmra.mrb[104].mxu1 %vm251_vm2, %v204_v49  ;;  %8053 = vmatmul.mubr.msk.bf16.gmra.mrb[80].mxu0 %vm251_vm2, %v199_v33  ;;  %v8072_v33 = vld [vmem:[%s14186_s0 + $0x82] sm:$0xff] }
  0xe3   :  { %654 = vmatprep.mubr.bf16.mxu1 %v14191_v1  ;;  %2985 = vmatprep.mubr.bf16.mxu0 %v14191_v1  ;;  %v10739_v35 = vpack.c.bf16 %v8072_v33, %v8071_v31  ;;  %v8083_v31 = vld [vmem:[%s14186_s0 + $0x10a] sm:$0xff]  ;;  %v8084_v33 = vld [vmem:[%s14186_s0 + $0x112] sm:$0xff] }
  0xea   :  { %7767 = vmatmul.mubr.msk.bf16.gmra.mrb[108].mxu1 %vm251_vm2, %v205_v52  ;;  %8054 = vmatmul.mubr.msk.bf16.gmra.mrb[84].mxu0 %vm251_vm2, %v200_v36  ;;  %v43_v36 = vld [vmem:[%s14186_s0 + $0x108] sm:$0xff] }
  0xeb   :  { %664 = vmatprep.mubr.bf16.mxu1 %v14191_v1  ;;  %2995 = vmatprep.mubr.bf16.mxu0 %v14191_v1  ;;  %v10759_v40 = vpack.c.bf16 %v44_v37, %v43_v36  ;;  %v97_v36 = vpack.c.bf16 %v54_v30, %v53_v29  ;;  %v10897_v37 = vpack.c.bf16 %v8084_v33, %v8083_v31  ;;  %v67_v30 = vld [vmem:[%s14186_s0 + $0x258] sm:$0xff]  ;;  %v68_v31 = vld [vmem:[%s14186_s0 + $0x260] sm:$0xff] }
  0xec   :  { %v8097_v33 = vld [vmem:[%s14186_s0 + $0x1e2] sm:$0xff] }
  0xf2   :  { %7768 = vmatmul.mubr.msk.bf16.gmra.mrb[112].mxu1 %vm251_vm2, %v206_v56  ;;  %8055 = vmatmul.mubr.msk.bf16.gmra.mrb[88].mxu0 %vm251_vm2, %v201_v39  ;;  %v8074_v39 = vld [vmem:[%s14186_s0 + $0x9a] sm:$0xff] }
  0xf3   :  { %674 = vmatprep.mubr.bf16.mxu1 %v14191_v1  ;;  %3005 = vmatprep.mubr.bf16.mxu0 %v14191_v1  ;;  %v10761_v41 = vpack.c.bf16 %v8074_v39, %v8073_v38  ;;  %v55_v38 = vld [vmem:[%s14186_s0 + $0x1c8] sm:$0xff]  ;;  %v56_v39 = vld [vmem:[%s14186_s0 + $0x1d0] sm:$0xff] }
  0xfa   :  { %7769 = vmatmul.mubr.msk.bf16.gmra.mrb[116].mxu1 %vm251_vm2, %v207_v59  ;;  %8056 = vmatmul.mubr.msk.bf16.gmra.mrb[92].mxu0 %vm251_vm2, %v202_v42  ;;  %v45_v42 = vld [vmem:[%s14186_s0 + $0x120] sm:$0xff] }
  0xfb   :  { %848 = vmatprep.mubr.bf16.mxu1 %v14191_v1  ;;  %3015 = vmatprep.mubr.bf16.mxu0 %v14191_v1  ;;  %v10781_v47 = vpack.c.bf16 %v46_v43, %v45_v42  ;;  %v8085_v42 = vld [vmem:[%s14186_s0 + $0x122] sm:$0xff]  ;;  %v8086_v43 = vld [vmem:[%s14186_s0 + $0x12a] sm:$0xff] }
 0x102   :  { %7778 = vmatmul.mubr.msk.bf16.vlgmr.msra.gmra.mrb[0].mxu1 %vm251_vm2, %v81_v63  ;;  %8057 = vmatmul.mubr.msk.bf16.gmra.mrb[96].mxu0 %vm251_vm2, %v203_v46  ;;  %v8076_v46 = vld [vmem:[%s14186_s0 + $0xb2] sm:$0xff]  ;;  %v4103_v63 = vand.u32 %v8241_v58, %v10116_v14 }
 0x103   :  { %858 = vmatprep.mubr.bf16.mxu1 %v14191_v1  ;;  %3025 = vmatprep.mubr.bf16.mxu0 %v14191_v1  ;;  %v10783_v48 = vpack.c.bf16 %v8076_v46, %v8075_v45  ;;  %v10916_v45 = vpack.c.bf16 %v56_v39, %v55_v38  ;;  %v10918_v46 = vpack.c.bf16 %v8086_v43, %v8085_v42  ;;  %v8089_v58 = vld [vmem:[%s14186_s0 + $0x152] sm:$0xff] }
 0x104   :  { %v11048_v38 = vpack.c.bf16 %v68_v31, %v67_v30  ;;  %v69_v42 = vld [vmem:[%s14186_s0 + $0x270] sm:$0xff]  ;;  %v70_v43 = vld [vmem:[%s14186_s0 + $0x278] sm:$0xff] }
 0x105   :  { %v77_v30 = vld [vmem:[%s14186_s0 + $0x2d0] sm:$0xff]  ;;  %v78_v31 = vld [vmem:[%s14186_s0 + $0x2d8] sm:$0xff] }
 0x10a   :  { %7779 = vmatmul.mubr.msk.bf16.gmra.mrb[4].mxu1 %vm251_vm2, %v10151_v32  ;;  %8058 = vmatmul.mubr.msk.bf16.gmra.mrb[100].mxu0 %vm251_vm2, %v204_v49  ;;  %v8016_v32 = vld [vmem:[%s14186_s0 + $0x301] sm:$0xff]  ;;  %v9983_v49 = vld [vmem:[%s14185_s1 + $0x74] ss:$8 sps:$4 sm:$0xff]  }
 0x10b   :  { %868 = vmatprep.mubr.bf16.mxu1 %v14191_v1  ;;  %3035 = vmatprep.mubr.bf16.mxu0 %v14191_v1 }
 0x10c   :  { %1378 = vmatprep.subr.bf16.mxu1 %v9983_v49  ;;  %v57_v49 = vld [vmem:[%s14186_s0 + $0x1e0] sm:$0xff] }
 0x10d   :  { %1379 = vmatpush1.bf16.msra.mxu1 %v9981_v50  ;;  %v58_v50 = vld [vmem:[%s14186_s0 + $0x1e8] sm:$0xff] }
 0x112   :  { %7780 = vmatmul.mubr.msk.bf16.gmra.mrb[8].mxu1 %vm251_vm2, %v10188_v44  ;;  %8059 = vmatmul.mubr.msk.bf16.gmra.mrb[104].mxu0 %vm251_vm2, %v205_v52  ;;  %v8017_v44 = vld [vmem:[%s14186_s0 + $0x309] sm:$0xff] }
 0x113   :  { %878 = vmatprep.mubr.bf16.mxu1 %v14191_v1  ;;  %3045 = vmatprep.mubr.bf16.mxu0 %v14191_v1  ;;  %v9986_v52 = vld [vmem:[%s14185_s1 + $0x84] ss:$8 sps:$4 sm:$0xff]  }
 0x114   :  { %1380 = vmatprep.subr.bf16.mxu1 %v9986_v52  ;;  %v8088_v52 = vld [vmem:[%s14186_s0 + $0x142] sm:$0xff] }
 0x115   :  { %1381 = vmatpush1.bf16.msra.mxu1 %v9984_v60 }
 0x11a   :  { %7781 = vmatmul.mubr.msk.bf16.gmra.mrb[12].mxu1 %vm251_vm2, %v10216_v55  ;;  %8060 = vmatmul.mubr.msk.bf16.gmra.mrb[108].mxu0 %vm251_vm2, %v206_v56  ;;  %v2603_v55 = vpack.c.bf16 %v8017_v44, %v8016_v32  ;;  %v8077_v56 = vld [vmem:[%s14186_s0 + $0xc2] sm:$0xff]  ;;  %v10820_v32 = vpack.c.bf16 %v48_v54, %v47_v51  ;;  %v8087_v51 = vld [vmem:[%s14186_s0 + $0x13a] sm:$0xff] }
 0x11b   :  { %888 = vmatprep.mubr.bf16.mxu1 %v14191_v1  ;;  %3055 = vmatprep.mubr.bf16.mxu0 %v14191_v1  ;;  %v10822_v44 = vpack.c.bf16 %v8078_v57, %v8077_v56  ;;  %v10940_v54 = vpack.c.bf16 %v8088_v52, %v8087_v51  ;;  %v59_v56 = vld [vmem:[%s14186_s0 + $0x1f8] sm:$0xff]  ;;  %v60_v57 = vld [vmem:[%s14186_s0 + $0x200] sm:$0xff]  ;;  %v11070_v51 = vpack.c.bf16 %v70_v43, %v69_v42 }
 0x11c   :  { %v10960_v60 = vpack.c.bf16 %v60_v57, %v59_v56  ;;  %v71_v56 = vld [vmem:[%s14186_s0 + $0x288] sm:$0xff]  ;;  %v72_v57 = vld [vmem:[%s14186_s0 + $0x290] sm:$0xff]  ;;  %v11158_v42 = vpack.c.bf16 %v78_v31, %v77_v30  ;;  %v10044_v31 = vld [vmem:[%s14185_s1 + $0xbc] ss:$8 sps:$4 sm:$0xff]  }
 0x11d   :  { %v10043_v30 = vld [vmem:[%s14185_s1 + $0xa8] ss:$8 sps:$4 sm:$0xff]  }
 0x122   :  { %7782 = vmatmul.mubr.msk.bf16.gmra.mrb[16].mxu1 %vm251_vm2, %v10235_v61  ;;  %8061 = vmatmul.mubr.msk.bf16.gmra.mrb[112].mxu0 %vm251_vm2, %v207_v59  ;;  %v8063_v61 = vld [vmem:[%s14186_s0 + $0x1a] sm:$0xff]  ;;  %v8242_v59 = vcombine.high %v8234_v53, %v8234_v53  ;;  %v10938_v53 = vpack.c.bf16 %v58_v50, %v57_v49  ;;  %v8100_v50 = vld [vmem:[%s14186_s0 + $0x202] sm:$0xff] }
 0x123   :  { %898 = vmatprep.mubr.bf16.mxu1 %v14191_v1  ;;  %3065 = vmatprep.mubr.bf16.mxu0 %v14191_v1  ;;  %v10636_v2 = vpack.c.bf16 %v8064_v0, %v8063_v61  ;;  %v9989_v61 = vld [vmem:[%s14185_s1 + $0x90] ss:$8 sps:$4 sm:$0xff]   ;;  %v7814_v0 = vld [vmem:[%s14185_s1 + $0xa0] sm:$0x33] }
 0x124   :  { %v4106_v62 = vand.u32 %v8242_v59, %v10116_v14  ;;  %v7822_v5 = vcombine.high %v7814_v0, %v7814_v0  ;;  %v8090_v59 = vld [vmem:[%s14186_s0 + $0x15a] sm:$0xff] }
 0x125   :  { %v8099_v49 = vld [vmem:[%s14186_s0 + $0x1fa] sm:$0xff] }
 0x126   :  { %v11072_v52 = vpack.c.bf16 %v8100_v50, %v8099_v49  ;;  %v79_v49 = vld [vmem:[%s14186_s0 + $0x2e8] sm:$0xff]  ;;  %v80_v50 = vld [vmem:[%s14186_s0 + $0x2f0] sm:$0xff] }
 0x12a   :  { %7783 = vmatmul.mubr.msk.bf16.gmra.mrb[20].mxu1 %vm251_vm2, %v10254_v4  ;;  %8062 = vmatmul.mubr.msk.bf16.gmra.mrb[116].mxu0 %vm251_vm2, %v2603_v55  ;;  %v9972_v4 = vld [vmem:[%s14185_s1 + $0x150] ss:$8 sps:$4 sm:$0xff]   ;;  %v9991_v55 = vld [vmem:[%s14185_s1 + $0x94] ss:$8 sps:$4 sm:$0xff]  }
 0x12b   :  { %908 = vmatprep.mubr.bf16.mxu1 %v14191_v1  ;;  %3457 = vmatprep.mubr.bf16.mxu0 %v14191_v1 }
 0x12c   :  { %1382 = vmatprep.subr.bf16.mxu1 %v9991_v55  ;;  %v62_v55 = vld [vmem:[%s14186_s0 + $0x218] sm:$0xff] }
 0x12d   :  { %1383 = vmatpush1.bf16.msra.mxu1 %v9989_v61  ;;  %v8091_v61 = vld [vmem:[%s14186_s0 + $0x16a] sm:$0xff] }
 0x132   :  { %7784 = vmatmul.mubr.msk.bf16.gmra.mrb[24].mxu1 %vm251_vm2, %v10273_v10  ;;  %8138 = vmatmul.mubr.msk.bf16.vlgmr.msra.gmra.mrb[0].mxu0 %vm251_vm2, %v10636_v2  ;;  %v8066_v10 = vld [vmem:[%s14186_s0 + $0x3a] sm:$0xff] }
 0x133   :  { %4109 = vmatpush1.bf16.msra.mxu0 %v9972_v4  ;;  %918 = vmatprep.mubr.bf16.mxu1 %v14191_v1  ;;  %v10670_v12 = vpack.c.bf16 %v8066_v10, %v8065_v7  ;;  %v49_v4 = vld [vmem:[%s14186_s0 + $0x150] sm:$0xff]  ;;  %v8079_v7 = vld [vmem:[%s14186_s0 + $0xda] sm:$0xff]  ;;  %v8080_v10 = vld [vmem:[%s14186_s0 + $0xe2] sm:$0xff] }
 0x134   :  { %3467 = vmatprep.mubr.bf16.mxu0 %v14191_v1  ;;  %4110 = vmatprep.subr.bf16.mxu0 %v9977_v3  ;;  %v7821_v3 = vcombine.low %v7814_v0, %v7814_v0  ;;  %v10855_v15 = vpack.c.bf16 %v8080_v10, %v8079_v7  ;;  %v8092_v0 = vld [vmem:[%s14186_s0 + $0x172] sm:$0xff] }
 0x135   :  { %v64_v7 = vld [vmem:[%s14186_s0 + $0x230] sm:$0xff] }
 0x136   :  { %v8093_v10 = vld [vmem:[%s14186_s0 + $0x1b2] sm:$0xff] }
 0x137   :  { %4111 = vmatpush1.bf16.msra.mxu0 %v9975_v8  ;;  %v1376_v8 = vand.u32 %v7822_v5, %v10116_v14  ;;  %v63_v5 = vld [vmem:[%s14186_s0 + $0x228] sm:$0xff] }
 0x138   :  { %4112 = vmatprep.subr.bf16.mxu0 %v9980_v9  ;;  %v1373_v9 = vand.u32 %v7821_v3, %v10116_v14  ;;  %v3270_v3 = vpack.c.bf16 %v8092_v0, %v8091_v61  ;;  %v73_v61 = vld [vmem:[%s14186_s0 + $0x2a0] sm:$0xff]  ;;  %v74_v0 = vld [vmem:[%s14186_s0 + $0x2a8] sm:$0xff] }
 0x139   :  { %1384 = vmatprep.subr.bf16.mxu1 %v1376_v8  ;;  %v8094_v8 = vld [vmem:[%s14186_s0 + $0x1ba] sm:$0xff] }
 0x13a   :  { %7785 = vmatmul.mubr.msk.bf16.gmra.mrb[28].mxu1 %vm251_vm2, %v10668_v11  ;;  %8139 = vmatmul.mubr.msk.bf16.gmra.mrb[4].mxu0 %vm251_vm2, %v10670_v12  ;;  %v11006_v16 = vpack.c.bf16 %v8094_v8, %v8093_v10  ;;  %v75_v10 = vld [vmem:[%s14186_s0 + $0x2b8] sm:$0xff]  ;;  %v76_v8 = vld [vmem:[%s14186_s0 + $0x2c0] sm:$0xff] }
 0x13b   :  { %928 = vmatprep.mubr.bf16.mxu1 %v14191_v1  ;;  %3477 = vmatprep.mubr.bf16.mxu0 %v14191_v1 }
 0x13c   :  { %4113 = vmatpush1.bf16.msra.mxu0 %v9978_v13  ;;  %v10853_v13 = vpack.c.bf16 %v50_v6, %v49_v4  ;;  %1385 = vmatpush1.bf16.msra.mxu1 %v1373_v9  ;;  %v9996_v6 = vld [vmem:[%s14185_s1 + $0x18c] ss:$8 sps:$4 sm:$0xff]   ;;  %v11004_v9 = vpack.c.bf16 %v64_v7, %v63_v5 }
 0x13d   :  { %4114 = vmatprep.subr.bf16.mxu0 %v4106_v62  ;;  %8939 = vmatprep.subr.bf16.mxu1 %v10042_v22  ;;  %v10962_v62 = vpack.c.bf16 %v8090_v59, %v8089_v58  ;;  %v8096_v22 = vld [vmem:[%s14186_s0 + $0x1d2] sm:$0xff]  ;;  %v8102_v59 = vld [vmem:[%s14186_s0 + $0x21a] sm:$0xff] }
 0x13e   :  { %v11028_v29 = vpack.c.bf16 %v8096_v22, %v8095_v21  ;;  %v8101_v58 = vld [vmem:[%s14186_s0 + $0x212] sm:$0xff]  ;;  %v11136_v21 = vpack.c.bf16 %v76_v8, %v75_v10 }
 0x13f   :  { %v8104_v5 = vld [vmem:[%s14186_s0 + $0x232] sm:$0xff] }
 0x140   :  { %4115 = vmatpush1.bf16.msra.mxu0 %v4103_v63  ;;  %v61_v63 = vld [vmem:[%s14186_s0 + $0x210] sm:$0xff] }
 0x141   :  { %v10982_v4 = vpack.c.bf16 %v62_v55, %v61_v63  ;;  %4790 = vmatprep.subr.bf16.mxu0 %v9996_v6  ;;  %v11092_v63 = vpack.c.bf16 %v72_v57, %v71_v56  ;;  %v11094_v55 = vpack.c.bf16 %v8102_v59, %v8101_v58  ;;  %v11114_v6 = vpack.c.bf16 %v74_v0, %v73_v61  ;;  %v8109_v56 = vld [vmem:[%s14186_s0 + $0x272] sm:$0xff]  ;;  %v8110_v57 = vld [vmem:[%s14186_s0 + $0x27a] sm:$0xff]  ;;  %v1149_v61 = vld [vmem:[%s14186_s0 + $0x2] sm:$0xff] }
 0x142   :  { %7786 = vmatmul.mubr.msk.bf16.gmra.mrb[32].mxu1 %vm251_vm2, %v10693_v19  ;;  %8140 = vmatmul.mubr.msk.bf16.gmra.mrb[8].mxu0 %vm251_vm2, %v10695_v20  ;;  %v11180_v58 = vpack.c.bf16 %v80_v50, %v79_v49  ;;  %v11182_v59 = vpack.c.bf16 %v8110_v57, %v8109_v56  ;;  %v1150_v0 = vld [vmem:[%s14186_s0 + $0xa] sm:$0xff]  ;;  %v8115_v50 = vld [vmem:[%s14186_s0 + $0x2ba] sm:$0xff]  ;;  %v8116_v56 = vld [vmem:[%s14186_s0 + $0x2c2] sm:$0xff] }
 0x143   :  { %938 = vmatprep.mubr.bf16.mxu1 %v14191_v1  ;;  %3487 = vmatprep.mubr.bf16.mxu0 %v14191_v1  ;;  %v1209_v10 = vpack.c.bf16 %v1150_v0, %v1149_v61  ;;  %v10046_v49 = vld [vmem:[%s14185_s1 + $0xcc] ss:$8 sps:$4 sm:$0xff]   ;;  %v10047_v57 = vld [vmem:[%s14185_s1 + $0xc8] ss:$8 sps:$4 sm:$0xff]  }
 0x144   :  { %v8117_v61 = vld [vmem:[%s14186_s0 + $0x2d2] sm:$0xff] }
 0x14a   :  { %7787 = vmatmul.mubr.msk.bf16.gmra.mrb[36].mxu1 %vm251_vm2, %v10715_v26  ;;  %8141 = vmatmul.mubr.msk.bf16.gmra.mrb[12].mxu0 %vm251_vm2, %v10717_v28 }
 0x14b   :  { %948 = vmatprep.mubr.bf16.mxu1 %v14191_v1  ;;  %3497 = vmatprep.mubr.bf16.mxu0 %v14191_v1 }
 0x152   :  { %7788 = vmatmul.mubr.msk.bf16.gmra.mrb[40].mxu1 %vm251_vm2, %v10737_v34  ;;  %8142 = vmatmul.mubr.msk.bf16.gmra.mrb[16].mxu0 %vm251_vm2, %v10739_v35 }
 0x153   :  { %958 = vmatprep.mubr.bf16.mxu1 %v14191_v1  ;;  %3507 = vmatprep.mubr.bf16.mxu0 %v14191_v1 }
 0x15a   :  { %7789 = vmatmul.mubr.msk.bf16.gmra.mrb[44].mxu1 %vm251_vm2, %v10759_v40  ;;  %8143 = vmatmul.mubr.msk.bf16.gmra.mrb[20].mxu0 %vm251_vm2, %v10761_v41 }
 0x15b   :  { %968 = vmatprep.mubr.bf16.mxu1 %v14191_v1  ;;  %3517 = vmatprep.mubr.bf16.mxu0 %v14191_v1 }
 0x162   :  { %7790 = vmatmul.mubr.msk.bf16.gmra.mrb[48].mxu1 %vm251_vm2, %v10781_v47  ;;  %8144 = vmatmul.mubr.msk.bf16.gmra.mrb[24].mxu0 %vm251_vm2, %v10783_v48 }
 0x163   :  { %978 = vmatprep.mubr.bf16.mxu1 %v14191_v1  ;;  %3527 = vmatprep.mubr.bf16.mxu0 %v14191_v1 }
 0x16a   :  { %7791 = vmatmul.mubr.msk.bf16.gmra.mrb[52].mxu1 %vm251_vm2, %v10820_v32  ;;  %8145 = vmatmul.mubr.msk.bf16.gmra.mrb[28].mxu0 %vm251_vm2, %v10822_v44 }
 0x16b   :  { %988 = vmatprep.mubr.bf16.mxu1 %v14191_v1  ;;  %3537 = vmatprep.mubr.bf16.mxu0 %v14191_v1 }
 0x172   :  { %7792 = vmatmul.mubr.msk.bf16.gmra.mrb[56].mxu1 %vm251_vm2, %v10853_v13  ;;  %8146 = vmatmul.mubr.msk.bf16.gmra.mrb[32].mxu0 %vm251_vm2, %v10855_v15 }
 0x173   :  { %998 = vmatprep.mubr.bf16.mxu1 %v14191_v1  ;;  %3547 = vmatprep.mubr.bf16.mxu0 %v14191_v1 }
 0x17a   :  { %7793 = vmatmul.mubr.msk.bf16.gmra.mrb[60].mxu1 %vm251_vm2, %v96_v24  ;;  %8147 = vmatmul.mubr.msk.bf16.gmra.mrb[36].mxu0 %vm251_vm2, %v10878_v25  ;;  %v11026_v24 = vpack.c.bf16 %v66_v18, %v65_v17  ;;  %v8105_v17 = vld [vmem:[%s14186_s0 + $0x242] sm:$0xff]  ;;  %v8106_v18 = vld [vmem:[%s14186_s0 + $0x24a] sm:$0xff] }
 0x17b   :  { %1008 = vmatprep.mubr.bf16.mxu1 %v14191_v1  ;;  %3557 = vmatprep.mubr.bf16.mxu0 %v14191_v1  ;;  %v11138_v22 = vpack.c.bf16 %v8106_v18, %v8105_v17  ;;  %v8113_v17 = vld [vmem:[%s14186_s0 + $0x2a2] sm:$0xff]  ;;  %v8114_v18 = vld [vmem:[%s14186_s0 + $0x2aa] sm:$0xff] }
 0x182   :  { %7794 = vmatmul.mubr.msk.bf16.gmra.mrb[64].mxu1 %vm251_vm2, %v97_v36  ;;  %8148 = vmatmul.mubr.msk.bf16.gmra.mrb[40].mxu0 %vm251_vm2, %v10897_v37  ;;  %v8098_v36 = vld [vmem:[%s14186_s0 + $0x1ea] sm:$0xff] }
 0x183   :  { %1018 = vmatprep.mubr.bf16.mxu1 %v14191_v1  ;;  %3567 = vmatprep.mubr.bf16.mxu0 %v14191_v1  ;;  %v11050_v39 = vpack.c.bf16 %v8098_v36, %v8097_v33  ;;  %v8107_v33 = vld [vmem:[%s14186_s0 + $0x25a] sm:$0xff]  ;;  %v8108_v36 = vld [vmem:[%s14186_s0 + $0x262] sm:$0xff] }
 0x184   :  { %v11160_v43 = vpack.c.bf16 %v8108_v36, %v8107_v33  ;;  %v11221_v33 = vpack.c.bf16 %v8114_v18, %v8113_v17  ;;  %v10045_v36 = vld [vmem:[%s14185_s1 + $0xb8] ss:$8 sps:$4 sm:$0xff]  }
 0x185   :  { %v8169_v17 = vld [vmem:[%s14186_s0 + $0x38] sm:$0xff] }
 0x18a   :  { %7795 = vmatmul.mubr.msk.bf16.gmra.mrb[68].mxu1 %vm251_vm2, %v10916_v45  ;;  %8149 = vmatmul.mubr.msk.bf16.gmra.mrb[44].mxu0 %vm251_vm2, %v10918_v46 }
 0x18b   :  { %1028 = vmatprep.mubr.bf16.mxu1 %v14191_v1  ;;  %3577 = vmatprep.mubr.bf16.mxu0 %v14191_v1 }
 0x192   :  { %7796 = vmatmul.mubr.msk.bf16.gmra.mrb[72].mxu1 %vm251_vm2, %v10938_v53  ;;  %8150 = vmatmul.mubr.msk.bf16.gmra.mrb[48].mxu0 %vm251_vm2, %v10940_v54 }
 0x193   :  { %1038 = vmatprep.mubr.bf16.mxu1 %v14191_v1  ;;  %3587 = vmatprep.mubr.bf16.mxu0 %v14191_v1 }
 0x19a   :  { %7797 = vmatmul.mubr.msk.bf16.gmra.mrb[76].mxu1 %vm251_vm2, %v10960_v60  ;;  %8151 = vmatmul.mubr.msk.bf16.gmra.mrb[52].mxu0 %vm251_vm2, %v10962_v62 }
 0x19b   :  { %1048 = vmatprep.mubr.bf16.mxu1 %v14191_v1  ;;  %3597 = vmatprep.mubr.bf16.mxu0 %v14191_v1 }
 0x1a2   :  { %7798 = vmatmul.mubr.msk.bf16.gmra.mrb[80].mxu1 %vm251_vm2, %v10982_v4  ;;  %8152 = vmatmul.mubr.msk.bf16.gmra.mrb[56].mxu0 %vm251_vm2, %v3270_v3  ;;  %v8103_v3 = vld [vmem:[%s14186_s0 + $0x22a] sm:$0xff] }
 0x1a3   :  { %1058 = vmatprep.mubr.bf16.mxu1 %v14191_v1  ;;  %3607 = vmatprep.mubr.bf16.mxu0 %v14191_v1  ;;  %v11116_v7 = vpack.c.bf16 %v8104_v5, %v8103_v3  ;;  %v8111_v3 = vld [vmem:[%s14186_s0 + $0x28a] sm:$0xff]  ;;  %v8112_v5 = vld [vmem:[%s14186_s0 + $0x292] sm:$0xff] }
 0x1a4   :  { %v11202_v8 = vpack.c.bf16 %v8112_v5, %v8111_v3  ;;  %v8122_v5 = vld [vmem:[%s14186_s0 + $0x30a] sm:$0xff] }
 0x1aa   :  { %7799 = vmatmul.mubr.msk.bf16.gmra.mrb[84].mxu1 %vm251_vm2, %v11004_v9  ;;  %8153 = vmatmul.mubr.msk.bf16.gmra.mrb[60].mxu0 %vm251_vm2, %v11006_v16 }
 0x1ab   :  { %1068 = vmatprep.mubr.bf16.mxu1 %v14191_v1  ;;  %3617 = vmatprep.mubr.bf16.mxu0 %v14191_v1 }
 0x1b2   :  { %7800 = vmatmul.mubr.msk.bf16.gmra.mrb[88].mxu1 %vm251_vm2, %v11026_v24  ;;  %8154 = vmatmul.mubr.msk.bf16.gmra.mrb[64].mxu0 %vm251_vm2, %v11028_v29 }
 0x1b3   :  { %1078 = vmatprep.mubr.bf16.mxu1 %v14191_v1  ;;  %3627 = vmatprep.mubr.bf16.mxu0 %v14191_v1 }
 0x1ba   :  { %7801 = vmatmul.mubr.msk.bf16.gmra.mrb[92].mxu1 %vm251_vm2, %v11048_v38  ;;  %8155 = vmatmul.mubr.msk.bf16.gmra.mrb[68].mxu0 %vm251_vm2, %v11050_v39 }
 0x1bb   :  { %1088 = vmatprep.mubr.bf16.mxu1 %v14191_v1  ;;  %3637 = vmatprep.mubr.bf16.mxu0 %v14191_v1 }
 0x1c2   :  { %7802 = vmatmul.mubr.msk.bf16.gmra.mrb[96].mxu1 %vm251_vm2, %v11070_v51  ;;  %8156 = vmatmul.mubr.msk.bf16.gmra.mrb[72].mxu0 %vm251_vm2, %v11072_v52 }
 0x1c3   :  { %1098 = vmatprep.mubr.bf16.mxu1 %v14191_v1  ;;  %3647 = vmatprep.mubr.bf16.mxu0 %v14191_v1 }
 0x1ca   :  { %7803 = vmatmul.mubr.msk.bf16.gmra.mrb[100].mxu1 %vm251_vm2, %v11092_v63  ;;  %8157 = vmatmul.mubr.msk.bf16.gmra.mrb[76].mxu0 %vm251_vm2, %v11094_v55 }
 0x1cb   :  { %1108 = vmatprep.mubr.bf16.mxu1 %v14191_v1  ;;  %3657 = vmatprep.mubr.bf16.mxu0 %v14191_v1 }
 0x1d2   :  { %7804 = vmatmul.mubr.msk.bf16.gmra.mrb[104].mxu1 %vm251_vm2, %v11114_v6  ;;  %8158 = vmatmul.mubr.msk.bf16.gmra.mrb[80].mxu0 %vm251_vm2, %v11116_v7 }
 0x1d3   :  { %1118 = vmatprep.mubr.bf16.mxu1 %v14191_v1  ;;  %3667 = vmatprep.mubr.bf16.mxu0 %v14191_v1 }
 0x1da   :  { %7805 = vmatmul.mubr.msk.bf16.gmra.mrb[108].mxu1 %vm251_vm2, %v11136_v21  ;;  %8159 = vmatmul.mubr.msk.bf16.gmra.mrb[84].mxu0 %vm251_vm2, %v11138_v22 }
 0x1db   :  { %1128 = vmatprep.mubr.bf16.mxu1 %v14191_v1  ;;  %3677 = vmatprep.mubr.bf16.mxu0 %v14191_v1 }
 0x1e2   :  { %7806 = vmatmul.mubr.msk.bf16.gmra.mrb[112].mxu1 %vm251_vm2, %v11158_v42  ;;  %8160 = vmatmul.mubr.msk.bf16.gmra.mrb[88].mxu0 %vm251_vm2, %v11160_v43 }
 0x1e3   :  { %1138 = vmatprep.mubr.bf16.mxu1 %v14191_v1  ;;  %3687 = vmatprep.mubr.bf16.mxu0 %v14191_v1 }
 0x1ea   :  { %7807 = vmatmul.mubr.msk.bf16.gmra.mrb[116].mxu1 %vm251_vm2, %v11180_v58  ;;  %8161 = vmatmul.mubr.msk.bf16.gmra.mrb[92].mxu0 %vm251_vm2, %v11182_v59 }
 0x1eb   :  { %1410 = vmatprep.mubr.bf16.mxu1 %v14191_v1  ;;  %3697 = vmatprep.mubr.bf16.mxu0 %v14191_v1 }
 0x1f2   :  { %7823 = vmatmul.mubr.msk.bf16.vlgmr.msra.gmra.mrb[0].mxu1 %vm251_vm2, %v1209_v10  ;;  %8162 = vmatmul.mubr.msk.bf16.gmra.mrb[96].mxu0 %vm251_vm2, %v11202_v8 }
 0x1f3   :  { %1420 = vmatprep.mubr.bf16.mxu1 %v14191_v1  ;;  %3707 = vmatprep.mubr.bf16.mxu0 %v14191_v1 }
 0x1f4   :  { %8943 = vmatpush1.bf16.msra.mxu1 %v10043_v30  ;;  %v9994_v30 = vld [vmem:[%s14185_s1 + $0x188] ss:$8 sps:$4 sm:$0xff]  }
 0x1f5   :  { %8940 = vmatprep.subr.bf16.mxu1 %v10044_v31  ;;  %v8170_v31 = vld [vmem:[%s14186_s0 + $0x48] sm:$0xff] }
 0x1f8   :  { %8944 = vmatpush1.bf16.msra.mxu1 %v10045_v36  ;;  %v8171_v36 = vld [vmem:[%s14186_s0 + $0x50] sm:$0xff] }
 0x1f9   :  { %8941 = vmatprep.subr.bf16.mxu1 %v10046_v49  ;;  %v9997_v49 = vld [vmem:[%s14185_s1 + $0x198] ss:$8 sps:$4 sm:$0xff]  }
 0x1fa   :  { %7824 = vmatmul.mubr.msk.bf16.gmra.mrb[4].mxu1 %vm251_vm2, %v10636_v2  ;;  %8163 = vmatmul.mubr.msk.bf16.gmra.mrb[100].mxu0 %vm251_vm2, %v11221_v33  ;;  %v11245_v2 = vpack.c.bf16 %v8116_v56, %v8115_v50  ;;  %v3940_v50 = vpack.c.bf16 %v8171_v36, %v8170_v31  ;;  %v10000_v56 = vld [vmem:[%s14185_s1 + $0x1a8] ss:$8 sps:$4 sm:$0xff]  }
 0x1fb   :  { %1430 = vmatprep.mubr.bf16.mxu1 %v14191_v1  ;;  %3717 = vmatprep.mubr.bf16.mxu0 %v14191_v1 }
 0x1fc   :  { %8945 = vmatpush1.bf16.msra.mxu1 %v10047_v57  ;;  %v8172_v57 = vld [vmem:[%s14186_s0 + $0x60] sm:$0xff] }
 0x1fd   :  { %8942 = vmatprep.subr.bf16.mxu1 %v10129_v23  ;;  %v8118_v23 = vld [vmem:[%s14186_s0 + $0x2da] sm:$0xff] }
 0x1fe   :  { %v11260_v0 = vpack.c.bf16 %v8118_v23, %v8117_v61  ;;  %v8173_v61 = vld [vmem:[%s14186_s0 + $0x68] sm:$0xff] }
 0x1ff   :  { %v3941_v23 = vpack.c.bf16 %v8173_v61, %v8172_v57  ;;  %v7874_v57 = vld [vmem:[%s14186_s0 + $0x110] sm:$0xff]  ;;  %v8224_v61 = vld [vmem:[%s14186_s0 + $0x300] sm:$0xff] }
 0x200   :  { %8946 = vmatpush1.bf16.msra.mxu1 %v10139_v27  ;;  %v8119_v27 = vld [vmem:[%s14186_s0 + $0x2ea] sm:$0xff] }
 0x202   :  { %7825 = vmatmul.mubr.msk.bf16.gmra.mrb[8].mxu1 %vm251_vm2, %v10670_v12  ;;  %8164 = vmatmul.mubr.msk.bf16.gmra.mrb[104].mxu0 %vm251_vm2, %v11245_v2  ;;  %v8120_v12 = vld [vmem:[%s14186_s0 + $0x2f2] sm:$0xff] }
 0x203   :  { %1440 = vmatprep.mubr.bf16.mxu1 %v14191_v1  ;;  %3727 = vmatprep.mubr.bf16.mxu0 %v14191_v1  ;;  %v11274_v3 = vpack.c.bf16 %v8120_v12, %v8119_v27  ;;  %v8175_v27 = vld [vmem:[%s14186_s0 + $0x80] sm:$0xff] }
 0x20a   :  { %7826 = vmatmul.mubr.msk.bf16.gmra.mrb[12].mxu1 %vm251_vm2, %v10695_v20  ;;  %8165 = vmatmul.mubr.msk.bf16.gmra.mrb[108].mxu0 %vm251_vm2, %v11260_v0  ;;  %v8121_v20 = vld [vmem:[%s14186_s0 + $0x302] sm:$0xff] }
 0x20b   :  { %1450 = vmatprep.mubr.bf16.mxu1 %v14191_v1  ;;  %3737 = vmatprep.mubr.bf16.mxu0 %v14191_v1  ;;  %v3285_v10 = vpack.c.bf16 %v8122_v5, %v8121_v20  ;;  %v8177_v20 = vld [vmem:[%s14186_s0 + $0x98] sm:$0xff] }
 0x212   :  { %7827 = vmatmul.mubr.msk.bf16.gmra.mrb[16].mxu1 %vm251_vm2, %v10717_v28  ;;  %8166 = vmatmul.mubr.msk.bf16.gmra.mrb[112].mxu0 %vm251_vm2, %v11274_v3  ;;  %v8168_v28 = vld [vmem:[%s14186_s0 + $0x30] sm:$0xff] }
 0x213   :  { %1460 = vmatprep.mubr.bf16.mxu1 %v14191_v1  ;;  %3747 = vmatprep.mubr.bf16.mxu0 %v14191_v1  ;;  %v3939_v18 = vpack.c.bf16 %v8169_v17, %v8168_v28 }
 0x21a   :  { %7828 = vmatmul.mubr.msk.bf16.gmra.mrb[20].mxu1 %vm251_vm2, %v10739_v35  ;;  %8167 = vmatmul.mubr.msk.bf16.gmra.mrb[116].mxu0 %vm251_vm2, %v3285_v10  ;;  %v9999_v35 = vld [vmem:[%s14185_s1 + $0x19c] ss:$8 sps:$4 sm:$0xff]  }
 0x21b   :  { %1470 = vmatprep.mubr.bf16.mxu1 %v14191_v1  ;;  %4140 = vmatprep.mubr.bf16.mxu0 %v14191_v1 }
 0x222   :  { %7829 = vmatmul.mubr.msk.bf16.gmra.mrb[24].mxu1 %vm251_vm2, %v10761_v41  ;;  %8243 = vmatmul.mubr.msk.bf16.vlgmr.msra.gmra.mrb[0].mxu0 %vm251_vm2, %v3939_v18  ;;  %v10002_v41 = vld [vmem:[%s14185_s1 + $0x1ac] ss:$8 sps:$4 sm:$0xff]   ;;  %v7869_v18 = vld [vmem:[%s14186_s0 + $0xd8] sm:$0xff] }
 0x223   :  { %4791 = vmatpush1.bf16.msra.mxu0 %v9994_v30  ;;  %1480 = vmatprep.mubr.bf16.mxu1 %v14191_v1  ;;  %v7870_v30 = vld [vmem:[%s14186_s0 + $0xe0] sm:$0xff] }
 0x224   :  { %4150 = vmatprep.mubr.bf16.mxu0 %v14191_v1  ;;  %4792 = vmatprep.subr.bf16.mxu0 %v9999_v35  ;;  %v1900_v36 = vpack.c.bf16 %v7870_v30, %v7869_v18  ;;  %v7883_v30 = vld [vmem:[%s14186_s0 + $0x1b0] sm:$0xff] }
 0x227   :  { %4793 = vmatpush1.bf16.msra.mxu0 %v9997_v49 }
 0x228   :  { %4794 = vmatprep.subr.bf16.mxu0 %v10002_v41  ;;  %v7871_v41 = vld [vmem:[%s14186_s0 + $0xf0] sm:$0xff] }
 0x22a   :  { %7830 = vmatmul.mubr.msk.bf16.gmra.mrb[28].mxu1 %vm251_vm2, %v10783_v48  ;;  %8244 = vmatmul.mubr.msk.bf16.gmra.mrb[4].mxu0 %vm251_vm2, %v3940_v50  ;;  %v8174_v48 = vld [vmem:[%s14186_s0 + $0x78] sm:$0xff] }
 0x22b   :  { %1490 = vmatprep.mubr.bf16.mxu1 %v14191_v1  ;;  %4160 = vmatprep.mubr.bf16.mxu0 %v14191_v1  ;;  %v3942_v12 = vpack.c.bf16 %v8175_v27, %v8174_v48  ;;  %v7872_v50 = vld [vmem:[%s14186_s0 + $0xf8] sm:$0xff]  ;;  %v7875_v27 = vld [vmem:[%s14186_s0 + $0x120] sm:$0xff] }
 0x22c   :  { %4795 = vmatpush1.bf16.msra.mxu0 %v10000_v56  ;;  %v1901_v56 = vpack.c.bf16 %v7872_v50, %v7871_v41  ;;  %v8279_v41 = vld [vmem:[%s14186_s0 + $0x79] sm:$0xff] }
 0x232   :  { %7831 = vmatmul.mubr.msk.bf16.gmra.mrb[32].mxu1 %vm251_vm2, %v10822_v44  ;;  %8245 = vmatmul.mubr.msk.bf16.gmra.mrb[8].mxu0 %vm251_vm2, %v3941_v23  ;;  %v8176_v44 = vld [vmem:[%s14186_s0 + $0x90] sm:$0xff] }
 0x233   :  { %1500 = vmatprep.mubr.bf16.mxu1 %v14191_v1  ;;  %4170 = vmatprep.mubr.bf16.mxu0 %v14191_v1  ;;  %v3943_v5 = vpack.c.bf16 %v8177_v20, %v8176_v44  ;;  %v8226_v44 = vld [vmem:[%s14186_s0 + $0x318] sm:$0xff]  ;;  %v8227_v20 = vld [vmem:[%s14186_s0 + $0x320] sm:$0xff] }
 0x23a   :  { %7832 = vmatmul.mubr.msk.bf16.gmra.mrb[36].mxu1 %vm251_vm2, %v10855_v15  ;;  %8246 = vmatmul.mubr.msk.bf16.gmra.mrb[12].mxu0 %vm251_vm2, %v3942_v12  ;;  %v8339_v15 = vld [vmem:[%s14185_s1 + $0x1b8] sm:$0x33]  ;;  %v7876_v12 = vld [vmem:[%s14186_s0 + $0x128] sm:$0xff] }
 0x23b   :  { %1510 = vmatprep.mubr.bf16.mxu1 %v14191_v1  ;;  %4180 = vmatprep.mubr.bf16.mxu0 %v14191_v1 }
 0x242   :  { %7833 = vmatmul.mubr.msk.bf16.gmra.mrb[40].mxu1 %vm251_vm2, %v10878_v25  ;;  %8247 = vmatmul.mubr.msk.bf16.gmra.mrb[16].mxu0 %vm251_vm2, %v3943_v5  ;;  %v8346_v25 = vcombine.low %v8339_v15, %v8339_v15  ;;  %v1903_v5 = vpack.c.bf16 %v7876_v12, %v7875_v27  ;;  %v7887_v12 = vld [vmem:[%s14186_s0 + $0x1e0] sm:$0xff] }
 0x243   :  { %1520 = vmatprep.mubr.bf16.mxu1 %v14191_v1  ;;  %4190 = vmatprep.mubr.bf16.mxu0 %v14191_v1 }
 0x244   :  { %v4785_v10 = vand.u32 %v8346_v25, %v10116_v14  ;;  %v7877_v25 = vld [vmem:[%s14186_s0 + $0x138] sm:$0xff] }
 0x24a   :  { %7834 = vmatmul.mubr.msk.bf16.gmra.mrb[44].mxu1 %vm251_vm2, %v10897_v37  ;;  %8248 = vmatmul.mubr.msk.bf16.gmra.mrb[20].mxu0 %vm251_vm2, %v10668_v11  ;;  %v8347_v11 = vcombine.high %v8339_v15, %v8339_v15  ;;  %v3968_v15 = vpack.c.bf16 %v8227_v20, %v8226_v44  ;;  %v7888_v44 = vld [vmem:[%s14186_s0 + $0x1e8] sm:$0xff] }
 0x24b   :  { %1530 = vmatprep.mubr.bf16.mxu1 %v14191_v1  ;;  %4200 = vmatprep.mubr.bf16.mxu0 %v14191_v1  ;;  %v8283_v20 = vld [vmem:[%s14186_s0 + $0xa9] sm:$0xff] }
 0x24c   :  { %v4788_v37 = vand.u32 %v8347_v11, %v10116_v14  ;;  %v7878_v11 = vld [vmem:[%s14186_s0 + $0x140] sm:$0xff] }
 0x24e   :  { %4796 = vmatprep.subr.bf16.mxu0 %v4788_v37  ;;  %v8273_v37 = vld [vmem:[%s14186_s0 + $0x31] sm:$0xff] }
 0x24f   :  { %4797 = vmatpush1.bf16.msra.mxu0 %v4785_v10  ;;  %v8274_v10 = vld [vmem:[%s14186_s0 + $0x39] sm:$0xff] }
 0x252   :  { %7835 = vmatmul.mubr.msk.bf16.gmra.mrb[48].mxu1 %vm251_vm2, %v10918_v46  ;;  %8249 = vmatmul.mubr.msk.bf16.gmra.mrb[24].mxu0 %vm251_vm2, %v10693_v19  ;;  %v1179_v19 = vld [vmem:[%s14186_s0 + $0x19a] sm:$0xff] }
 0x253   :  { %1540 = vmatprep.mubr.bf16.mxu1 %v14191_v1  ;;  %4210 = vmatprep.mubr.bf16.mxu0 %v14191_v1 }
 0x25a   :  { %7836 = vmatmul.mubr.msk.bf16.gmra.mrb[52].mxu1 %vm251_vm2, %v10940_v54  ;;  %8250 = vmatmul.mubr.msk.bf16.gmra.mrb[28].mxu0 %vm251_vm2, %v10715_v26  ;;  %v1180_v26 = vld [vmem:[%s14186_s0 + $0x1a2] sm:$0xff] }
 0x25b   :  { %1550 = vmatprep.mubr.bf16.mxu1 %v14191_v1  ;;  %4220 = vmatprep.mubr.bf16.mxu0 %v14191_v1  ;;  %v1224_v46 = vpack.c.bf16 %v1180_v26, %v1179_v19  ;;  %v1904_v19 = vpack.c.bf16 %v7878_v11, %v7877_v25  ;;  %v4621_v26 = vpack.c.bf16 %v8274_v10, %v8273_v37  ;;  %v7889_v11 = vld [vmem:[%s14186_s0 + $0x1f8] sm:$0xff]  ;;  %v7890_v37 = vld [vmem:[%s14186_s0 + $0x200] sm:$0xff] }
 0x25c   :  { %v8285_v10 = vld [vmem:[%s14186_s0 + $0xc1] sm:$0xff] }
 0x262   :  { %7837 = vmatmul.mubr.msk.bf16.gmra.mrb[56].mxu1 %vm251_vm2, %v10962_v62  ;;  %8251 = vmatmul.mubr.msk.bf16.gmra.mrb[32].mxu0 %vm251_vm2, %v10737_v34  ;;  %v8194_v34 = vld [vmem:[%s14186_s0 + $0x168] sm:$0xff] }
 0x263   :  { %1560 = vmatprep.mubr.bf16.mxu1 %v14191_v1  ;;  %4230 = vmatprep.mubr.bf16.mxu0 %v14191_v1  ;;  %v10007_v62 = vld [vmem:[%s14185_s1 + $0x1c4] ss:$8 sps:$4 sm:$0xff]  }
 0x264   :  { %5472 = vmatprep.subr.bf16.mxu0 %v10007_v62  ;;  %v10008_v62 = vld [vmem:[%s14185_s1 + $0x1d0] ss:$8 sps:$4 sm:$0xff]  }
 0x26a   :  { %7838 = vmatmul.mubr.msk.bf16.gmra.mrb[60].mxu1 %vm251_vm2, %v1224_v46  ;;  %8252 = vmatmul.mubr.msk.bf16.gmra.mrb[36].mxu0 %vm251_vm2, %v10759_v40  ;;  %v8195_v40 = vld [vmem:[%s14186_s0 + $0x170] sm:$0xff]  ;;  %v10005_v46 = vld [vmem:[%s14185_s1 + $0x1c0] ss:$8 sps:$4 sm:$0xff]  }
 0x26b   :  { %1570 = vmatprep.mubr.bf16.mxu1 %v14191_v1  ;;  %4240 = vmatprep.mubr.bf16.mxu0 %v14191_v1 }
 0x272   :  { %7839 = vmatmul.mubr.msk.bf16.gmra.mrb[64].mxu1 %vm251_vm2, %v11006_v16  ;;  %8253 = vmatmul.mubr.msk.bf16.gmra.mrb[40].mxu0 %vm251_vm2, %v10781_v47  ;;  %v11427_v47 = vpack.c.bf16 %v8195_v40, %v8194_v34  ;;  %v10010_v34 = vld [vmem:[%s14185_s1 + $0x1d4] ss:$8 sps:$4 sm:$0xff]  }
 0x273   :  { %1580 = vmatprep.mubr.bf16.mxu1 %v14191_v1  ;;  %4250 = vmatprep.mubr.bf16.mxu0 %v14191_v1  ;;  %v7879_v40 = vld [vmem:[%s14186_s0 + $0x150] sm:$0xff] }
 0x27a   :  { %7840 = vmatmul.mubr.msk.bf16.gmra.mrb[68].mxu1 %vm251_vm2, %v11028_v29  ;;  %8254 = vmatmul.mubr.msk.bf16.gmra.mrb[44].mxu0 %vm251_vm2, %v10820_v32  ;;  %v8196_v32 = vld [vmem:[%s14186_s0 + $0x180] sm:$0xff] }
 0x27b   :  { %1590 = vmatprep.mubr.bf16.mxu1 %v14191_v1  ;;  %4260 = vmatprep.mubr.bf16.mxu0 %v14191_v1 }
 0x282   :  { %7841 = vmatmul.mubr.msk.bf16.gmra.mrb[72].mxu1 %vm251_vm2, %v11050_v39  ;;  %8255 = vmatmul.mubr.msk.bf16.gmra.mrb[48].mxu0 %vm251_vm2, %v10853_v13  ;;  %v8197_v13 = vld [vmem:[%s14186_s0 + $0x188] sm:$0xff] }
 0x283   :  { %1600 = vmatprep.mubr.bf16.mxu1 %v14191_v1  ;;  %4270 = vmatprep.mubr.bf16.mxu0 %v14191_v1  ;;  %v3953_v54 = vpack.c.bf16 %v8197_v13, %v8196_v32  ;;  %v7880_v32 = vld [vmem:[%s14186_s0 + $0x158] sm:$0xff]  ;;  %v8275_v13 = vld [vmem:[%s14186_s0 + $0x49] sm:$0xff] }
 0x28a   :  { %7842 = vmatmul.mubr.msk.bf16.gmra.mrb[76].mxu1 %vm251_vm2, %v11072_v52  ;;  %8256 = vmatmul.mubr.msk.bf16.gmra.mrb[52].mxu0 %vm251_vm2, %v11427_v47 }
 0x28b   :  { %1610 = vmatprep.mubr.bf16.mxu1 %v14191_v1  ;;  %4280 = vmatprep.mubr.bf16.mxu0 %v14191_v1 }
 0x292   :  { %7843 = vmatmul.mubr.msk.bf16.gmra.mrb[80].mxu1 %vm251_vm2, %v11094_v55  ;;  %8257 = vmatmul.mubr.msk.bf16.gmra.mrb[56].mxu0 %vm251_vm2, %v3953_v54  ;;  %v8276_v54 = vld [vmem:[%s14186_s0 + $0x51] sm:$0xff] }
 0x293   :  { %1620 = vmatprep.mubr.bf16.mxu1 %v14191_v1  ;;  %4290 = vmatprep.mubr.bf16.mxu0 %v14191_v1 }
 0x29a   :  { %7844 = vmatmul.mubr.msk.bf16.gmra.mrb[84].mxu1 %vm251_vm2, %v11116_v7  ;;  %8258 = vmatmul.mubr.msk.bf16.gmra.mrb[60].mxu0 %vm251_vm2, %v10916_v45  ;;  %v7866_v7 = vld [vmem:[%s14186_s0 + $0xb0] sm:$0xff] }
 0x29b   :  { %1630 = vmatprep.mubr.bf16.mxu1 %v14191_v1  ;;  %4300 = vmatprep.mubr.bf16.mxu0 %v14191_v1 }
 0x2a2   :  { %7845 = vmatmul.mubr.msk.bf16.gmra.mrb[88].mxu1 %vm251_vm2, %v11138_v22  ;;  %8259 = vmatmul.mubr.msk.bf16.gmra.mrb[64].mxu0 %vm251_vm2, %v10938_v53 }
 0x2a3   :  { %1640 = vmatprep.mubr.bf16.mxu1 %v14191_v1  ;;  %4310 = vmatprep.mubr.bf16.mxu0 %v14191_v1 }
 0x2aa   :  { %7846 = vmatmul.mubr.msk.bf16.gmra.mrb[92].mxu1 %vm251_vm2, %v11160_v43  ;;  %8260 = vmatmul.mubr.msk.bf16.gmra.mrb[68].mxu0 %vm251_vm2, %v10960_v60 }
 0x2ab   :  { %1650 = vmatprep.mubr.bf16.mxu1 %v14191_v1  ;;  %4320 = vmatprep.mubr.bf16.mxu0 %v14191_v1 }
 0x2b2   :  { %7847 = vmatmul.mubr.msk.bf16.gmra.mrb[96].mxu1 %vm251_vm2, %v11182_v59  ;;  %8261 = vmatmul.mubr.msk.bf16.gmra.mrb[72].mxu0 %vm251_vm2, %v10982_v4 }
 0x2b3   :  { %1660 = vmatprep.mubr.bf16.mxu1 %v14191_v1  ;;  %4330 = vmatprep.mubr.bf16.mxu0 %v14191_v1 }
 0x2ba   :  { %7848 = vmatmul.mubr.msk.bf16.gmra.mrb[100].mxu1 %vm251_vm2, %v11202_v8  ;;  %8262 = vmatmul.mubr.msk.bf16.gmra.mrb[76].mxu0 %vm251_vm2, %v11004_v9 }
 0x2bb   :  { %1670 = vmatprep.mubr.bf16.mxu1 %v14191_v1  ;;  %4340 = vmatprep.mubr.bf16.mxu0 %v14191_v1 }
 0x2c2   :  { %7849 = vmatmul.mubr.msk.bf16.gmra.mrb[104].mxu1 %vm251_vm2, %v11221_v33  ;;  %8263 = vmatmul.mubr.msk.bf16.gmra.mrb[80].mxu0 %vm251_vm2, %v11026_v24  ;;  %v7867_v33 = vld [vmem:[%s14186_s0 + $0xc0] sm:$0xff] }
 0x2c3   :  { %1680 = vmatprep.mubr.bf16.mxu1 %v14191_v1  ;;  %4350 = vmatprep.mubr.bf16.mxu0 %v14191_v1 }
 0x2c5   :  { %v11485_v45 = vpop.f32.mrb[0].mxu1 }
 0x2c6   :  { %v11487_v53 = vpop.f32.mrb[1].mxu1 }
 0x2c7   :  { %v11489_v60 = vpop.f32.mrb[2].mxu1 }
 0x2c8   :  { %v11491_v4 = vpop.f32.mrb[3].mxu1 }
 0x2ca   :  { %7850 = vmatmul.mubr.msk.bf16.gmra.mrb[108].mxu1 %vm251_vm2, %v11245_v2  ;;  %8264 = vmatmul.mubr.msk.bf16.gmra.mrb[84].mxu0 %vm251_vm2, %v11048_v38  ;;  %v7868_v2 = vld [vmem:[%s14186_s0 + $0xc8] sm:$0xff] }
 0x2cb   :  { %1690 = vmatprep.mubr.bf16.mxu1 %v14191_v1  ;;  %4360 = vmatprep.mubr.bf16.mxu0 %v14191_v1  ;;  %v1899_v28 = vpack.c.bf16 %v7868_v2, %v7867_v33  ;;  %v10011_v33 = vld [vmem:[%s14185_s1 + $0x1e0] ss:$8 sps:$4 sm:$0xff]  }
 0x2cc   :  { %v8277_v2 = vld [vmem:[%s14186_s0 + $0x61] sm:$0xff] }
 0x2cd   :  { %v11499_v9 = vpop.f32.mrb[4].mxu1 }
 0x2ce   :  { %v11501_v16 = vpop.f32.mrb[5].mxu1 }
 0x2cf   :  { %v11503_v24 = vpop.f32.mrb[6].mxu1 }
 0x2d0   :  { %v11505_v29 = vpop.f32.mrb[7].mxu1 }
 0x2d2   :  { %7851 = vmatmul.mubr.msk.bf16.gmra.mrb[112].mxu1 %vm251_vm2, %v11260_v0  ;;  %8265 = vmatmul.mubr.msk.bf16.gmra.mrb[88].mxu0 %vm251_vm2, %v11070_v51  ;;  %v7865_v51 = vld [vmem:[%s14186_s0 + $0xa8] sm:$0xff] }
 0x2d3   :  { %1700 = vmatprep.mubr.bf16.mxu1 %v14191_v1  ;;  %4370 = vmatprep.mubr.bf16.mxu0 %v14191_v1  ;;  %v1898_v59 = vpack.c.bf16 %v7866_v7, %v7865_v51  ;;  %v10013_v51 = vld [vmem:[%s14185_s1 + $0x1e4] ss:$8 sps:$4 sm:$0xff]   ;;  %v1905_v7 = vpack.c.bf16 %v7880_v32, %v7879_v40  ;;  %v7892_v40 = vld [vmem:[%s14186_s0 + $0x218] sm:$0xff] }
 0x2d4   :  { %v8287_v32 = vld [vmem:[%s14186_s0 + $0xd9] sm:$0xff] }
 0x2d5   :  { %v11513_v38 = vpop.f32.mrb[8].mxu1 }
 0x2d6   :  { %v11515_v39 = vpop.f32.mrb[9].mxu1 }
 0x2d7   :  { %v11517_v52 = vpop.f32.mrb[10].mxu1 }
 0x2d8   :  { %v11519_v55 = vpop.f32.mrb[11].mxu1 }
 0x2da   :  { %7852 = vmatmul.mubr.msk.bf16.gmra.mrb[116].mxu1 %vm251_vm2, %v11274_v3  ;;  %8266 = vmatmul.mubr.msk.bf16.gmra.mrb[92].mxu0 %vm251_vm2, %v11092_v63 }
 0x2db   :  { %2153 = vmatprep.mubr.bf16.mxu1 %v14191_v1  ;;  %4380 = vmatprep.mubr.bf16.mxu0 %v14191_v1 }
 0x2dd   :  { %v11533_v22 = vpop.f32.mrb[12].mxu1 }
 0x2de   :  { %v11535_v43 = vpop.f32.mrb[13].mxu1 }
 0x2df   :  { %v11537_v8 = vpop.f32.mrb[14].mxu1 }
 0x2e0   :  { %v11539_v63 = vpop.f32.mrb[15].mxu1 }
 0x2e2   :  { %7934 = vmatmul.mubr.msk.bf16.vlgmr.msra.gmra.mrb[24].mxu1 %vm251_vm2, %v1898_v59  ;;  %8267 = vmatmul.mubr.msk.bf16.gmra.mrb[96].mxu0 %vm251_vm2, %v11114_v6  ;;  %v4622_v59 = vpack.c.bf16 %v8276_v54, %v8275_v13  ;;  %v8288_v13 = vld [vmem:[%s14186_s0 + $0xe1] sm:$0xff] }
 0x2e3   :  { %2163 = vmatprep.mubr.bf16.mxu1 %v14191_v1  ;;  %4390 = vmatprep.mubr.bf16.mxu0 %v14191_v1 }
 0x2e5   :  { %v11552_v0 = vpop.f32.mrb[16].mxu1 }
 0x2e6   :  { %v11554_v3 = vpop.f32.mrb[17].mxu1 }
 0x2e7   :  { %v11556_v17 = vpop.f32.mrb[18].mxu1 }
 0x2e8   :  { %v11558_v6 = vpop.f32.mrb[19].mxu1 }
 0x2ea   :  { %7935 = vmatmul.mubr.msk.bf16.gmra.mrb[28].mxu1 %vm251_vm2, %v1899_v28  ;;  %8268 = vmatmul.mubr.msk.bf16.gmra.mrb[100].mxu0 %vm251_vm2, %v11136_v21  ;;  %v8278_v28 = vld [vmem:[%s14186_s0 + $0x69] sm:$0xff] }
 0x2eb   :  { %2173 = vmatprep.mubr.bf16.mxu1 %v14191_v1  ;;  %4400 = vmatprep.mubr.bf16.mxu0 %v14191_v1  ;;  %v4623_v18 = vpack.c.bf16 %v8278_v28, %v8277_v2  ;;  %v7893_v28 = vld [vmem:[%s14186_s0 + $0x228] sm:$0xff] }
 0x2ed   :  { %v11571_v35 = vpop.f32.mrb[20].mxu1 }
 0x2ee   :  { %v11573_v31 = vpop.f32.mrb[21].mxu1 }
 0x2ef   :  { %v11575_v49 = vpop.f32.mrb[22].mxu1 }
 0x2f0   :  { %v11577_v21 = vpop.f32.mrb[23].mxu1 }
 0x2f2   :  { %7936 = vmatmul.mubr.msk.bf16.gmra.mrb[32].mxu1 %vm251_vm2, %v1900_v36  ;;  %8269 = vmatmul.mubr.msk.bf16.gmra.mrb[104].mxu0 %vm251_vm2, %v11158_v42  ;;  %v7873_v42 = vld [vmem:[%s14186_s0 + $0x108] sm:$0xff]  ;;  %v7884_v36 = vld [vmem:[%s14186_s0 + $0x1b8] sm:$0xff] }
 0x2f3   :  { %2183 = vmatprep.mubr.bf16.mxu1 %v14191_v1  ;;  %4410 = vmatprep.mubr.bf16.mxu0 %v14191_v1  ;;  %v1902_v23 = vpack.c.bf16 %v7874_v57, %v7873_v42  ;;  %v1907_v50 = vpack.c.bf16 %v7884_v36, %v7883_v30  ;;  %v7885_v42 = vld [vmem:[%s14186_s0 + $0x1c8] sm:$0xff]  ;;  %v7886_v57 = vld [vmem:[%s14186_s0 + $0x1d0] sm:$0xff]  ;;  %v8290_v30 = vld [vmem:[%s14186_s0 + $0xf9] sm:$0xff] }
 0x2fa   :  { %7937 = vmatmul.mubr.msk.bf16.gmra.mrb[36].mxu1 %vm251_vm2, %v1901_v56  ;;  %8270 = vmatmul.mubr.msk.bf16.gmra.mrb[108].mxu0 %vm251_vm2, %v11180_v58  ;;  %v8225_v58 = vld [vmem:[%s14186_s0 + $0x308] sm:$0xff] }
 0x2fb   :  { %2193 = vmatprep.mubr.bf16.mxu1 %v14191_v1  ;;  %4420 = vmatprep.mubr.bf16.mxu0 %v14191_v1  ;;  %v11607_v48 = vpack.c.bf16 %v8225_v58, %v8224_v61  ;;  %v8281_v61 = vld [vmem:[%s14186_s0 + $0x91] sm:$0xff]  ;;  %v8282_v58 = vld [vmem:[%s14186_s0 + $0x99] sm:$0xff] }
 0x2fc   :  { %v4625_v27 = vpack.c.bf16 %v8282_v58, %v8281_v61  ;;  %v7897_v58 = vld [vmem:[%s14186_s0 + $0x258] sm:$0xff] }
 0x302   :  { %7938 = vmatmul.mubr.msk.bf16.gmra.mrb[40].mxu1 %vm251_vm2, %v1902_v23  ;;  %8271 = vmatmul.mubr.msk.bf16.gmra.mrb[112].mxu0 %vm251_vm2, %v11607_v48  ;;  %v1908_v23 = vpack.c.bf16 %v7886_v57, %v7885_v42  ;;  %v8292_v42 = vld [vmem:[%s14186_s0 + $0x111] sm:$0xff] }
 0x303   :  { %2203 = vmatprep.mubr.bf16.mxu1 %v14191_v1  ;;  %4430 = vmatprep.mubr.bf16.mxu0 %v14191_v1 }
 0x30a   :  { %7939 = vmatmul.mubr.msk.bf16.gmra.mrb[44].mxu1 %vm251_vm2, %v1903_v5  ;;  %8272 = vmatmul.mubr.msk.bf16.gmra.mrb[116].mxu0 %vm251_vm2, %v3968_v15  ;;  %v8284_v5 = vld [vmem:[%s14186_s0 + $0xb1] sm:$0xff]  ;;  %v1909_v15 = vpack.c.bf16 %v7888_v44, %v7887_v12  ;;  %v8294_v12 = vld [vmem:[%s14186_s0 + $0x129] sm:$0xff] }
 0x30b   :  { %2213 = vmatprep.mubr.bf16.mxu1 %v14191_v1  ;;  %4822 = vmatprep.mubr.bf16.mxu0 %v14191_v1  ;;  %v4626_v25 = vpack.c.bf16 %v8284_v5, %v8283_v20  ;;  %v7899_v5 = vld [vmem:[%s14186_s0 + $0x270] sm:$0xff] }
 0x312   :  { %7940 = vmatmul.mubr.msk.bf16.gmra.mrb[48].mxu1 %vm251_vm2, %v1904_v19  ;;  %8348 = vmatmul.mubr.msk.bf16.vlgmr.msra.gmra.mrb[0].mxu0 %vm251_vm2, %v4621_v26  ;;  %v8286_v19 = vld [vmem:[%s14186_s0 + $0xc9] sm:$0xff]  ;;  %v1910_v26 = vpack.c.bf16 %v7890_v37, %v7889_v11  ;;  %v8296_v11 = vld [vmem:[%s14186_s0 + $0x141] sm:$0xff] }
 0x313   :  { %5473 = vmatpush1.bf16.msra.mxu0 %v10005_v46  ;;  %2223 = vmatprep.mubr.bf16.mxu1 %v14191_v1  ;;  %v4627_v46 = vpack.c.bf16 %v8286_v19, %v8285_v10  ;;  %v7901_v19 = vld [vmem:[%s14186_s0 + $0x288] sm:$0xff] }
 0x314   :  { %4832 = vmatprep.mubr.bf16.mxu0 %v14191_v1  ;;  %5474 = vmatprep.subr.bf16.mxu0 %v10010_v34  ;;  %v7891_v34 = vld [vmem:[%s14186_s0 + $0x210] sm:$0xff] }
 0x315   :  { %v1911_v54 = vpack.c.bf16 %v7892_v40, %v7891_v34  ;;  %v8298_v34 = vld [vmem:[%s14186_s0 + $0x159] sm:$0xff] }
 0x317   :  { %5475 = vmatpush1.bf16.msra.mxu0 %v10008_v62  ;;  %v4628_v62 = vpack.c.bf16 %v8288_v13, %v8287_v32  ;;  %v7903_v13 = vld [vmem:[%s14186_s0 + $0x2a0] sm:$0xff] }
 0x318   :  { %5476 = vmatprep.subr.bf16.mxu0 %v10013_v51  ;;  %v8444_v51 = vld [vmem:[%s14185_s1 + $0x1f0] sm:$0x33] }
 0x31a   :  { %7941 = vmatmul.mubr.msk.bf16.gmra.mrb[52].mxu1 %vm251_vm2, %v1905_v7  ;;  %8349 = vmatmul.mubr.msk.bf16.gmra.mrb[4].mxu0 %vm251_vm2, %v4622_v59  ;;  %v8451_v7 = vcombine.low %v8444_v51, %v8444_v51  ;;  %v8452_v59 = vcombine.high %v8444_v51, %v8444_v51  ;;  %v8300_v51 = vld [vmem:[%s14186_s0 + $0x171] sm:$0xff] }
 0x31b   :  { %2233 = vmatprep.mubr.bf16.mxu1 %v14191_v1  ;;  %4842 = vmatprep.mubr.bf16.mxu0 %v14191_v1 }
 0x31c   :  { %5477 = vmatpush1.bf16.msra.mxu0 %v10011_v33  ;;  %v5470_v33 = vand.u32 %v8452_v59, %v10116_v14  ;;  %v5467_v2 = vand.u32 %v8451_v7, %v10116_v14  ;;  %v8289_v14 = vld [vmem:[%s14186_s0 + $0xf1] sm:$0xff] }
 0x31e   :  { %5478 = vmatprep.subr.bf16.mxu0 %v5470_v33  ;;  %v7905_v33 = vld [vmem:[%s14186_s0 + $0x2b8] sm:$0xff] }
 0x320   :  { %5479 = vmatpush1.bf16.msra.mxu0 %v5467_v2  ;;  %v7906_v2 = vld [vmem:[%s14186_s0 + $0x2c0] sm:$0xff] }
 0x322   :  { %7942 = vmatmul.mubr.msk.bf16.gmra.mrb[56].mxu1 %vm251_vm2, %v11427_v47  ;;  %8350 = vmatmul.mubr.msk.bf16.gmra.mrb[8].mxu0 %vm251_vm2, %v4623_v18  ;;  %v8280_v47 = vld [vmem:[%s14186_s0 + $0x81] sm:$0xff]  ;;  %v7894_v18 = vld [vmem:[%s14186_s0 + $0x230] sm:$0xff] }
 0x323   :  { %2243 = vmatprep.mubr.bf16.mxu1 %v14191_v1  ;;  %4852 = vmatprep.mubr.bf16.mxu0 %v14191_v1  ;;  %v4624_v56 = vpack.c.bf16 %v8280_v47, %v8279_v41  ;;  %v1912_v36 = vpack.c.bf16 %v7894_v18, %v7893_v28  ;;  %v4629_v41 = vpack.c.bf16 %v8290_v30, %v8289_v14  ;;  %v7895_v47 = vld [vmem:[%s14186_s0 + $0x240] sm:$0xff]  ;;  %v8302_v18 = vld [vmem:[%s14186_s0 + $0x189] sm:$0xff] }
 0x324   :  { %v8301_v28 = vld [vmem:[%s14186_s0 + $0x181] sm:$0xff]  ;;  %v1918_v14 = vpack.c.bf16 %v7906_v2, %v7905_v33 }
 0x325   :  { %v4635_v30 = vpack.c.bf16 %v8302_v18, %v8301_v28 }
 0x32a   :  { %7943 = vmatmul.mubr.msk.bf16.gmra.mrb[60].mxu1 %vm251_vm2, %v1907_v50  ;;  %8351 = vmatmul.mubr.msk.bf16.gmra.mrb[12].mxu0 %vm251_vm2, %v4624_v56  ;;  %v7896_v50 = vld [vmem:[%s14186_s0 + $0x248] sm:$0xff] }
 0x32b   :  { %2253 = vmatprep.mubr.bf16.mxu1 %v14191_v1  ;;  %4862 = vmatprep.mubr.bf16.mxu0 %v14191_v1  ;;  %v8291_v56 = vld [vmem:[%s14186_s0 + $0x109] sm:$0xff]  ;;  %v1913_v57 = vpack.c.bf16 %v7896_v50, %v7895_v47  ;;  %v8304_v50 = vld [vmem:[%s14186_s0 + $0x1d1] sm:$0xff] }
 0x32c   :  { %v4630_v61 = vpack.c.bf16 %v8292_v42, %v8291_v56  ;;  %v8303_v47 = vld [vmem:[%s14186_s0 + $0x1c9] sm:$0xff] }
 0x32d   :  { %v4636_v42 = vpack.c.bf16 %v8304_v50, %v8303_v47 }
 0x332   :  { %7944 = vmatmul.mubr.msk.bf16.gmra.mrb[64].mxu1 %vm251_vm2, %v1908_v23  ;;  %8352 = vmatmul.mubr.msk.bf16.gmra.mrb[16].mxu0 %vm251_vm2, %v4625_v27  ;;  %v7898_v23 = vld [vmem:[%s14186_s0 + $0x260] sm:$0xff] }
 0x333   :  { %2263 = vmatprep.mubr.bf16.mxu1 %v14191_v1  ;;  %4872 = vmatprep.mubr.bf16.mxu0 %v14191_v1  ;;  %v8293_v27 = vld [vmem:[%s14186_s0 + $0x121] sm:$0xff]  ;;  %v1914_v44 = vpack.c.bf16 %v7898_v23, %v7897_v58  ;;  %v8306_v23 = vld [vmem:[%s14186_s0 + $0x1e9] sm:$0xff] }
 0x334   :  { %v4631_v20 = vpack.c.bf16 %v8294_v12, %v8293_v27  ;;  %v8305_v58 = vld [vmem:[%s14186_s0 + $0x1e1] sm:$0xff] }
 0x335   :  { %v4637_v12 = vpack.c.bf16 %v8306_v23, %v8305_v58 }
 0x33a   :  { %7945 = vmatmul.mubr.msk.bf16.gmra.mrb[68].mxu1 %vm251_vm2, %v1909_v15  ;;  %8353 = vmatmul.mubr.msk.bf16.gmra.mrb[20].mxu0 %vm251_vm2, %v4626_v25  ;;  %v7900_v15 = vld [vmem:[%s14186_s0 + $0x278] sm:$0xff] }
 0x33b   :  { %2273 = vmatprep.mubr.bf16.mxu1 %v14191_v1  ;;  %4882 = vmatprep.mubr.bf16.mxu0 %v14191_v1  ;;  %v8295_v25 = vld [vmem:[%s14186_s0 + $0x139] sm:$0xff]  ;;  %v1915_v37 = vpack.c.bf16 %v7900_v15, %v7899_v5  ;;  %v8309_v15 = vld [vmem:[%s14186_s0 + $0x211] sm:$0xff] }
 0x33c   :  { %v4632_v10 = vpack.c.bf16 %v8296_v11, %v8295_v25  ;;  %v8310_v25 = vld [vmem:[%s14186_s0 + $0x219] sm:$0xff] }
 0x33d   :  { %v4639_v11 = vpack.c.bf16 %v8310_v25, %v8309_v15 }
 0x342   :  { %7946 = vmatmul.mubr.msk.bf16.gmra.mrb[72].mxu1 %vm251_vm2, %v1910_v26  ;;  %8354 = vmatmul.mubr.msk.bf16.gmra.mrb[24].mxu0 %vm251_vm2, %v4627_v46  ;;  %v7902_v26 = vld [vmem:[%s14186_s0 + $0x290] sm:$0xff] }
 0x343   :  { %2283 = vmatprep.mubr.bf16.mxu1 %v14191_v1  ;;  %4892 = vmatprep.mubr.bf16.mxu0 %v14191_v1  ;;  %v8297_v46 = vld [vmem:[%s14186_s0 + $0x151] sm:$0xff]  ;;  %v1916_v40 = vpack.c.bf16 %v7902_v26, %v7901_v19  ;;  %v8313_v19 = vld [vmem:[%s14186_s0 + $0x241] sm:$0xff]  ;;  %v8314_v26 = vld [vmem:[%s14186_s0 + $0x249] sm:$0xff] }
 0x344   :  { %v4633_v32 = vpack.c.bf16 %v8298_v34, %v8297_v46  ;;  %v4641_v46 = vpack.c.bf16 %v8314_v26, %v8313_v19  ;;  %v8315_v34 = vld [vmem:[%s14186_s0 + $0x259] sm:$0xff] }
 0x345   :  { %v8326_v19 = vld [vmem:[%s14186_s0 + $0x2d9] sm:$0xff] }
 0x34a   :  { %7947 = vmatmul.mubr.msk.bf16.gmra.mrb[76].mxu1 %vm251_vm2, %v1911_v54  ;;  %8355 = vmatmul.mubr.msk.bf16.gmra.mrb[28].mxu0 %vm251_vm2, %v4628_v62  ;;  %v7904_v54 = vld [vmem:[%s14186_s0 + $0x2a8] sm:$0xff] }
 0x34b   :  { %2293 = vmatprep.mubr.bf16.mxu1 %v14191_v1  ;;  %4902 = vmatprep.mubr.bf16.mxu0 %v14191_v1  ;;  %v8299_v62 = vld [vmem:[%s14186_s0 + $0x169] sm:$0xff]  ;;  %v1917_v7 = vpack.c.bf16 %v7904_v54, %v7903_v13 }
 0x34c   :  { %v4634_v59 = vpack.c.bf16 %v8300_v51, %v8299_v62 }
 0x352   :  { %7948 = vmatmul.mubr.msk.bf16.gmra.mrb[80].mxu1 %vm251_vm2, %v1912_v36  ;;  %8356 = vmatmul.mubr.msk.bf16.gmra.mrb[32].mxu0 %vm251_vm2, %v4629_v41  ;;  %v7907_v36 = vld [vmem:[%s14186_s0 + $0x2d0] sm:$0xff]  ;;  %v7908_v41 = vld [vmem:[%s14186_s0 + $0x2d8] sm:$0xff] }
 0x353   :  { %2303 = vmatprep.mubr.bf16.mxu1 %v14191_v1  ;;  %4912 = vmatprep.mubr.bf16.mxu0 %v14191_v1  ;;  %v1919_v56 = vpack.c.bf16 %v7908_v41, %v7907_v36  ;;  %v8320_v36 = vld [vmem:[%s14186_s0 + $0x291] sm:$0xff] }
 0x35a   :  { %7949 = vmatmul.mubr.msk.bf16.gmra.mrb[84].mxu1 %vm251_vm2, %v1913_v57  ;;  %8357 = vmatmul.mubr.msk.bf16.gmra.mrb[36].mxu0 %vm251_vm2, %v4630_v61  ;;  %v7909_v57 = vld [vmem:[%s14186_s0 + $0x2e8] sm:$0xff]  ;;  %v7910_v61 = vld [vmem:[%s14186_s0 + $0x2f0] sm:$0xff] }
 0x35b   :  { %2313 = vmatprep.mubr.bf16.mxu1 %v14191_v1  ;;  %4922 = vmatprep.mubr.bf16.mxu0 %v14191_v1  ;;  %v1920_v27 = vpack.c.bf16 %v7910_v61, %v7909_v57  ;;  %v8321_v57 = vld [vmem:[%s14186_s0 + $0x2a1] sm:$0xff]  ;;  %v8322_v61 = vld [vmem:[%s14186_s0 + $0x2a9] sm:$0xff] }
 0x362   :  { %7950 = vmatmul.mubr.msk.bf16.gmra.mrb[88].mxu1 %vm251_vm2, %v1914_v44  ;;  %8358 = vmatmul.mubr.msk.bf16.gmra.mrb[40].mxu0 %vm251_vm2, %v4631_v20  ;;  %v8307_v44 = vld [vmem:[%s14186_s0 + $0x1f9] sm:$0xff]  ;;  %v8308_v20 = vld [vmem:[%s14186_s0 + $0x201] sm:$0xff] }
 0x363   :  { %2323 = vmatprep.mubr.bf16.mxu1 %v14191_v1  ;;  %4932 = vmatprep.mubr.bf16.mxu0 %v14191_v1  ;;  %v4638_v5 = vpack.c.bf16 %v8308_v20, %v8307_v44  ;;  %v8323_v20 = vld [vmem:[%s14186_s0 + $0x2b9] sm:$0xff] }
 0x36a   :  { %7951 = vmatmul.mubr.msk.bf16.gmra.mrb[92].mxu1 %vm251_vm2, %v1915_v37  ;;  %8359 = vmatmul.mubr.msk.bf16.gmra.mrb[44].mxu0 %vm251_vm2, %v4632_v10  ;;  %v8312_v37 = vld [vmem:[%s14186_s0 + $0x231] sm:$0xff] }
 0x36b   :  { %2333 = vmatprep.mubr.bf16.mxu1 %v14191_v1  ;;  %4942 = vmatprep.mubr.bf16.mxu0 %v14191_v1 }
 0x372   :  { %7952 = vmatmul.mubr.msk.bf16.gmra.mrb[96].mxu1 %vm251_vm2, %v1916_v40  ;;  %8360 = vmatmul.mubr.msk.bf16.gmra.mrb[48].mxu0 %vm251_vm2, %v4633_v32  ;;  %v8316_v40 = vld [vmem:[%s14186_s0 + $0x261] sm:$0xff] }
 0x373   :  { %2343 = vmatprep.mubr.bf16.mxu1 %v14191_v1  ;;  %4952 = vmatprep.mubr.bf16.mxu0 %v14191_v1  ;;  %v4642_v54 = vpack.c.bf16 %v8316_v40, %v8315_v34 }
 0x37a   :  { %7953 = vmatmul.mubr.msk.bf16.gmra.mrb[100].mxu1 %vm251_vm2, %v1917_v7  ;;  %8361 = vmatmul.mubr.msk.bf16.gmra.mrb[52].mxu0 %vm251_vm2, %v4634_v59  ;;  %v8317_v7 = vld [vmem:[%s14186_s0 + $0x271] sm:$0xff]  ;;  %v8318_v59 = vld [vmem:[%s14186_s0 + $0x279] sm:$0xff] }
 0x37b   :  { %2353 = vmatprep.mubr.bf16.mxu1 %v14191_v1  ;;  %4962 = vmatprep.mubr.bf16.mxu0 %v14191_v1  ;;  %v4643_v28 = vpack.c.bf16 %v8318_v59, %v8317_v7  ;;  %v8327_v7 = vld [vmem:[%s14186_s0 + $0x2e9] sm:$0xff]  ;;  %v8328_v59 = vld [vmem:[%s14186_s0 + $0x2f1] sm:$0xff] }
 0x382   :  { %7954 = vmatmul.mubr.msk.bf16.gmra.mrb[104].mxu1 %vm251_vm2, %v1918_v14  ;;  %8362 = vmatmul.mubr.msk.bf16.gmra.mrb[56].mxu0 %vm251_vm2, %v4635_v30  ;;  %v8319_v30 = vld [vmem:[%s14186_s0 + $0x289] sm:$0xff] }
 0x383   :  { %2363 = vmatprep.mubr.bf16.mxu1 %v14191_v1  ;;  %4972 = vmatprep.mubr.bf16.mxu0 %v14191_v1  ;;  %v4644_v50 = vpack.c.bf16 %v8320_v36, %v8319_v30  ;;  %v4648_v36 = vpack.c.bf16 %v8328_v59, %v8327_v7  ;;  %v8332_v7 = vld [vmem:[%s14186_s0 + $0x321] sm:$0xff] }
 0x38a   :  { %7955 = vmatmul.mubr.msk.bf16.gmra.mrb[108].mxu1 %vm251_vm2, %v1919_v56  ;;  %8363 = vmatmul.mubr.msk.bf16.gmra.mrb[60].mxu0 %vm251_vm2, %v4636_v42 }
 0x38b   :  { %2373 = vmatprep.mubr.bf16.mxu1 %v14191_v1  ;;  %4982 = vmatprep.mubr.bf16.mxu0 %v14191_v1 }
 0x392   :  { %7956 = vmatmul.mubr.msk.bf16.gmra.mrb[112].mxu1 %vm251_vm2, %v1920_v27  ;;  %8364 = vmatmul.mubr.msk.bf16.gmra.mrb[64].mxu0 %vm251_vm2, %v4637_v12  ;;  %v4645_v27 = vpack.c.bf16 %v8322_v61, %v8321_v57  ;;  %v8329_v61 = vld [vmem:[%s14186_s0 + $0x301] sm:$0xff] }
 0x393   :  { %2383 = vmatprep.mubr.bf16.mxu1 %v14191_v1  ;;  %4992 = vmatprep.mubr.bf16.mxu0 %v14191_v1 }
 0x39a   :  { %7957 = vmatmul.mubr.msk.bf16.gmra.mrb[116].mxu1 %vm251_vm2, %v11607_v48  ;;  %8365 = vmatmul.mubr.msk.bf16.gmra.mrb[68].mxu0 %vm251_vm2, %v4638_v5  ;;  %v8311_v48 = vld [vmem:[%s14186_s0 + $0x229] sm:$0xff]  ;;  %v8324_v5 = vld [vmem:[%s14186_s0 + $0x2c1] sm:$0xff] }
 0x39b   :  { %5002 = vmatprep.mubr.bf16.mxu0 %v14191_v1  ;;  %v4640_v10 = vpack.c.bf16 %v8312_v37, %v8311_v48 }
 0x3a2   :  { %8366 = vmatmul.mubr.msk.bf16.gmra.mrb[72].mxu0 %vm251_vm2, %v4639_v11  ;;  %v4646_v11 = vpack.c.bf16 %v8324_v5, %v8323_v20 }
 0x3a3   :  { %5012 = vmatprep.mubr.bf16.mxu0 %v14191_v1 }
 0x3aa   :  { %8367 = vmatmul.mubr.msk.bf16.gmra.mrb[76].mxu0 %vm251_vm2, %v4640_v10  ;;  %v8325_v10 = vld [vmem:[%s14186_s0 + $0x2d1] sm:$0xff] }
 0x3ab   :  { %5022 = vmatprep.mubr.bf16.mxu0 %v14191_v1  ;;  %v4647_v34 = vpack.c.bf16 %v8326_v19, %v8325_v10 }
 0x3b2   :  { %8368 = vmatmul.mubr.msk.bf16.gmra.mrb[80].mxu0 %vm251_vm2, %v4641_v46 }
 0x3b3   :  { %5032 = vmatprep.mubr.bf16.mxu0 %v14191_v1 }
 0x3b5   :  { %v11957_v32 = vpop.f32.mrb[24].mxu1 }
 0x3b6   :  { %v11959_v13 = vpop.f32.mrb[25].mxu1 }
 0x3b7   :  { %v11961_v62 = vpop.f32.mrb[26].mxu1 }
 0x3b8   :  { %v11963_v51 = vpop.f32.mrb[27].mxu1 }
 0x3ba   :  { %8369 = vmatmul.mubr.msk.bf16.gmra.mrb[84].mxu0 %vm251_vm2, %v4642_v54 }
 0x3bb   :  { %5042 = vmatprep.mubr.bf16.mxu0 %v14191_v1 }
 0x3bd   :  { %v11973_v33 = vpop.f32.mrb[28].mxu1 }
 0x3be   :  { %v11975_v2 = vpop.f32.mrb[29].mxu1 }
 0x3bf   :  { %v11977_v18 = vpop.f32.mrb[30].mxu1 }
 0x3c0   :  { %v11979_v14 = vpop.f32.mrb[31].mxu1 }
 0x3c2   :  { %8370 = vmatmul.mubr.msk.bf16.gmra.mrb[88].mxu0 %vm251_vm2, %v4643_v28 }
 0x3c3   :  { %5052 = vmatprep.mubr.bf16.mxu0 %v14191_v1 }
 0x3c5   :  { %v11989_v41 = vpop.f32.mrb[32].mxu1 }
 0x3c6   :  { %v11991_v47 = vpop.f32.mrb[33].mxu1 }
 0x3c7   :  { %v11993_v56 = vpop.f32.mrb[34].mxu1 }
 0x3c8   :  { %v11995_v42 = vpop.f32.mrb[35].mxu1 }
 0x3ca   :  { %8371 = vmatmul.mubr.msk.bf16.gmra.mrb[92].mxu0 %vm251_vm2, %v4644_v50 }
 0x3cb   :  { %5062 = vmatprep.mubr.bf16.mxu0 %v14191_v1 }
 0x3cd   :  { %v12005_v58 = vpop.f32.mrb[36].mxu1 }
 0x3ce   :  { %v12007_v23 = vpop.f32.mrb[37].mxu1 }
 0x3cf   :  { %v12009_v12 = vpop.f32.mrb[38].mxu1 }
 0x3d0   :  { %v12011_v44 = vpop.f32.mrb[39].mxu1 }
 0x3d2   :  { %8372 = vmatmul.mubr.msk.bf16.gmra.mrb[96].mxu0 %vm251_vm2, %v4645_v27  ;;  %v8330_v27 = vld [vmem:[%s14186_s0 + $0x309] sm:$0xff] }
 0x3d3   :  { %5072 = vmatprep.mubr.bf16.mxu0 %v14191_v1 }
 0x3d5   :  { %v12021_v15 = vpop.f32.mrb[40].mxu1 }
 0x3d6   :  { %v12023_v25 = vpop.f32.mrb[41].mxu1 }
 0x3d7   :  { %v12025_v48 = vpop.f32.mrb[42].mxu1 }
 0x3d8   :  { %14392 = vst [vmem:[#allocation2_spill] sm:$0xff] %v12025_v48  ;;  %v12027_v37 = vpop.f32.mrb[43].mxu1 }
 0x3d9   :  { %14393 = vst [vmem:[#allocation3_spill] sm:$0xff] %v12027_v37 }
 0x3da   :  { %8373 = vmatmul.mubr.msk.bf16.gmra.mrb[100].mxu0 %vm251_vm2, %v4646_v11  ;;  %v4649_v11 = vpack.c.bf16 %v8330_v27, %v8329_v61 }
 0x3db   :  { %5082 = vmatprep.mubr.bf16.mxu0 %v14191_v1 }
 0x3dd   :  { %v12037_v26 = vpop.f32.mrb[44].mxu1 }
 0x3de   :  { %14394 = vst [vmem:[#allocation4_spill] sm:$0xff] %v12037_v26  ;;  %v12039_v46 = vpop.f32.mrb[45].mxu1 }
 0x3df   :  { %14395 = vst [vmem:[#allocation5_spill] sm:$0xff] %v12039_v46  ;;  %v12041_v40 = vpop.f32.mrb[46].mxu1 }
 0x3e0   :  { %14396 = vst [vmem:[#allocation6_spill] sm:$0xff] %v12041_v40  ;;  %v12043_v54 = vpop.f32.mrb[47].mxu1 }
 0x3e1   :  { %14397 = vst [vmem:[#allocation7_spill] sm:$0xff] %v12043_v54 }
 0x3e2   :  { %8374 = vmatmul.mubr.msk.bf16.gmra.mrb[104].mxu0 %vm251_vm2, %v4647_v34  ;;  %v8331_v34 = vld [vmem:[%s14186_s0 + $0x319] sm:$0xff] }
 0x3e3   :  { %5092 = vmatprep.mubr.bf16.mxu0 %v14191_v1  ;;  %v4650_v61 = vpack.c.bf16 %v8332_v7, %v8331_v34 }
 0x3e5   :  { %v12053_v28 = vpop.f32.mrb[48].mxu1 }
 0x3e6   :  { %14398 = vst [vmem:[#allocation8_spill] sm:$0xff] %v12053_v28  ;;  %v12055_v30 = vpop.f32.mrb[49].mxu1  ;;  %v8423_v28 = vld [vmem:[%s14186_s0 + $0x27a] sm:$0xff] }
 0x3e7   :  { %14399 = vst [vmem:[#allocation9_spill] sm:$0xff] %v12055_v30  ;;  %v12057_v50 = vpop.f32.mrb[50].mxu1  ;;  %v8422_v30 = vld [vmem:[%s14186_s0 + $0x272] sm:$0xff] }
 0x3e8   :  { %14400 = vst [vmem:[#allocation10_spill] sm:$0xff] %v12057_v50  ;;  %v12059_v57 = vpop.f32.mrb[51].mxu1  ;;  %v14474_v50 = vmov 0  }
 0x3e9   :  { %14401 = vst [vmem:[#allocation11_spill] sm:$0xff] %v12059_v57 }
 0x3ea   :  { %8375 = vmatmul.mubr.msk.bf16.gmra.mrb[108].mxu0 %vm251_vm2, %v4648_v36 }
 0x3eb   :  { %5102 = vmatprep.mubr.bf16.mxu0 %v14191_v1 }
 0x3ed   :  { %v12069_v20 = vpop.f32.mrb[52].mxu1 }
 0x3ee   :  { %14402 = vst [vmem:[#allocation12_spill] sm:$0xff] %v12069_v20  ;;  %v12071_v5 = vpop.f32.mrb[53].mxu1 }
 0x3ef   :  { %14403 = vst [vmem:[#allocation13_spill] sm:$0xff] %v12071_v5  ;;  %v12073_v10 = vpop.f32.mrb[54].mxu1 }
 0x3f0   :  { %14404 = vst [vmem:[#allocation14_spill] sm:$0xff] %v12073_v10  ;;  %v12075_v19 = vpop.f32.mrb[55].mxu1  ;;  %v8379_v10 = vld [vmem:[%s14186_s0 + $0x3a] sm:$0xff] }
 0x3f1   :  { %14405 = vst [vmem:[#allocation15_spill] sm:$0xff] %v12075_v19 }
 0x3f2   :  { %8376 = vmatmul.mubr.msk.bf16.gmra.mrb[112].mxu0 %vm251_vm2, %v4649_v11  ;;  %v8378_v11 = vld [vmem:[%s14186_s0 + $0x32] sm:$0xff] }
 0x3f3   :  { %5112 = vmatprep.mubr.bf16.mxu0 %v14191_v1  ;;  %v5303_v34 = vpack.c.bf16 %v8379_v10, %v8378_v11 }
 0x3f5   :  { %v12085_v59 = vpop.f32.mrb[56].mxu1 }
 0x3f6   :  { %14406 = vst [vmem:[#allocation16_spill] sm:$0xff] %v12085_v59  ;;  %v12087_v36 = vpop.f32.mrb[57].mxu1 }
 0x3f7   :  { %14407 = vst [vmem:[#allocation17_spill] sm:$0xff] %v12087_v36  ;;  %v12089_v27 = vpop.f32.mrb[58].mxu1 }
 0x3f8   :  { %14408 = vst [vmem:[#allocation18_spill] sm:$0xff] %v12089_v27  ;;  %v12091_v19 = vpop.f32.mrb[59].mxu1  ;;  %v8381_v27 = vld [vmem:[%s14186_s0 + $0x52] sm:$0xff] }
 0x3f9   :  { %14409 = vst [vmem:[#allocation19_spill] sm:$0xff] %v12091_v19 }
 0x3fa   :  { %8377 = vmatmul.mubr.msk.bf16.gmra.mrb[116].mxu0 %vm251_vm2, %v4650_v61  ;;  %v8380_v61 = vld [vmem:[%s14186_s0 + $0x4a] sm:$0xff] }
 0x3fb   :  { %5504 = vmatprep.mubr.bf16.mxu0 %v14191_v1  ;;  %v5304_v10 = vpack.c.bf16 %v8381_v27, %v8380_v61 }
 0x3fd   :  { %v12101_v59 = vpop.f32.mrb[60].mxu1 }
 0x3fe   :  { %14410 = vst [vmem:[#allocation20_spill] sm:$0xff] %v12101_v59  ;;  %v12103_v36 = vpop.f32.mrb[61].mxu1 }
 0x3ff   :  { %14411 = vst [vmem:[#allocation21_spill] sm:$0xff] %v12103_v36  ;;  %v12105_v7 = vpop.f32.mrb[62].mxu1 }
 0x400   :  { %14412 = vst [vmem:[#allocation22_spill] sm:$0xff] %v12105_v7  ;;  %v12107_v19 = vpop.f32.mrb[63].mxu1  ;;  %v8383_v7 = vld [vmem:[%s14186_s0 + $0x6a] sm:$0xff] }
 0x401   :  { %14413 = vst [vmem:[#allocation23_spill] sm:$0xff] %v12107_v19 }
 0x402   :  { %8453 = vmatmul.mubr.msk.bf16.vlgmr.msra.gmra.mrb[0].mxu0 %vm251_vm2, %v5303_v34  ;;  %v8382_v34 = vld [vmem:[%s14186_s0 + $0x62] sm:$0xff] }
 0x403   :  { %5514 = vmatprep.mubr.bf16.mxu0 %v14191_v1  ;;  %v5305_v27 = vpack.c.bf16 %v8383_v7, %v8382_v34 }
 0x405   :  { %v12117_v59 = vpop.f32.mrb[64].mxu1 }
 0x406   :  { %14414 = vst [vmem:[#allocation24_spill] sm:$0xff] %v12117_v59  ;;  %v12119_v36 = vpop.f32.mrb[65].mxu1 }
 0x407   :  { %14415 = vst [vmem:[#allocation25_spill] sm:$0xff] %v12119_v36  ;;  %v12121_v11 = vpop.f32.mrb[66].mxu1 }
 0x408   :  { %14416 = vst [vmem:[#allocation26_spill] sm:$0xff] %v12121_v11  ;;  %v12123_v19 = vpop.f32.mrb[67].mxu1  ;;  %v8385_v11 = vld [vmem:[%s14186_s0 + $0x82] sm:$0xff] }
 0x409   :  { %14417 = vst [vmem:[#allocation27_spill] sm:$0xff] %v12123_v19 }
 0x40a   :  { %8454 = vmatmul.mubr.msk.bf16.gmra.mrb[4].mxu0 %vm251_vm2, %v5304_v10  ;;  %v8384_v10 = vld [vmem:[%s14186_s0 + $0x7a] sm:$0xff] }
 0x40b   :  { %5524 = vmatprep.mubr.bf16.mxu0 %v14191_v1  ;;  %v5306_v7 = vpack.c.bf16 %v8385_v11, %v8384_v10 }
 0x40d   :  { %v12133_v59 = vpop.f32.mrb[68].mxu1 }
 0x40e   :  { %14418 = vst [vmem:[#allocation28_spill] sm:$0xff] %v12133_v59  ;;  %v12135_v36 = vpop.f32.mrb[69].mxu1 }
 0x40f   :  { %14419 = vst [vmem:[#allocation29_spill] sm:$0xff] %v12135_v36  ;;  %v12137_v61 = vpop.f32.mrb[70].mxu1 }
 0x410   :  { %14420 = vst [vmem:[#allocation30_spill] sm:$0xff] %v12137_v61  ;;  %v12139_v19 = vpop.f32.mrb[71].mxu1  ;;  %v8387_v61 = vld [vmem:[%s14186_s0 + $0x9a] sm:$0xff] }
 0x411   :  { %14421 = vst [vmem:[#allocation31_spill] sm:$0xff] %v12139_v19 }
 0x412   :  { %8455 = vmatmul.mubr.msk.bf16.gmra.mrb[8].mxu0 %vm251_vm2, %v5305_v27  ;;  %v8386_v27 = vld [vmem:[%s14186_s0 + $0x92] sm:$0xff] }
 0x413   :  { %5534 = vmatprep.mubr.bf16.mxu0 %v14191_v1  ;;  %v5307_v11 = vpack.c.bf16 %v8387_v61, %v8386_v27 }
 0x415   :  { %v12149_v59 = vpop.f32.mrb[72].mxu1 }
 0x416   :  { %14422 = vst [vmem:[#allocation32_spill] sm:$0xff] %v12149_v59  ;;  %v12151_v36 = vpop.f32.mrb[73].mxu1 }
 0x417   :  { %14423 = vst [vmem:[#allocation33_spill] sm:$0xff] %v12151_v36  ;;  %v12153_v34 = vpop.f32.mrb[74].mxu1 }
 0x418   :  { %14424 = vst [vmem:[#allocation34_spill] sm:$0xff] %v12153_v34  ;;  %v12155_v19 = vpop.f32.mrb[75].mxu1  ;;  %v8389_v34 = vld [vmem:[%s14186_s0 + $0xb2] sm:$0xff] }
 0x419   :  { %14425 = vst [vmem:[#allocation35_spill] sm:$0xff] %v12155_v19 }
 0x41a   :  { %8456 = vmatmul.mubr.msk.bf16.gmra.mrb[12].mxu0 %vm251_vm2, %v5306_v7  ;;  %v8388_v7 = vld [vmem:[%s14186_s0 + $0xaa] sm:$0xff] }
 0x41b   :  { %5544 = vmatprep.mubr.bf16.mxu0 %v14191_v1  ;;  %v5308_v61 = vpack.c.bf16 %v8389_v34, %v8388_v7 }
 0x41d   :  { %v12165_v59 = vpop.f32.mrb[76].mxu1 }
 0x41e   :  { %14426 = vst [vmem:[#allocation36_spill] sm:$0xff] %v12165_v59  ;;  %v12167_v36 = vpop.f32.mrb[77].mxu1 }
 0x41f   :  { %14427 = vst [vmem:[#allocation37_spill] sm:$0xff] %v12167_v36  ;;  %v12169_v10 = vpop.f32.mrb[78].mxu1 }
 0x420   :  { %14428 = vst [vmem:[#allocation38_spill] sm:$0xff] %v12169_v10  ;;  %v12171_v19 = vpop.f32.mrb[79].mxu1  ;;  %v8391_v10 = vld [vmem:[%s14186_s0 + $0xca] sm:$0xff] }
 0x421   :  { %14429 = vst [vmem:[#allocation39_spill] sm:$0xff] %v12171_v19 }
 0x422   :  { %8457 = vmatmul.mubr.msk.bf16.gmra.mrb[16].mxu0 %vm251_vm2, %v5307_v11  ;;  %v8390_v11 = vld [vmem:[%s14186_s0 + $0xc2] sm:$0xff] }
 0x423   :  { %5554 = vmatprep.mubr.bf16.mxu0 %v14191_v1  ;;  %v5309_v34 = vpack.c.bf16 %v8391_v10, %v8390_v11 }
 0x425   :  { %v12181_v59 = vpop.f32.mrb[80].mxu1 }
 0x426   :  { %14430 = vst [vmem:[#allocation40_spill] sm:$0xff] %v12181_v59  ;;  %v12183_v36 = vpop.f32.mrb[81].mxu1 }
 0x427   :  { %14431 = vst [vmem:[#allocation41_spill] sm:$0xff] %v12183_v36  ;;  %v12185_v27 = vpop.f32.mrb[82].mxu1 }
 0x428   :  { %14432 = vst [vmem:[#allocation42_spill] sm:$0xff] %v12185_v27  ;;  %v12187_v19 = vpop.f32.mrb[83].mxu1  ;;  %v8393_v27 = vld [vmem:[%s14186_s0 + $0xe2] sm:$0xff] }
 0x429   :  { %14433 = vst [vmem:[#allocation43_spill] sm:$0xff] %v12187_v19 }
 0x42a   :  { %8458 = vmatmul.mubr.msk.bf16.gmra.mrb[20].mxu0 %vm251_vm2, %v5308_v61  ;;  %v8392_v61 = vld [vmem:[%s14186_s0 + $0xda] sm:$0xff] }
 0x42b   :  { %5564 = vmatprep.mubr.bf16.mxu0 %v14191_v1  ;;  %v5310_v10 = vpack.c.bf16 %v8393_v27, %v8392_v61 }
 0x42d   :  { %v12197_v59 = vpop.f32.mrb[84].mxu1 }
 0x42e   :  { %14434 = vst [vmem:[#allocation44_spill] sm:$0xff] %v12197_v59  ;;  %v12199_v36 = vpop.f32.mrb[85].mxu1 }
 0x42f   :  { %14435 = vst [vmem:[#allocation45_spill] sm:$0xff] %v12199_v36  ;;  %v12201_v7 = vpop.f32.mrb[86].mxu1 }
 0x430   :  { %14436 = vst [vmem:[#allocation46_spill] sm:$0xff] %v12201_v7  ;;  %v12203_v19 = vpop.f32.mrb[87].mxu1  ;;  %v8395_v7 = vld [vmem:[%s14186_s0 + $0xfa] sm:$0xff] }
 0x431   :  { %14437 = vst [vmem:[#allocation47_spill] sm:$0xff] %v12203_v19 }
 0x432   :  { %8459 = vmatmul.mubr.msk.bf16.gmra.mrb[24].mxu0 %vm251_vm2, %v5309_v34  ;;  %v8394_v34 = vld [vmem:[%s14186_s0 + $0xf2] sm:$0xff] }
 0x433   :  { %5574 = vmatprep.mubr.bf16.mxu0 %v14191_v1  ;;  %v5311_v27 = vpack.c.bf16 %v8395_v7, %v8394_v34 }
 0x435   :  { %v12213_v59 = vpop.f32.mrb[88].mxu1 }
 0x436   :  { %14438 = vst [vmem:[#allocation48_spill] sm:$0xff] %v12213_v59  ;;  %v12215_v36 = vpop.f32.mrb[89].mxu1 }
 0x437   :  { %14439 = vst [vmem:[#allocation49_spill] sm:$0xff] %v12215_v36  ;;  %v12217_v11 = vpop.f32.mrb[90].mxu1 }
 0x438   :  { %14440 = vst [vmem:[#allocation50_spill] sm:$0xff] %v12217_v11  ;;  %v12219_v19 = vpop.f32.mrb[91].mxu1  ;;  %v8397_v11 = vld [vmem:[%s14186_s0 + $0x112] sm:$0xff] }
 0x439   :  { %14441 = vst [vmem:[#allocation51_spill] sm:$0xff] %v12219_v19 }
 0x43a   :  { %8460 = vmatmul.mubr.msk.bf16.gmra.mrb[28].mxu0 %vm251_vm2, %v5310_v10  ;;  %v8396_v10 = vld [vmem:[%s14186_s0 + $0x10a] sm:$0xff] }
 0x43b   :  { %5584 = vmatprep.mubr.bf16.mxu0 %v14191_v1  ;;  %v5312_v7 = vpack.c.bf16 %v8397_v11, %v8396_v10 }
 0x43d   :  { %v12229_v59 = vpop.f32.mrb[92].mxu1 }
 0x43e   :  { %14442 = vst [vmem:[#allocation52_spill] sm:$0xff] %v12229_v59  ;;  %v12231_v36 = vpop.f32.mrb[93].mxu1 }
 0x43f   :  { %14443 = vst [vmem:[#allocation53_spill] sm:$0xff] %v12231_v36  ;;  %v12233_v61 = vpop.f32.mrb[94].mxu1 }
 0x440   :  { %14444 = vst [vmem:[#allocation54_spill] sm:$0xff] %v12233_v61  ;;  %v12235_v19 = vpop.f32.mrb[95].mxu1  ;;  %v8399_v61 = vld [vmem:[%s14186_s0 + $0x12a] sm:$0xff] }
 0x441   :  { %14445 = vst [vmem:[#allocation55_spill] sm:$0xff] %v12235_v19 }
 0x442   :  { %8461 = vmatmul.mubr.msk.bf16.gmra.mrb[32].mxu0 %vm251_vm2, %v5311_v27  ;;  %v8398_v27 = vld [vmem:[%s14186_s0 + $0x122] sm:$0xff] }
 0x443   :  { %5594 = vmatprep.mubr.bf16.mxu0 %v14191_v1  ;;  %v5313_v11 = vpack.c.bf16 %v8399_v61, %v8398_v27 }
 0x445   :  { %v12245_v59 = vpop.f32.mrb[96].mxu1 }
 0x446   :  { %14446 = vst [vmem:[#allocation56_spill] sm:$0xff] %v12245_v59  ;;  %v12247_v36 = vpop.f32.mrb[97].mxu1 }
 0x447   :  { %14447 = vst [vmem:[#allocation57_spill] sm:$0xff] %v12247_v36  ;;  %v12249_v34 = vpop.f32.mrb[98].mxu1 }
 0x448   :  { %14448 = vst [vmem:[#allocation58_spill] sm:$0xff] %v12249_v34  ;;  %v12251_v19 = vpop.f32.mrb[99].mxu1  ;;  %v8401_v34 = vld [vmem:[%s14186_s0 + $0x142] sm:$0xff] }
 0x449   :  { %14449 = vst [vmem:[#allocation59_spill] sm:$0xff] %v12251_v19 }
 0x44a   :  { %8462 = vmatmul.mubr.msk.bf16.gmra.mrb[36].mxu0 %vm251_vm2, %v5312_v7  ;;  %v8400_v7 = vld [vmem:[%s14186_s0 + $0x13a] sm:$0xff] }
 0x44b   :  { %5604 = vmatprep.mubr.bf16.mxu0 %v14191_v1  ;;  %v5314_v61 = vpack.c.bf16 %v8401_v34, %v8400_v7 }
 0x44d   :  { %v12261_v59 = vpop.f32.mrb[100].mxu1 }
 0x44e   :  { %14450 = vst [vmem:[#allocation60_spill] sm:$0xff] %v12261_v59  ;;  %v12263_v36 = vpop.f32.mrb[101].mxu1 }
 0x44f   :  { %14451 = vst [vmem:[#allocation61_spill] sm:$0xff] %v12263_v36  ;;  %v12265_v10 = vpop.f32.mrb[102].mxu1 }
 0x450   :  { %14452 = vst [vmem:[#allocation62_spill] sm:$0xff] %v12265_v10  ;;  %v12267_v19 = vpop.f32.mrb[103].mxu1  ;;  %v8403_v10 = vld [vmem:[%s14186_s0 + $0x15a] sm:$0xff] }
 0x451   :  { %14453 = vst [vmem:[#allocation63_spill] sm:$0xff] %v12267_v19 }
 0x452   :  { %8463 = vmatmul.mubr.msk.bf16.gmra.mrb[40].mxu0 %vm251_vm2, %v5313_v11  ;;  %v8402_v11 = vld [vmem:[%s14186_s0 + $0x152] sm:$0xff] }
 0x453   :  { %5614 = vmatprep.mubr.bf16.mxu0 %v14191_v1  ;;  %v5315_v34 = vpack.c.bf16 %v8403_v10, %v8402_v11 }
 0x455   :  { %v12277_v59 = vpop.f32.mrb[104].mxu1 }
 0x456   :  { %14454 = vst [vmem:[#allocation64_spill] sm:$0xff] %v12277_v59  ;;  %v12279_v36 = vpop.f32.mrb[105].mxu1 }
 0x457   :  { %14455 = vst [vmem:[#allocation65_spill] sm:$0xff] %v12279_v36  ;;  %v12281_v27 = vpop.f32.mrb[106].mxu1 }
 0x458   :  { %14456 = vst [vmem:[#allocation66_spill] sm:$0xff] %v12281_v27  ;;  %v12283_v19 = vpop.f32.mrb[107].mxu1  ;;  %v8405_v27 = vld [vmem:[%s14186_s0 + $0x172] sm:$0xff] }
 0x459   :  { %14457 = vst [vmem:[#allocation67_spill] sm:$0xff] %v12283_v19 }
 0x45a   :  { %8464 = vmatmul.mubr.msk.bf16.gmra.mrb[44].mxu0 %vm251_vm2, %v5314_v61  ;;  %v8404_v61 = vld [vmem:[%s14186_s0 + $0x16a] sm:$0xff] }
 0x45b   :  { %5624 = vmatprep.mubr.bf16.mxu0 %v14191_v1  ;;  %v5316_v10 = vpack.c.bf16 %v8405_v27, %v8404_v61 }
 0x45d   :  { %v12293_v59 = vpop.f32.mrb[108].mxu1 }
 0x45e   :  { %14458 = vst [vmem:[#allocation68_spill] sm:$0xff] %v12293_v59  ;;  %v12295_v36 = vpop.f32.mrb[109].mxu1 }
 0x45f   :  { %14459 = vst [vmem:[#allocation69_spill] sm:$0xff] %v12295_v36  ;;  %v12297_v7 = vpop.f32.mrb[110].mxu1 }
 0x460   :  { %14460 = vst [vmem:[#allocation70_spill] sm:$0xff] %v12297_v7  ;;  %v12299_v19 = vpop.f32.mrb[111].mxu1  ;;  %v8407_v7 = vld [vmem:[%s14186_s0 + $0x18a] sm:$0xff] }
 0x461   :  { %14461 = vst [vmem:[#allocation71_spill] sm:$0xff] %v12299_v19 }
 0x462   :  { %8465 = vmatmul.mubr.msk.bf16.gmra.mrb[48].mxu0 %vm251_vm2, %v5315_v34  ;;  %v8406_v34 = vld [vmem:[%s14186_s0 + $0x182] sm:$0xff] }
 0x463   :  { %5634 = vmatprep.mubr.bf16.mxu0 %v14191_v1  ;;  %v5317_v27 = vpack.c.bf16 %v8407_v7, %v8406_v34  ;;  %v8410_v7 = vld [vmem:[%s14186_s0 + $0x1e2] sm:$0xff]  ;;  %v8411_v34 = vld [vmem:[%s14186_s0 + $0x1ea] sm:$0xff] }
 0x465   :  { %v12309_v59 = vpop.f32.mrb[112].mxu1 }
 0x466   :  { %14462 = vst [vmem:[#allocation72_spill] sm:$0xff] %v12309_v59  ;;  %v12311_v36 = vpop.f32.mrb[113].mxu1 }
 0x467   :  { %14463 = vst [vmem:[#allocation73_spill] sm:$0xff] %v12311_v36  ;;  %v12313_v11 = vpop.f32.mrb[114].mxu1 }
 0x468   :  { %14464 = vst [vmem:[#allocation74_spill] sm:$0xff] %v12313_v11  ;;  %v12315_v19 = vpop.f32.mrb[115].mxu1  ;;  %v8409_v11 = vld [vmem:[%s14186_s0 + $0x1d2] sm:$0xff] }
 0x469   :  { %14465 = vst [vmem:[#allocation75_spill] sm:$0xff] %v12315_v19 }
 0x46a   :  { %8466 = vmatmul.mubr.msk.bf16.gmra.mrb[52].mxu0 %vm251_vm2, %v5316_v10  ;;  %v8408_v10 = vld [vmem:[%s14186_s0 + $0x1ca] sm:$0xff] }
 0x46b   :  { %5644 = vmatprep.mubr.bf16.mxu0 %v14191_v1 }
 0x46d   :  { %v12325_v59 = vpop.f32.mrb[116].mxu1 }
 0x46e   :  { %14466 = vst [vmem:[#allocation76_spill] sm:$0xff] %v12325_v59  ;;  %v12327_v36 = vpop.f32.mrb[117].mxu1  ;;  %v5318_v59 = vpack.c.bf16 %v8409_v11, %v8408_v10  ;;  %v8412_v11 = vld [vmem:[%s14186_s0 + $0x1fa] sm:$0xff] }
 0x46f   :  { %14467 = vst [vmem:[#allocation77_spill] sm:$0xff] %v12327_v36  ;;  %v12329_v61 = vpop.f32.mrb[118].mxu1 }
 0x470   :  { %14468 = vst [vmem:[#allocation78_spill] sm:$0xff] %v12329_v61  ;;  %v12331_v19 = vpop.f32.mrb[119].mxu1  ;;  %v6437_v61 = vld [vmem:[%s14187_s4 + $0x8] sm:$0xff] }
 0x471   :  { %14469 = vst [vmem:[#allocation79_spill] sm:$0xff] %v12331_v19  ;;  %v6452_v19 = vld [vmem:[%s14187_s4 + $0x80] sm:$0xff] }
 0x472   :  { %8467 = vmatmul.mubr.msk.bf16.gmra.mrb[56].mxu0 %vm251_vm2, %v5317_v27  ;;  %v5319_v27 = vpack.c.bf16 %v8411_v34, %v8410_v7  ;;  %v8414_v7 = vld [vmem:[%s14186_s0 + $0x212] sm:$0xff]  ;;  %v8415_v34 = vld [vmem:[%s14186_s0 + $0x21a] sm:$0xff] }
 0x473   :  { %5654 = vmatprep.mubr.bf16.mxu0 %v14191_v1 }
 0x47a   :  { %8468 = vmatmul.mubr.msk.bf16.gmra.mrb[60].mxu0 %vm251_vm2, %v5318_v59  ;;  %v8413_v59 = vld [vmem:[%s14186_s0 + $0x202] sm:$0xff] }
 0x47b   :  { %5664 = vmatprep.mubr.bf16.mxu0 %v14191_v1  ;;  %v5320_v10 = vpack.c.bf16 %v8413_v59, %v8412_v11  ;;  %v8416_v11 = vld [vmem:[%s14186_s0 + $0x22a] sm:$0xff]  ;;  %v8417_v59 = vld [vmem:[%s14186_s0 + $0x232] sm:$0xff] }
 0x482   :  { %8469 = vmatmul.mubr.msk.bf16.gmra.mrb[64].mxu0 %vm251_vm2, %v5319_v27  ;;  %v5321_v27 = vpack.c.bf16 %v8415_v34, %v8414_v7  ;;  %v8418_v7 = vld [vmem:[%s14186_s0 + $0x242] sm:$0xff]  ;;  %v8419_v34 = vld [vmem:[%s14186_s0 + $0x24a] sm:$0xff] }
 0x483   :  { %5674 = vmatprep.mubr.bf16.mxu0 %v14191_v1 }
 0x48a   :  { %8470 = vmatmul.mubr.msk.bf16.gmra.mrb[68].mxu0 %vm251_vm2, %v5320_v10  ;;  %v5322_v10 = vpack.c.bf16 %v8417_v59, %v8416_v11  ;;  %v8420_v11 = vld [vmem:[%s14186_s0 + $0x25a] sm:$0xff]  ;;  %v8421_v59 = vld [vmem:[%s14186_s0 + $0x262] sm:$0xff] }
 0x48b   :  { %5684 = vmatprep.mubr.bf16.mxu0 %v14191_v1 }
 0x492   :  { %8471 = vmatmul.mubr.msk.bf16.gmra.mrb[72].mxu0 %vm251_vm2, %v5321_v27  ;;  %v5323_v27 = vpack.c.bf16 %v8419_v34, %v8418_v7  ;;  %v6453_v7 = vld [vmem:[%s14187_s4 + $0x88] sm:$0xff]  ;;  %v6436_v34 = vld [vmem:[%s14187_s4] sm:$0xff] }
 0x493   :  { %5694 = vmatprep.mubr.bf16.mxu0 %v14191_v1  ;;  %v6469_v36 = vand.u32 4294901760, %v6436_v34 }
 0x495   :  { %v12408_v57 = vsub.f32 %v6436_v34, %v6469_v36  ;;  %v6454_v34 = vld [vmem:[%s14187_s4 + $0x90] sm:$0xff] }
 0x497   :  { %14473 = vst [vmem:[#allocation83_spill] sm:$0xff] %v12408_v57 }
 0x49a   :  { %8472 = vmatmul.mubr.msk.bf16.gmra.mrb[76].mxu0 %vm251_vm2, %v5322_v10  ;;  %v5324_v10 = vpack.c.bf16 %v8421_v59, %v8420_v11  ;;  %v6472_v11 = vand.u32 4294901760, %v6437_v61 }
 0x49b   :  { %5704 = vmatprep.mubr.bf16.mxu0 %v14191_v1 }
 0x49c   :  { %v12417_v54 = vpack.c.bf16 %v6472_v11, %v6469_v36  ;;  %v8425_v36 = vld [vmem:[%s14186_s0 + $0x292] sm:$0xff] }
 0x49e   :  { %14475 = vst [vmem:[#allocation84_spill] sm:$0xff] %v12417_v54 }
 0x4a2   :  { %8473 = vmatmul.mubr.msk.bf16.gmra.mrb[80].mxu0 %vm251_vm2, %v5323_v27  ;;  %v6517_v27 = vand.u32 4294901760, %v6452_v19 }
 0x4a3   :  { %5714 = vmatprep.mubr.bf16.mxu0 %v14191_v1  ;;  %v6520_v1 = vand.u32 4294901760, %v6453_v7 }
 0x4a4   :  { %v12404_v5 = vsub.f32 %v6452_v19, %v6517_v27  ;;  %v8424_v19 = vld [vmem:[%s14186_s0 + $0x28a] sm:$0xff] }
 0x4a5   :  { %v12402_v59 = vpack.c.bf16 %v6520_v1, %v6517_v27  ;;  %v12406_v20 = vsub.f32 %v6453_v7, %v6520_v1  ;;  %v5325_v1 = vpack.c.bf16 %v8423_v28, %v8422_v30  ;;  %v5326_v7 = vpack.c.bf16 %v8425_v36, %v8424_v19  ;;  %v8426_v28 = vld [vmem:[%s14186_s0 + $0x2a2] sm:$0xff]  ;;  %v8427_v30 = vld [vmem:[%s14186_s0 + $0x2aa] sm:$0xff]  ;;  %v6455_v27 = vld [vmem:[%s14187_s4 + $0x98] sm:$0xff] }
 0x4a6   :  { %14471 = vst [vmem:[#allocation81_spill] sm:$0xff] %v12404_v5  ;;  %v6526_v19 = vand.u32 4294901760, %v6455_v27  ;;  %v6439_v36 = vld [vmem:[%s14187_s4 + $0x18] sm:$0xff] }
 0x4a7   :  { %14470 = vst [vmem:[#allocation80_spill] sm:$0xff] %v12402_v59  ;;  %14472 = vst [vmem:[#allocation82_spill] sm:$0xff] %v12406_v20  ;;  %8748 = vmatprep.subr.bf16.mxu1 %v12402_v59  ;;  %v8428_v5 = vld [vmem:[%s14186_s0 + $0x2ba] sm:$0xff] }
 0x4a8   :  { %8750 = vmatpush3.bf16.msra.mxu1 %v12417_v54  ;;  %v12455_v59 = vsub.f32 %v6455_v27, %v6526_v19 }
 0x4aa   :  { %8474 = vmatmul.mubr.msk.bf16.gmra.mrb[84].mxu0 %vm251_vm2, %v5324_v10  ;;  %v12419_v10 = vsub.f32 %v6437_v61, %v6472_v11  ;;  %v5327_v61 = vpack.c.bf16 %v8427_v30, %v8426_v28  ;;  %v6438_v11 = vld [vmem:[%s14187_s4 + $0x10] sm:$0xff]  ;;  %v6478_v28 = vand.u32 4294901760, %v6439_v36  ;;  %14479 = vst [vmem:[#allocation88_spill] sm:$0xff] %v12455_v59 }
 0x4ab   :  { %5724 = vmatprep.mubr.bf16.mxu0 %v14474_v50 }
 0x4ac   :  { %14476 = vst [vmem:[#allocation85_spill] sm:$0xff] %v12419_v10  ;;  %v12462_v20 = vsub.f32 %v6439_v36, %v6478_v28 }
 0x4ae   :  { %14482 = vst [vmem:[#allocation91_spill] sm:$0xff] %v12462_v20 }
 0x4b2   :  { %8475 = vmatmul.mubr.msk.bf16.gmra.mrb[88].mxu0 %vm251_vm2, %v5325_v1  ;;  %v6523_v1 = vand.u32 4294901760, %v6454_v34 }
 0x4b3   :  { %5734 = vmatprep.mubr.bf16.mxu0 %v14474_v50 }
 0x4b4   :  { %v12451_v30 = vpack.c.bf16 %v6526_v19, %v6523_v1  ;;  %v12453_v54 = vsub.f32 %v6454_v34, %v6523_v1  ;;  %v8429_v34 = vld [vmem:[%s14186_s0 + $0x2c2] sm:$0xff]  ;;  %v8431_v1 = vld [vmem:[%s14186_s0 + $0x2da] sm:$0xff] }
 0x4b5   :  { %v5328_v27 = vpack.c.bf16 %v8429_v34, %v8428_v5  ;;  %v8432_v5 = vld [vmem:[%s14186_s0 + $0x2ea] sm:$0xff] }
 0x4b6   :  { %14477 = vst [vmem:[#allocation86_spill] sm:$0xff] %v12451_v30  ;;  %14478 = vst [vmem:[#allocation87_spill] sm:$0xff] %v12453_v54  ;;  %8752 = vmatprep.subr.bf16.mxu1 %v12451_v30 }
 0x4ba   :  { %8476 = vmatmul.mubr.msk.bf16.gmra.mrb[92].mxu0 %vm251_vm2, %v5326_v7  ;;  %v6475_v7 = vand.u32 4294901760, %v6438_v11 }
 0x4bb   :  { %5744 = vmatprep.mubr.bf16.mxu0 %v14474_v50 }
 0x4bc   :  { %v12457_v10 = vsub.f32 %v6438_v11, %v6475_v7  ;;  %v12460_v57 = vpack.c.bf16 %v6478_v28, %v6475_v7  ;;  %v8430_v11 = vld [vmem:[%s14186_s0 + $0x2d2] sm:$0xff] }
 0x4bd   :  { %v5329_v19 = vpack.c.bf16 %v8431_v1, %v8430_v11  ;;  %v8433_v28 = vld [vmem:[%s14186_s0 + $0x2f2] sm:$0xff]  ;;  %v6456_v1 = vld [vmem:[%s14187_s4 + $0xa0] sm:$0xff] }
 0x4be   :  { %14480 = vst [vmem:[#allocation89_spill] sm:$0xff] %v12457_v10  ;;  %14481 = vst [vmem:[#allocation90_spill] sm:$0xff] %v12460_v57  ;;  %8754 = vmatpush3.bf16.msra.mxu1 %v12460_v57 }
 0x4c2   :  { %8477 = vmatmul.mubr.msk.bf16.gmra.mrb[96].mxu0 %vm251_vm2, %v5327_v61  ;;  %v5925_v61 = vlaneseq }
 0x4c3   :  { %5754 = vmatprep.mubr.bf16.mxu0 %v14474_v50 }
 0x4c4   :  { %v5926_v36 = vshrl.u32 %v5925_v61, 7  ;;  %v5330_v61 = vpack.c.bf16 %v8433_v28, %v8432_v5  ;;  %v6441_v5 = vld [vmem:[%s14187_s4 + $0x28] sm:$0xff] }
 0x4c5   :  { %v6484_v54 = vand.u32 4294901760, %v6441_v5 }
 0x4c6   :  { %v12482_v7 = vadd.s32 8, %v5926_v36  ;;  %v6440_v36 = vld [vmem:[%s14187_s4 + $0x20] sm:$0xff] }
 0x4c7   :  { %v6481_v28 = vand.u32 4294901760, %v6440_v36 }
 0x4c8   :  { %vm5929_vm3 = vcmp.lt.s32.totalorder %v12482_v7, 15 }
 0x4c9   :  { %v12532_v37 = vpack.c.bf16 %v6484_v54, %v6481_v28 }
 0x4ca   :  { %8478 = vmatmul.mubr.msk.bf16.gmra.mrb[100].mxu0 %vm251_vm2, %v5328_v27 }
 0x4cb   :  { %5764 = vmatprep.mubr.bf16.mxu0 %v14474_v50  ;;  %14490 = vst [vmem:[#allocation99_spill] sm:$0xff] %v12532_v37 }
 0x4d2   :  { %8479 = vmatmul.mubr.msk.bf16.gmra.mrb[104].mxu0 %vm251_vm2, %v5329_v19  ;;  %v6457_v19 = vld [vmem:[%s14187_s4 + $0xa8] sm:$0xff] }
 0x4d3   :  { %5774 = vmatprep.mubr.bf16.mxu0 %v14474_v50  ;;  %v6532_v30 = vand.u32 4294901760, %v6457_v19 }
 0x4d5   :  { %v5506_v34 = vpop.f32.mrb[0].mxu0 }
 0x4d6   :  { %v12492_v27 = vadd.f32 %v5506_v34, %v11485_v45  ;;  %v5508_v11 = vpop.f32.mrb[1].mxu0  ;;  %v6529_v34 = vand.u32 4294901760, %v6456_v1 }
 0x4d7   :  { %v12505_v57 = vadd.f32 %v5508_v11, %v11487_v53  ;;  %v5510_v45 = vpop.f32.mrb[2].mxu0 }
 0x4d8   :  { %14483 = vst [vmem:[#allocation92_spill] sm:$0xff] %v12492_v27  ;;  %v6184_v20 = vmul.f32 %v12492_v27, %v12492_v27  ;;  %v12513_v10 = vadd.f32 %v5510_v45, %v11489_v60  ;;  %v5512_v59 = vpop.f32.mrb[3].mxu0  ;;  %v12520_v40 = vpack.c.bf16 %v6532_v30, %v6529_v34  ;;  %v12522_v46 = vsub.f32 %v6456_v1, %v6529_v34  ;;  %v8434_v34 = vld [vmem:[%s14186_s0 + $0x302] sm:$0xff] }
 0x4d9   :  { %14484 = vst [vmem:[#allocation93_spill] sm:$0xff] %v12505_v57  ;;  %v6185_v53 = vmul.f32 %v12505_v57, %v12505_v57  ;;  %v12518_v11 = vadd.f32 %v5512_v59, %v11491_v4  ;;  %v12530_v45 = vsub.f32 %v6457_v19, %v6532_v30  ;;  %v8435_v30 = vld [vmem:[%s14186_s0 + $0x30a] sm:$0xff]  ;;  %v12552_v60 = vsub.f32 %v6441_v5, %v6484_v54 }
 0x4da   :  { %14485 = vst [vmem:[#allocation94_spill] sm:$0xff] %v12513_v10  ;;  %14487 = vst [vmem:[#allocation96_spill] sm:$0xff] %v12520_v40  ;;  %v5936_v26 = vsel %vm5929_vm3, %v12513_v10, 0.0  ;;  %8480 = vmatmul.mubr.msk.bf16.gmra.mrb[108].mxu0 %vm251_vm2, %v5330_v61  ;;  %8756 = vmatprep.subr.bf16.mxu1 %v12520_v40  ;;  %v12547_v61 = vsub.f32 %v6440_v36, %v6481_v28  ;;  %v5331_v36 = vpack.c.bf16 %v8435_v30, %v8434_v34 }
 0x4db   :  { %14486 = vst [vmem:[#allocation95_spill] sm:$0xff] %v12518_v11  ;;  %14488 = vst [vmem:[#allocation97_spill] sm:$0xff] %v12522_v46  ;;  %v6054_v4 = vadd.f32 %v12492_v27, %v5936_v26  ;;  %v6186_v59 = vmul.f32 %v12513_v10, %v5936_v26  ;;  %v5937_v1 = vsel %vm5929_vm3, %v12518_v11, 0.0  ;;  %5784 = vmatprep.mubr.bf16.mxu0 %v14474_v50  ;;  %8758 = vmatpush3.bf16.msra.mxu1 %v12532_v37 }
 0x4dc   :  { %14489 = vst [vmem:[#allocation98_spill] sm:$0xff] %v12530_v45  ;;  %14491 = vst [vmem:[#allocation100_spill] sm:$0xff] %v12547_v61  ;;  %v6119_v26 = vadd.f32 %v12505_v57, %v5937_v1  ;;  %v6187_v19 = vmul.f32 %v12518_v11, %v5937_v1 }
 0x4dd   :  { %v6304_v10 = vadd.f32 %v6186_v59, %v6184_v20  ;;  %v5516_v45 = vpop.f32.mrb[4].mxu0 }
 0x4de   :  { %v6369_v46 = vadd.f32 %v6187_v19, %v6185_v53  ;;  %v12557_v48 = vadd.f32 %v5516_v45, %v11499_v9  ;;  %v5518_v40 = vpop.f32.mrb[5].mxu0 }
 0x4df   :  { %v12560_v28 = vadd.f32 %v5518_v40, %v11501_v16  ;;  %v5520_v61 = vpop.f32.mrb[6].mxu0 }
 0x4e0   :  { %14492 = vst [vmem:[#allocation101_spill] sm:$0xff] %v12557_v48  ;;  %v6055_v1 = vadd.f32 %v12557_v48, %v6054_v4  ;;  %v6188_v54 = vmul.f32 %v12557_v48, %v12557_v48  ;;  %v12566_v5 = vadd.f32 %v5520_v61, %v11503_v24  ;;  %v5522_v20 = vpop.f32.mrb[7].mxu0 }
 0x4e1   :  { %14493 = vst [vmem:[#allocation102_spill] sm:$0xff] %v12560_v28  ;;  %v6120_v53 = vadd.f32 %v12560_v28, %v6119_v26  ;;  %v6189_v9 = vmul.f32 %v12560_v28, %v12560_v28  ;;  %v12572_v45 = vadd.f32 %v5522_v20, %v11505_v29  ;;  %v8436_v29 = vld [vmem:[%s14186_s0 + $0x31a] sm:$0xff] }
 0x4e2   :  { %14494 = vst [vmem:[#allocation103_spill] sm:$0xff] %v12566_v5  ;;  %v6305_v16 = vadd.f32 %v6304_v10, %v6188_v54  ;;  %v5940_v40 = vsel %vm5929_vm3, %v12566_v5, 0.0  ;;  %8481 = vmatmul.mubr.msk.bf16.gmra.mrb[112].mxu0 %vm251_vm2, %v5331_v36  ;;  %v8437_v10 = vld [vmem:[%s14186_s0 + $0x322] sm:$0xff] }
 0x4e3   :  { %14495 = vst [vmem:[#allocation104_spill] sm:$0xff] %v12572_v45  ;;  %v6370_v24 = vadd.f32 %v6369_v46, %v6189_v9  ;;  %v6056_v59 = vadd.f32 %v6055_v1, %v5940_v40  ;;  %v6190_v34 = vmul.f32 %v12566_v5, %v5940_v40  ;;  %v5941_v30 = vsel %vm5929_vm3, %v12572_v45, 0.0  ;;  %5794 = vmatprep.mubr.bf16.mxu0 %v14474_v50 }
 0x4e4   :  { %v6121_v61 = vadd.f32 %v6120_v53, %v5941_v30  ;;  %v6191_v46 = vmul.f32 %v12572_v45, %v5941_v30  ;;  %v5332_v20 = vpack.c.bf16 %v8437_v10, %v8436_v29 }
 0x4e5   :  { %v6306_v19 = vadd.f32 %v6305_v16, %v6190_v34  ;;  %v5526_v36 = vpop.f32.mrb[8].mxu0 }
 0x4e6   :  { %v6371_v1 = vadd.f32 %v6370_v24, %v6191_v46  ;;  %v12595_v54 = vadd.f32 %v5526_v36, %v11513_v38  ;;  %v5528_v50 = vpop.f32.mrb[9].mxu0 }
 0x4e7   :  { %v12598_v9 = vadd.f32 %v5528_v50, %v11515_v39  ;;  %v5530_v40 = vpop.f32.mrb[10].mxu0 }
 0x4e8   :  { %14496 = vst [vmem:[#allocation105_spill] sm:$0xff] %v12595_v54  ;;  %v6057_v4 = vadd.f32 %v12595_v54, %v6056_v59  ;;  %v6192_v53 = vmul.f32 %v12595_v54, %v12595_v54  ;;  %v12604_v30 = vadd.f32 %v5530_v40, %v11517_v52  ;;  %v5532_v16 = vpop.f32.mrb[11].mxu0 }
 0x4e9   :  { %14497 = vst [vmem:[#allocation106_spill] sm:$0xff] %v12598_v9  ;;  %v6122_v24 = vadd.f32 %v12598_v9, %v6121_v61  ;;  %v6193_v38 = vmul.f32 %v12598_v9, %v12598_v9  ;;  %v12610_v34 = vadd.f32 %v5532_v16, %v11519_v55 }
 0x4ea   :  { %14498 = vst [vmem:[#allocation107_spill] sm:$0xff] %v12604_v30  ;;  %v6307_v39 = vadd.f32 %v6306_v19, %v6192_v53  ;;  %v5944_v59 = vsel %vm5929_vm3, %v12604_v30, 0.0  ;;  %8482 = vmatmul.mubr.msk.bf16.gmra.mrb[116].mxu0 %vm251_vm2, %v5332_v20  ;;  %v6459_v20 = vld [vmem:[%s14187_s4 + $0xb8] sm:$0xff] }
 0x4eb   :  { %14499 = vst [vmem:[#allocation108_spill] sm:$0xff] %v12610_v34  ;;  %v6372_v52 = vadd.f32 %v6371_v1, %v6193_v38  ;;  %v6058_v10 = vadd.f32 %v6057_v4, %v5944_v59  ;;  %v6194_v61 = vmul.f32 %v12604_v30, %v5944_v59  ;;  %v5945_v46 = vsel %vm5929_vm3, %v12610_v34, 0.0  ;;  %v6458_v4 = vld [vmem:[%s14187_s4 + $0xb0] sm:$0xff] }
 0x4ec   :  { %v6123_v55 = vadd.f32 %v6122_v24, %v5945_v46  ;;  %v6195_v19 = vmul.f32 %v12610_v34, %v5945_v46  ;;  %v6442_v24 = vld [vmem:[%s14187_s4 + $0x30] sm:$0xff]  ;;  %v6535_v59 = vand.u32 4294901760, %v6458_v4 }
 0x4ed   :  { %v6308_v50 = vadd.f32 %v6307_v39, %v6194_v61  ;;  %v5536_v40 = vpop.f32.mrb[12].mxu0  ;;  %v6487_v61 = vand.u32 4294901760, %v6442_v24 }
 0x4ee   :  { %v6373_v53 = vadd.f32 %v6372_v52, %v6195_v19  ;;  %v12626_v16 = vadd.f32 %v5536_v40, %v11533_v22  ;;  %v5538_v1 = vpop.f32.mrb[13].mxu0  ;;  %v6538_v22 = vand.u32 4294901760, %v6459_v20  ;;  %v6443_v52 = vld [vmem:[%s14187_s4 + $0x38] sm:$0xff] }
 0x4ef   :  { %v12638_v38 = vadd.f32 %v5538_v1, %v11535_v43  ;;  %v5540_v39 = vpop.f32.mrb[14].mxu0  ;;  %v6490_v36 = vand.u32 4294901760, %v6443_v52 }
 0x4f0   :  { %14500 = vst [vmem:[#allocation109_spill] sm:$0xff] %v12626_v16  ;;  %v6059_v46 = vadd.f32 %v12626_v16, %v6058_v10  ;;  %v6196_v19 = vmul.f32 %v12626_v16, %v12626_v16  ;;  %v12647_v40 = vadd.f32 %v5540_v39, %v11537_v8  ;;  %v5542_v29 = vpop.f32.mrb[15].mxu0  ;;  %v12655_v27 = vpack.c.bf16 %v6538_v22, %v6535_v59 }
 0x4f1   :  { %14501 = vst [vmem:[#allocation110_spill] sm:$0xff] %v12638_v38  ;;  %v6124_v43 = vadd.f32 %v12638_v38, %v6123_v55  ;;  %v6197_v1 = vmul.f32 %v12638_v38, %v12638_v38  ;;  %v12653_v26 = vadd.f32 %v5542_v29, %v11539_v63  ;;  %v12662_v39 = vsub.f32 %v6458_v4, %v6535_v59 }
 0x4f2   :  { %14502 = vst [vmem:[#allocation111_spill] sm:$0xff] %v12647_v40  ;;  %14504 = vst [vmem:[#allocation113_spill] sm:$0xff] %v12655_v27  ;;  %v6309_v54 = vadd.f32 %v6308_v50, %v6196_v19  ;;  %v5948_v10 = vsel %vm5929_vm3, %v12647_v40, 0.0  ;;  %8760 = vmatprep.subr.bf16.mxu1 %v12655_v27  ;;  %v12670_v19 = vsub.f32 %v6459_v20, %v6538_v22 }
 0x4f3   :  { %14503 = vst [vmem:[#allocation112_spill] sm:$0xff] %v12653_v26  ;;  %v6374_v30 = vadd.f32 %v6373_v53, %v6197_v1  ;;  %v6060_v55 = vadd.f32 %v6059_v46, %v5948_v10  ;;  %v6198_v9 = vmul.f32 %v12647_v40, %v5948_v10  ;;  %v5949_v63 = vsel %vm5929_vm3, %v12653_v26, 0.0  ;;  %v14596_v40 = vld [vmem:[#allocation83_spill] sm:$0xff] }
 0x4f4   :  { %v6125_v29 = vadd.f32 %v6124_v43, %v5949_v63  ;;  %v6199_v50 = vmul.f32 %v12653_v26, %v5949_v63  ;;  %v12672_v34 = vpack.c.bf16 %v6490_v36, %v6487_v61  ;;  %v12674_v59 = vsub.f32 %v6442_v24, %v6487_v61 }
 0x4f5   :  { %v6310_v8 = vadd.f32 %v6309_v54, %v6198_v9  ;;  %v5546_v4 = vpop.f32.mrb[16].mxu0  ;;  %v12676_v53 = vsub.f32 %v6443_v52, %v6490_v36  ;;  %v14322_v27 = vand.u32 4294901760, %v12662_v39 }
 0x4f6   :  { %14505 = vst [vmem:[#allocation114_spill] sm:$0xff] %v12672_v34  ;;  %v6375_v1 = vadd.f32 %v6374_v30, %v6199_v50  ;;  %v12681_v10 = vadd.f32 %v5546_v4, %v11552_v0  ;;  %v5548_v43 = vpop.f32.mrb[17].mxu0  ;;  %8762 = vmatpush3.bf16.msra.mxu1 %v12672_v34 }
 0x4f7   :  { %v12685_v20 = vadd.f32 %v5548_v43, %v11554_v3  ;;  %v5550_v22 = vpop.f32.mrb[18].mxu0 }
 0x4f8   :  { %14506 = vst [vmem:[#allocation115_spill] sm:$0xff] %v12681_v10  ;;  %v6061_v54 = vadd.f32 %v12681_v10, %v6060_v55  ;;  %v6200_v9 = vmul.f32 %v12681_v10, %v12681_v10  ;;  %v12691_v36 = vadd.f32 %v5550_v22, %v11556_v17  ;;  %v5552_v24 = vpop.f32.mrb[19].mxu0 }
 0x4f9   :  { %14507 = vst [vmem:[#allocation116_spill] sm:$0xff] %v12685_v20  ;;  %v6126_v30 = vadd.f32 %v12685_v20, %v6125_v29  ;;  %v6201_v0 = vmul.f32 %v12685_v20, %v12685_v20  ;;  %v12697_v52 = vadd.f32 %v5552_v24, %v11558_v6 }
 0x4fa   :  { %14508 = vst [vmem:[#allocation117_spill] sm:$0xff] %v12691_v36  ;;  %v6311_v3 = vadd.f32 %v6310_v8, %v6200_v9  ;;  %v5952_v61 = vsel %vm5929_vm3, %v12691_v36, 0.0 }
 0x4fb   :  { %14509 = vst [vmem:[#allocation118_spill] sm:$0xff] %v12697_v52  ;;  %v6376_v63 = vadd.f32 %v6375_v1, %v6201_v0  ;;  %v6062_v17 = vadd.f32 %v6061_v54, %v5952_v61  ;;  %v6202_v50 = vmul.f32 %v12691_v36, %v5952_v61  ;;  %v5953_v29 = vsel %vm5929_vm3, %v12697_v52, 0.0 }
 0x4fc   :  { %v6127_v4 = vadd.f32 %v6126_v30, %v5953_v29  ;;  %v6203_v6 = vmul.f32 %v12697_v52, %v5953_v29  ;;  %v14595_v52 = vld [vmem:[#allocation82_spill] sm:$0xff] }
 0x4fd   :  { %v6312_v43 = vadd.f32 %v6311_v3, %v6202_v50  ;;  %v5556_v22 = vpop.f32.mrb[20].mxu0  ;;  %v14276_v16 = vand.u32 4294901760, %v14595_v52 }
 0x4fe   :  { %v6377_v9 = vadd.f32 %v6376_v63, %v6203_v6  ;;  %v12712_v24 = vadd.f32 %v5556_v22, %v11571_v35  ;;  %v5558_v1 = vpop.f32.mrb[21].mxu0 }
 0x4ff   :  { %v12715_v54 = vadd.f32 %v5558_v1, %v11573_v31  ;;  %v5560_v0 = vpop.f32.mrb[22].mxu0 }
 0x500   :  { %14510 = vst [vmem:[#allocation119_spill] sm:$0xff] %v12712_v24  ;;  %v6063_v61 = vadd.f32 %v12712_v24, %v6062_v17  ;;  %v6204_v30 = vmul.f32 %v12712_v24, %v12712_v24  ;;  %v12721_v29 = vadd.f32 %v5560_v0, %v11575_v49  ;;  %v5562_v55 = vpop.f32.mrb[23].mxu0 }
 0x501   :  { %14511 = vst [vmem:[#allocation120_spill] sm:$0xff] %v12715_v54  ;;  %v6128_v3 = vadd.f32 %v12715_v54, %v6127_v4  ;;  %v6205_v35 = vmul.f32 %v12715_v54, %v12715_v54  ;;  %v12727_v63 = vadd.f32 %v5562_v55, %v11577_v21 }
 0x502   :  { %14512 = vst [vmem:[#allocation121_spill] sm:$0xff] %v12721_v29  ;;  %v6313_v31 = vadd.f32 %v6312_v43, %v6204_v30  ;;  %v5956_v17 = vsel %vm5929_vm3, %v12721_v29, 0.0 }
 0x503   :  { %14513 = vst [vmem:[#allocation122_spill] sm:$0xff] %v12727_v63  ;;  %v6378_v6 = vadd.f32 %v6377_v9, %v6205_v35  ;;  %v6064_v49 = vadd.f32 %v6063_v61, %v5956_v17  ;;  %v6206_v22 = vmul.f32 %v12721_v29, %v5956_v17  ;;  %v5957_v4 = vsel %vm5929_vm3, %v12727_v63, 0.0  ;;  %v6460_v61 = vld [vmem:[%s14187_s4 + $0xc0] sm:$0xff] }
 0x504   :  { %v6129_v1 = vadd.f32 %v6128_v3, %v5957_v4  ;;  %v6207_v21 = vmul.f32 %v12727_v63, %v5957_v4  ;;  %v6461_v3 = vld [vmem:[%s14187_s4 + $0xc8] sm:$0xff]  ;;  %v6444_v35 = vld [vmem:[%s14187_s4 + $0x40] sm:$0xff] }
 0x505   :  { %v6314_v43 = vadd.f32 %v6313_v31, %v6206_v22  ;;  %v5566_v0 = vpop.f32.mrb[24].mxu0  ;;  %v6445_v22 = vld [vmem:[%s14187_s4 + $0x48] sm:$0xff]  ;;  %v6493_v4 = vand.u32 4294901760, %v6444_v35 }
 0x506   :  { %v6379_v30 = vadd.f32 %v6378_v6, %v6207_v21  ;;  %v12742_v8 = vadd.f32 %v5566_v0, %v11957_v32  ;;  %v5568_v9 = vpop.f32.mrb[25].mxu0  ;;  %v6541_v6 = vand.u32 4294901760, %v6460_v61  ;;  %v6544_v32 = vand.u32 4294901760, %v6461_v3 }
 0x507   :  { %v12754_v31 = vadd.f32 %v5568_v9, %v11959_v13  ;;  %v5570_v17 = vpop.f32.mrb[26].mxu0  ;;  %v6496_v46 = vand.u32 4294901760, %v6445_v22 }
 0x508   :  { %14514 = vst [vmem:[#allocation123_spill] sm:$0xff] %v12742_v8  ;;  %v6065_v21 = vadd.f32 %v12742_v8, %v6064_v49  ;;  %v6208_v0 = vmul.f32 %v12742_v8, %v12742_v8  ;;  %v12763_v50 = vadd.f32 %v5570_v17, %v11961_v62  ;;  %v5572_v55 = vpop.f32.mrb[27].mxu0  ;;  %v12771_v29 = vpack.c.bf16 %v6544_v32, %v6541_v6 }
 0x509   :  { %14515 = vst [vmem:[#allocation124_spill] sm:$0xff] %v12754_v31  ;;  %v6130_v13 = vadd.f32 %v12754_v31, %v6129_v1  ;;  %v6209_v9 = vmul.f32 %v12754_v31, %v12754_v31  ;;  %v12769_v24 = vadd.f32 %v5572_v55, %v11963_v51  ;;  %v12778_v17 = vsub.f32 %v6460_v61, %v6541_v6  ;;  %v14584_v31 = vld [vmem:[#allocation25_spill] sm:$0xff] }
 0x50a   :  { %14516 = vst [vmem:[#allocation125_spill] sm:$0xff] %v12763_v50  ;;  %14518 = vst [vmem:[#allocation127_spill] sm:$0xff] %v12771_v29  ;;  %v6315_v54 = vadd.f32 %v6314_v43, %v6208_v0  ;;  %v5960_v49 = vsel %vm5929_vm3, %v12763_v50, 0.0  ;;  %8764 = vmatprep.subr.bf16.mxu1 %v12771_v29  ;;  %v12786_v0 = vsub.f32 %v6461_v3, %v6544_v32 }
 0x50b   :  { %14517 = vst [vmem:[#allocation126_spill] sm:$0xff] %v12769_v24  ;;  %v6380_v63 = vadd.f32 %v6379_v30, %v6209_v9  ;;  %v6066_v1 = vadd.f32 %v6065_v21, %v5960_v49  ;;  %v6210_v10 = vmul.f32 %v12763_v50, %v5960_v49  ;;  %v5961_v51 = vsel %vm5929_vm3, %v12769_v24, 0.0 }
 0x50c   :  { %v6131_v55 = vadd.f32 %v6130_v13, %v5961_v51  ;;  %v6211_v43 = vmul.f32 %v12769_v24, %v5961_v51  ;;  %v12788_v36 = vpack.c.bf16 %v6496_v46, %v6493_v4  ;;  %v12790_v6 = vsub.f32 %v6444_v35, %v6493_v4 }
 0x50d   :  { %v6316_v62 = vadd.f32 %v6315_v54, %v6210_v10  ;;  %v5576_v61 = vpop.f32.mrb[28].mxu0  ;;  %v12792_v30 = vsub.f32 %v6445_v22, %v6496_v46 }
 0x50e   :  { %14519 = vst [vmem:[#allocation128_spill] sm:$0xff] %v12788_v36  ;;  %v6381_v9 = vadd.f32 %v6380_v63, %v6211_v43  ;;  %v12797_v49 = vadd.f32 %v5576_v61, %v11973_v33  ;;  %v5578_v13 = vpop.f32.mrb[29].mxu0  ;;  %8766 = vmatpush3.bf16.msra.mxu1 %v12788_v36 }
 0x50f   :  { %v12801_v3 = vadd.f32 %v5578_v13, %v11975_v2  ;;  %v5580_v32 = vpop.f32.mrb[30].mxu0 }
 0x510   :  { %14520 = vst [vmem:[#allocation129_spill] sm:$0xff] %v12797_v49  ;;  %v6067_v10 = vadd.f32 %v12797_v49, %v6066_v1  ;;  %v6212_v46 = vmul.f32 %v12797_v49, %v12797_v49  ;;  %v12807_v54 = vadd.f32 %v5580_v32, %v11977_v18  ;;  %v5582_v35 = vpop.f32.mrb[31].mxu0 }
 0x511   :  { %14521 = vst [vmem:[#allocation130_spill] sm:$0xff] %v12801_v3  ;;  %v6132_v63 = vadd.f32 %v12801_v3, %v6131_v55  ;;  %v6213_v33 = vmul.f32 %v12801_v3, %v12801_v3  ;;  %v12813_v22 = vadd.f32 %v5582_v35, %v11979_v14 }
 0x512   :  { %14522 = vst [vmem:[#allocation131_spill] sm:$0xff] %v12807_v54  ;;  %v6317_v2 = vadd.f32 %v6316_v62, %v6212_v46  ;;  %v5964_v4 = vsel %vm5929_vm3, %v12807_v54, 0.0 }
 0x513   :  { %14523 = vst [vmem:[#allocation132_spill] sm:$0xff] %v12813_v22  ;;  %v6382_v51 = vadd.f32 %v6381_v9, %v6213_v33  ;;  %v6068_v18 = vadd.f32 %v6067_v10, %v5964_v4  ;;  %v6214_v43 = vmul.f32 %v12807_v54, %v5964_v4  ;;  %v5965_v55 = vsel %vm5929_vm3, %v12813_v22, 0.0 }
 0x514   :  { %v6133_v61 = vadd.f32 %v6132_v63, %v5965_v55  ;;  %v6215_v14 = vmul.f32 %v12813_v22, %v5965_v55 }
 0x515   :  { %v6318_v13 = vadd.f32 %v6317_v2, %v6214_v43  ;;  %v5586_v32 = vpop.f32.mrb[32].mxu0 }
 0x516   :  { %v6383_v46 = vadd.f32 %v6382_v51, %v6215_v14  ;;  %v12828_v35 = vadd.f32 %v5586_v32, %v11989_v41  ;;  %v5588_v9 = vpop.f32.mrb[33].mxu0 }
 0x517   :  { %v12831_v10 = vadd.f32 %v5588_v9, %v11991_v47  ;;  %v5590_v33 = vpop.f32.mrb[34].mxu0 }
 0x518   :  { %14524 = vst [vmem:[#allocation133_spill] sm:$0xff] %v12828_v35  ;;  %v6069_v4 = vadd.f32 %v12828_v35, %v6068_v18  ;;  %v6216_v63 = vmul.f32 %v12828_v35, %v12828_v35  ;;  %v12837_v55 = vadd.f32 %v5590_v33, %v11993_v56  ;;  %v5592_v1 = vpop.f32.mrb[35].mxu0 }
 0x519   :  { %14525 = vst [vmem:[#allocation134_spill] sm:$0xff] %v12831_v10  ;;  %v6134_v2 = vadd.f32 %v12831_v10, %v6133_v61  ;;  %v6217_v41 = vmul.f32 %v12831_v10, %v12831_v10  ;;  %v12843_v51 = vadd.f32 %v5592_v1, %v11995_v42 }
 0x51a   :  { %14526 = vst [vmem:[#allocation135_spill] sm:$0xff] %v12837_v55  ;;  %v6319_v47 = vadd.f32 %v6318_v13, %v6216_v63  ;;  %v5968_v18 = vsel %vm5929_vm3, %v12837_v55, 0.0 }
 0x51b   :  { %14527 = vst [vmem:[#allocation136_spill] sm:$0xff] %v12843_v51  ;;  %v6384_v14 = vadd.f32 %v6383_v46, %v6217_v41  ;;  %v6070_v56 = vadd.f32 %v6069_v4, %v5968_v18  ;;  %v6218_v32 = vmul.f32 %v12837_v55, %v5968_v18  ;;  %v5969_v61 = vsel %vm5929_vm3, %v12843_v51, 0.0  ;;  %v6462_v4 = vld [vmem:[%s14187_s4 + $0xd0] sm:$0xff] }
 0x51c   :  { %v6135_v9 = vadd.f32 %v6134_v2, %v5969_v61  ;;  %v6219_v42 = vmul.f32 %v12843_v51, %v5969_v61  ;;  %v6463_v2 = vld [vmem:[%s14187_s4 + $0xd8] sm:$0xff]  ;;  %v6446_v41 = vld [vmem:[%s14187_s4 + $0x50] sm:$0xff] }
 0x51d   :  { %v6320_v13 = vadd.f32 %v6319_v47, %v6218_v32  ;;  %v5596_v33 = vpop.f32.mrb[36].mxu0  ;;  %v6447_v32 = vld [vmem:[%s14187_s4 + $0x58] sm:$0xff]  ;;  %v6499_v61 = vand.u32 4294901760, %v6446_v41 }
 0x51e   :  { %v6385_v63 = vadd.f32 %v6384_v14, %v6219_v42  ;;  %v12858_v62 = vadd.f32 %v5596_v33, %v12005_v58  ;;  %v5598_v46 = vpop.f32.mrb[37].mxu0  ;;  %v6547_v14 = vand.u32 4294901760, %v6462_v4  ;;  %v6550_v58 = vand.u32 4294901760, %v6463_v2 }
 0x51f   :  { %v12870_v47 = vadd.f32 %v5598_v46, %v12007_v23  ;;  %v5600_v18 = vpop.f32.mrb[38].mxu0  ;;  %v6502_v21 = vand.u32 4294901760, %v6447_v32 }
 0x520   :  { %14528 = vst [vmem:[#allocation137_spill] sm:$0xff] %v12858_v62  ;;  %v6071_v42 = vadd.f32 %v12858_v62, %v6070_v56  ;;  %v6220_v33 = vmul.f32 %v12858_v62, %v12858_v62  ;;  %v12879_v43 = vadd.f32 %v5600_v18, %v12009_v12  ;;  %v5602_v1 = vpop.f32.mrb[39].mxu0  ;;  %v12887_v55 = vpack.c.bf16 %v6550_v58, %v6547_v14  ;;  %v14540_v62 = vld [vmem:[#allocation4_spill] sm:$0xff] }
 0x521   :  { %14529 = vst [vmem:[#allocation138_spill] sm:$0xff] %v12870_v47  ;;  %v6136_v23 = vadd.f32 %v12870_v47, %v6135_v9  ;;  %v6221_v46 = vmul.f32 %v12870_v47, %v12870_v47  ;;  %v12885_v35 = vadd.f32 %v5602_v1, %v12011_v44  ;;  %v12894_v18 = vsub.f32 %v6462_v4, %v6547_v14 }
 0x522   :  { %14530 = vst [vmem:[#allocation139_spill] sm:$0xff] %v12879_v43  ;;  %14532 = vst [vmem:[#allocation141_spill] sm:$0xff] %v12887_v55  ;;  %v6321_v10 = vadd.f32 %v6320_v13, %v6220_v33  ;;  %v5972_v56 = vsel %vm5929_vm3, %v12879_v43, 0.0  ;;  %8768 = vmatprep.subr.bf16.mxu1 %v12887_v55  ;;  %v12902_v33 = vsub.f32 %v6463_v2, %v6550_v58 }
 0x523   :  { %14531 = vst [vmem:[#allocation140_spill] sm:$0xff] %v12885_v35  ;;  %v6386_v51 = vadd.f32 %v6385_v63, %v6221_v46  ;;  %v6072_v9 = vadd.f32 %v6071_v42, %v5972_v56  ;;  %v6222_v49 = vmul.f32 %v12879_v43, %v5972_v56  ;;  %v5973_v44 = vsel %vm5929_vm3, %v12885_v35, 0.0 }
 0x524   :  { %v6137_v1 = vadd.f32 %v6136_v23, %v5973_v44  ;;  %v6223_v13 = vmul.f32 %v12885_v35, %v5973_v44  ;;  %v12904_v54 = vpack.c.bf16 %v6502_v21, %v6499_v61  ;;  %v12906_v14 = vsub.f32 %v6446_v41, %v6499_v61  ;;  %v14538_v61 = vld [vmem:[#allocation3_spill] sm:$0xff] }
 0x525   :  { %v6322_v12 = vadd.f32 %v6321_v10, %v6222_v49  ;;  %v5606_v4 = vpop.f32.mrb[40].mxu0  ;;  %v12908_v63 = vsub.f32 %v6447_v32, %v6502_v21  ;;  %v14536_v10 = vld [vmem:[#allocation2_spill] sm:$0xff] }
 0x526   :  { %14533 = vst [vmem:[#allocation142_spill] sm:$0xff] %v12904_v54  ;;  %v6387_v46 = vadd.f32 %v6386_v51, %v6223_v13  ;;  %v12913_v56 = vadd.f32 %v5606_v4, %v12021_v15  ;;  %v5608_v23 = vpop.f32.mrb[41].mxu0  ;;  %8770 = vmatpush3.bf16.msra.mxu1 %v12904_v54 }
 0x527   :  { %v12917_v2 = vadd.f32 %v5608_v23, %v12023_v25  ;;  %v5610_v58 = vpop.f32.mrb[42].mxu0 }
 0x528   :  { %14534 = vst [vmem:[#allocation143_spill] sm:$0xff] %v12913_v56  ;;  %v6073_v49 = vadd.f32 %v12913_v56, %v6072_v9  ;;  %v6224_v21 = vmul.f32 %v12913_v56, %v12913_v56  ;;  %v12923_v41 = vadd.f32 %v5610_v58, %v14536_v10  ;;  %v5612_v32 = vpop.f32.mrb[43].mxu0 }
 0x529   :  { %14535 = vst [vmem:[#allocation144_spill] sm:$0xff] %v12917_v2  ;;  %v6138_v51 = vadd.f32 %v12917_v2, %v6137_v1  ;;  %v6225_v15 = vmul.f32 %v12917_v2, %v12917_v2  ;;  %v12929_v44 = vadd.f32 %v5612_v32, %v14538_v61  ;;  %v14548_v2 = vld [vmem:[#allocation8_spill] sm:$0xff] }
 0x52a   :  { %14537 = vst [vmem:[#allocation2_spill] sm:$0xff] %v12923_v41  ;;  %v6323_v25 = vadd.f32 %v6322_v12, %v6224_v21  ;;  %v5976_v9 = vsel %vm5929_vm3, %v12923_v41, 0.0 }
 0x52b   :  { %14539 = vst [vmem:[#allocation3_spill] sm:$0xff] %v12929_v44  ;;  %v6388_v4 = vadd.f32 %v6387_v46, %v6225_v15  ;;  %v6074_v23 = vadd.f32 %v6073_v49, %v5976_v9  ;;  %v6226_v58 = vmul.f32 %v12923_v41, %v5976_v9  ;;  %v5977_v1 = vsel %vm5929_vm3, %v12929_v44, 0.0  ;;  %v14542_v49 = vld [vmem:[#allocation5_spill] sm:$0xff] }
 0x52c   :  { %v6139_v10 = vadd.f32 %v6138_v51, %v5977_v1  ;;  %v6227_v32 = vmul.f32 %v12929_v44, %v5977_v1  ;;  %v14544_v1 = vld [vmem:[#allocation6_spill] sm:$0xff] }
 0x52d   :  { %v6324_v21 = vadd.f32 %v6323_v25, %v6226_v58  ;;  %v5616_v61 = vpop.f32.mrb[44].mxu0 }
 0x52e   :  { %v6389_v42 = vadd.f32 %v6388_v4, %v6227_v32  ;;  %v12944_v43 = vadd.f32 %v5616_v61, %v14540_v62  ;;  %v5618_v46 = vpop.f32.mrb[45].mxu0  ;;  %v14546_v4 = vld [vmem:[#allocation7_spill] sm:$0xff] }
 0x52f   :  { %v12947_v15 = vadd.f32 %v5618_v46, %v14542_v49  ;;  %v5620_v9 = vpop.f32.mrb[46].mxu0 }
 0x530   :  { %14541 = vst [vmem:[#allocation4_spill] sm:$0xff] %v12944_v43  ;;  %v6075_v13 = vadd.f32 %v12944_v43, %v6074_v23  ;;  %v6228_v51 = vmul.f32 %v12944_v43, %v12944_v43  ;;  %v12953_v56 = vadd.f32 %v5620_v9, %v14544_v1  ;;  %v5622_v12 = vpop.f32.mrb[47].mxu0 }
 0x531   :  { %14543 = vst [vmem:[#allocation5_spill] sm:$0xff] %v12947_v15  ;;  %v6140_v25 = vadd.f32 %v12947_v15, %v6139_v10  ;;  %v6229_v62 = vmul.f32 %v12947_v15, %v12947_v15  ;;  %v12959_v58 = vadd.f32 %v5622_v12, %v14546_v4 }
 0x532   :  { %14545 = vst [vmem:[#allocation6_spill] sm:$0xff] %v12953_v56  ;;  %v6325_v32 = vadd.f32 %v6324_v21, %v6228_v51  ;;  %v5980_v23 = vsel %vm5929_vm3, %v12953_v56, 0.0  ;;  %v14552_v21 = vld [vmem:[#allocation10_spill] sm:$0xff] }
 0x533   :  { %14547 = vst [vmem:[#allocation7_spill] sm:$0xff] %v12959_v58  ;;  %v6390_v46 = vadd.f32 %v6389_v42, %v6229_v62  ;;  %v6076_v49 = vadd.f32 %v6075_v13, %v5980_v23  ;;  %v6230_v9 = vmul.f32 %v12953_v56, %v5980_v23  ;;  %v5981_v10 = vsel %vm5929_vm3, %v12959_v58, 0.0  ;;  %v6464_v13 = vld [vmem:[%s14187_s4 + $0xe0] sm:$0xff]  ;;  %v14550_v23 = vld [vmem:[#allocation9_spill] sm:$0xff] }
 0x534   :  { %v6141_v1 = vadd.f32 %v6140_v25, %v5981_v10  ;;  %v6231_v12 = vmul.f32 %v12959_v58, %v5981_v10  ;;  %v6465_v25 = vld [vmem:[%s14187_s4 + $0xe8] sm:$0xff]  ;;  %v6448_v62 = vld [vmem:[%s14187_s4 + $0x60] sm:$0xff] }
 0x535   :  { %v6326_v51 = vadd.f32 %v6325_v32, %v6230_v9  ;;  %v5626_v4 = vpop.f32.mrb[48].mxu0  ;;  %v6553_v9 = vand.u32 4294901760, %v6464_v13  ;;  %v6449_v10 = vld [vmem:[%s14187_s4 + $0x68] sm:$0xff] }
 0x536   :  { %v6391_v41 = vadd.f32 %v6390_v46, %v6231_v12  ;;  %v12974_v44 = vadd.f32 %v5626_v4, %v14548_v2  ;;  %v5628_v42 = vpop.f32.mrb[49].mxu0  ;;  %v6556_v2 = vand.u32 4294901760, %v6465_v25  ;;  %v6505_v12 = vand.u32 4294901760, %v6448_v62  ;;  %v14554_v58 = vld [vmem:[#allocation11_spill] sm:$0xff] }
 0x537   :  { %v12986_v32 = vadd.f32 %v5628_v42, %v14550_v23  ;;  %v5630_v46 = vpop.f32.mrb[50].mxu0  ;;  %v6508_v15 = vand.u32 4294901760, %v6449_v10 }
 0x538   :  { %14549 = vst [vmem:[#allocation8_spill] sm:$0xff] %v12974_v44  ;;  %v6077_v4 = vadd.f32 %v12974_v44, %v6076_v49  ;;  %v6232_v61 = vmul.f32 %v12974_v44, %v12974_v44  ;;  %v12995_v43 = vadd.f32 %v5630_v46, %v14552_v21  ;;  %v5632_v56 = vpop.f32.mrb[51].mxu0  ;;  %v13003_v35 = vpack.c.bf16 %v6556_v2, %v6553_v9 }
 0x539   :  { %14551 = vst [vmem:[#allocation9_spill] sm:$0xff] %v12986_v32  ;;  %v6142_v42 = vadd.f32 %v12986_v32, %v6141_v1  ;;  %v6233_v23 = vmul.f32 %v12986_v32, %v12986_v32  ;;  %v13001_v47 = vadd.f32 %v5632_v56, %v14554_v58  ;;  %v13010_v46 = vsub.f32 %v6464_v13, %v6553_v9  ;;  %v14566_v32 = vld [vmem:[#allocation16_spill] sm:$0xff] }
 0x53a   :  { %14553 = vst [vmem:[#allocation10_spill] sm:$0xff] %v12995_v43  ;;  %14556 = vst [vmem:[#allocation145_spill] sm:$0xff] %v13003_v35  ;;  %v6327_v3 = vadd.f32 %v6326_v51, %v6232_v61  ;;  %v5984_v49 = vsel %vm5929_vm3, %v12995_v43, 0.0  ;;  %8772 = vmatprep.subr.bf16.mxu1 %v13003_v35  ;;  %v13018_v51 = vsub.f32 %v6465_v25, %v6556_v2  ;;  %v14560_v25 = vld [vmem:[#allocation13_spill] sm:$0xff] }
 0x53b   :  { %14555 = vst [vmem:[#allocation11_spill] sm:$0xff] %v13001_v47  ;;  %v6392_v22 = vadd.f32 %v6391_v41, %v6233_v23  ;;  %v6078_v1 = vadd.f32 %v6077_v4, %v5984_v49  ;;  %v6234_v8 = vmul.f32 %v12995_v43, %v5984_v49  ;;  %v5985_v56 = vsel %vm5929_vm3, %v13001_v47, 0.0  ;;  %v14558_v49 = vld [vmem:[#allocation12_spill] sm:$0xff] }
 0x53c   :  { %v6143_v58 = vadd.f32 %v6142_v42, %v5985_v56  ;;  %v6235_v61 = vmul.f32 %v13001_v47, %v5985_v56  ;;  %v13020_v50 = vpack.c.bf16 %v6508_v15, %v6505_v12  ;;  %v13022_v9 = vsub.f32 %v6448_v62, %v6505_v12 }
 0x53d   :  { %v6328_v21 = vadd.f32 %v6327_v3, %v6234_v8  ;;  %v5636_v13 = vpop.f32.mrb[52].mxu0  ;;  %v13024_v41 = vsub.f32 %v6449_v10, %v6508_v15  ;;  %v14562_v15 = vld [vmem:[#allocation14_spill] sm:$0xff] }
 0x53e   :  { %14557 = vst [vmem:[#allocation146_spill] sm:$0xff] %v13020_v50  ;;  %v6393_v23 = vadd.f32 %v6392_v22, %v6235_v61  ;;  %v13029_v44 = vadd.f32 %v5636_v13, %v14558_v49  ;;  %v5638_v42 = vpop.f32.mrb[53].mxu0  ;;  %8774 = vmatpush3.bf16.msra.mxu1 %v13020_v50  ;;  %v14564_v61 = vld [vmem:[#allocation15_spill] sm:$0xff] }
 0x53f   :  { %v13033_v2 = vadd.f32 %v5638_v42, %v14560_v25  ;;  %v5640_v56 = vpop.f32.mrb[54].mxu0 }
 0x540   :  { %14559 = vst [vmem:[#allocation12_spill] sm:$0xff] %v13029_v44  ;;  %v6079_v8 = vadd.f32 %v13029_v44, %v6078_v1  ;;  %v6236_v3 = vmul.f32 %v13029_v44, %v13029_v44  ;;  %v13039_v62 = vadd.f32 %v5640_v56, %v14562_v15  ;;  %v5642_v10 = vpop.f32.mrb[55].mxu0 }
 0x541   :  { %14561 = vst [vmem:[#allocation13_spill] sm:$0xff] %v13033_v2  ;;  %v6144_v22 = vadd.f32 %v13033_v2, %v6143_v58  ;;  %v6237_v12 = vmul.f32 %v13033_v2, %v13033_v2  ;;  %v13045_v13 = vadd.f32 %v5642_v10, %v14564_v61  ;;  %v14574_v2 = vld [vmem:[#allocation20_spill] sm:$0xff] }
 0x542   :  { %14563 = vst [vmem:[#allocation14_spill] sm:$0xff] %v13039_v62  ;;  %v6329_v49 = vadd.f32 %v6328_v21, %v6236_v3  ;;  %v5988_v1 = vsel %vm5929_vm3, %v13039_v62, 0.0 }
 0x543   :  { %14565 = vst [vmem:[#allocation15_spill] sm:$0xff] %v13045_v13  ;;  %v6394_v25 = vadd.f32 %v6393_v23, %v6237_v12  ;;  %v6080_v56 = vadd.f32 %v6079_v8, %v5988_v1  ;;  %v6238_v15 = vmul.f32 %v13039_v62, %v5988_v1  ;;  %v5989_v58 = vsel %vm5929_vm3, %v13045_v13, 0.0  ;;  %v14568_v8 = vld [vmem:[#allocation17_spill] sm:$0xff] }
 0x544   :  { %v6145_v4 = vadd.f32 %v6144_v22, %v5989_v58  ;;  %v6239_v10 = vmul.f32 %v13045_v13, %v5989_v58  ;;  %v14570_v58 = vld [vmem:[#allocation18_spill] sm:$0xff] }
 0x545   :  { %v6330_v3 = vadd.f32 %v6329_v49, %v6238_v15  ;;  %v5646_v61 = vpop.f32.mrb[56].mxu0 }
 0x546   :  { %v6395_v43 = vadd.f32 %v6394_v25, %v6239_v10  ;;  %v13060_v47 = vadd.f32 %v5646_v61, %v14566_v32  ;;  %v5648_v23 = vpop.f32.mrb[57].mxu0  ;;  %v14572_v25 = vld [vmem:[#allocation19_spill] sm:$0xff] }
 0x547   :  { %v13063_v12 = vadd.f32 %v5648_v23, %v14568_v8  ;;  %v5650_v1 = vpop.f32.mrb[58].mxu0 }
 0x548   :  { %14567 = vst [vmem:[#allocation16_spill] sm:$0xff] %v13060_v47  ;;  %v6081_v42 = vadd.f32 %v13060_v47, %v6080_v56  ;;  %v6240_v22 = vmul.f32 %v13060_v47, %v13060_v47  ;;  %v13069_v44 = vadd.f32 %v5650_v1, %v14570_v58  ;;  %v5652_v21 = vpop.f32.mrb[59].mxu0 }
 0x549   :  { %14569 = vst [vmem:[#allocation17_spill] sm:$0xff] %v13063_v12  ;;  %v6146_v49 = vadd.f32 %v13063_v12, %v6145_v4  ;;  %v6241_v32 = vmul.f32 %v13063_v12, %v13063_v12  ;;  %v13075_v15 = vadd.f32 %v5652_v21, %v14572_v25 }
 0x54a   :  { %14571 = vst [vmem:[#allocation18_spill] sm:$0xff] %v13069_v44  ;;  %v6331_v10 = vadd.f32 %v6330_v3, %v6240_v22  ;;  %v5992_v56 = vsel %vm5929_vm3, %v13069_v44, 0.0 }
 0x54b   :  { %14573 = vst [vmem:[#allocation19_spill] sm:$0xff] %v13075_v15  ;;  %v6396_v23 = vadd.f32 %v6395_v43, %v6241_v32  ;;  %v6082_v8 = vadd.f32 %v6081_v42, %v5992_v56  ;;  %v6242_v1 = vmul.f32 %v13069_v44, %v5992_v56  ;;  %v5993_v4 = vsel %vm5929_vm3, %v13075_v15, 0.0  ;;  %v14576_v42 = vld [vmem:[#allocation21_spill] sm:$0xff] }
 0x54c   :  { %v6147_v58 = vadd.f32 %v6146_v49, %v5993_v4  ;;  %v6243_v21 = vmul.f32 %v13075_v15, %v5993_v4  ;;  %v14578_v4 = vld [vmem:[#allocation22_spill] sm:$0xff] }
 0x54d   :  { %v6332_v22 = vadd.f32 %v6331_v10, %v6242_v1  ;;  %v5656_v25 = vpop.f32.mrb[60].mxu0 }
 0x54e   :  { %v6397_v62 = vadd.f32 %v6396_v23, %v6243_v21  ;;  %v13090_v13 = vadd.f32 %v5656_v25, %v14574_v2  ;;  %v5658_v43 = vpop.f32.mrb[61].mxu0  ;;  %v14580_v23 = vld [vmem:[#allocation23_spill] sm:$0xff] }
 0x54f   :  { %v13093_v32 = vadd.f32 %v5658_v43, %v14576_v42  ;;  %v5660_v56 = vpop.f32.mrb[62].mxu0 }
 0x550   :  { %14575 = vst [vmem:[#allocation20_spill] sm:$0xff] %v13090_v13  ;;  %v6083_v61 = vadd.f32 %v13090_v13, %v6082_v8  ;;  %v6244_v49 = vmul.f32 %v13090_v13, %v13090_v13  ;;  %v13099_v47 = vadd.f32 %v5660_v56, %v14578_v4  ;;  %v5662_v3 = vpop.f32.mrb[63].mxu0 }
 0x551   :  { %14577 = vst [vmem:[#allocation21_spill] sm:$0xff] %v13093_v32  ;;  %v6148_v10 = vadd.f32 %v13093_v32, %v6147_v58  ;;  %v6245_v2 = vmul.f32 %v13093_v32, %v13093_v32  ;;  %v13105_v1 = vadd.f32 %v5662_v3, %v14580_v23 }
 0x552   :  { %14579 = vst [vmem:[#allocation22_spill] sm:$0xff] %v13099_v47  ;;  %v6333_v21 = vadd.f32 %v6332_v22, %v6244_v49  ;;  %v5996_v8 = vsel %vm5929_vm3, %v13099_v47, 0.0  ;;  %v6466_v22 = vld [vmem:[%s14187_s4 + $0xf0] sm:$0xff]  ;;  %v6467_v49 = vld [vmem:[%s14187_s4 + $0xf8] sm:$0xff] }
 0x553   :  { %14581 = vst [vmem:[#allocation23_spill] sm:$0xff] %v13105_v1  ;;  %v6398_v43 = vadd.f32 %v6397_v62, %v6245_v2  ;;  %v6084_v42 = vadd.f32 %v6083_v61, %v5996_v8  ;;  %v6246_v56 = vmul.f32 %v13099_v47, %v5996_v8  ;;  %v5997_v58 = vsel %vm5929_vm3, %v13105_v1, 0.0  ;;  %v6450_v62 = vld [vmem:[%s14187_s4 + $0x70] sm:$0xff] }
 0x554   :  { %v6149_v4 = vadd.f32 %v6148_v10, %v5997_v58  ;;  %v6247_v3 = vmul.f32 %v13105_v1, %v5997_v58  ;;  %v6559_v10 = vand.u32 4294901760, %v6466_v22  ;;  %v6562_v8 = vand.u32 4294901760, %v6467_v49  ;;  %v6451_v58 = vld [vmem:[%s14187_s4 + $0x78] sm:$0xff]  ;;  %v14582_v47 = vld [vmem:[#allocation24_spill] sm:$0xff] }
 0x555   :  { %v6334_v2 = vadd.f32 %v6333_v21, %v6246_v56  ;;  %v5666_v23 = vpop.f32.mrb[64].mxu0  ;;  %v6511_v25 = vand.u32 4294901760, %v6450_v62  ;;  %v6514_v15 = vand.u32 4294901760, %v6451_v58 }
 0x556   :  { %v6399_v13 = vadd.f32 %v6398_v43, %v6247_v3  ;;  %v13132_v44 = vadd.f32 %v5666_v23, %v14582_v47  ;;  %v5668_v12 = vpop.f32.mrb[65].mxu0  ;;  %v13137_v61 = vpack.c.bf16 %v6562_v8, %v6559_v10  ;;  %v13139_v21 = vsub.f32 %v6466_v22, %v6559_v10  ;;  %v14587_v3 = vld [vmem:[#allocation26_spill] sm:$0xff]  ;;  %v14590_v22 = vld [vmem:[#allocation27_spill] sm:$0xff] }
 0x557   :  { %v13135_v24 = vadd.f32 %v5668_v12, %v14584_v31  ;;  %v5670_v20 = vpop.f32.mrb[66].mxu0  ;;  %v13141_v56 = vsub.f32 %v6467_v49, %v6562_v8  ;;  %v13149_v1 = vpack.c.bf16 %v6514_v15, %v6511_v25 }
 0x558   :  { %14583 = vst [vmem:[#allocation24_spill] sm:$0xff] %v13132_v44  ;;  %14586 = vst [vmem:[#allocation147_spill] sm:$0xff] %v13137_v61  ;;  %v6085_v32 = vadd.f32 %v13132_v44, %v6084_v42  ;;  %v6248_v43 = vmul.f32 %v13132_v44, %v13132_v44  ;;  %v13147_v47 = vadd.f32 %v5670_v20, %v14587_v3  ;;  %v5672_v23 = vpop.f32.mrb[67].mxu0  ;;  %8776 = vmatprep.subr.bf16.mxu1 %v13137_v61  ;;  %v14609_v61 = vld [vmem:[#allocation88_spill] sm:$0xff] }
 0x559   :  { %14585 = vst [vmem:[#allocation25_spill] sm:$0xff] %v13135_v24  ;;  %14589 = vst [vmem:[#allocation148_spill] sm:$0xff] %v13149_v1  ;;  %v6150_v31 = vadd.f32 %v13135_v24, %v6149_v4  ;;  %v6249_v12 = vmul.f32 %v13135_v24, %v13135_v24  ;;  %v13155_v10 = vadd.f32 %v5672_v23, %v14590_v22  ;;  %8778 = vmatpush3.bf16.msra.mxu1 %v13149_v1 }
 0x55a   :  { %14588 = vst [vmem:[#allocation26_spill] sm:$0xff] %v13147_v47  ;;  %v13158_v42 = vsub.f32 %v6450_v62, %v6511_v25  ;;  %v6335_v49 = vadd.f32 %v6334_v2, %v6248_v43  ;;  %v6000_v20 = vsel %vm5929_vm3, %v13147_v47, 0.0  ;;  %v13166_v4 = vsub.f32 %v6451_v58, %v6514_v15  ;;  %v14594_v43 = vld [vmem:[#allocation81_spill] sm:$0xff] }
 0x55b   :  { %14591 = vst [vmem:[#allocation27_spill] sm:$0xff] %v13155_v10  ;;  %v6400_v3 = vadd.f32 %v6399_v13, %v6249_v12  ;;  %v6086_v24 = vadd.f32 %v6085_v32, %v6000_v20  ;;  %v6250_v23 = vmul.f32 %v13147_v47, %v6000_v20  ;;  %v6001_v25 = vsel %vm5929_vm3, %v13155_v10, 0.0  ;;  %v14597_v58 = vld [vmem:[#allocation85_spill] sm:$0xff]  ;;  %v14598_v32 = vld [vmem:[#allocation87_spill] sm:$0xff]  ;;  %v14599_v47 = vld [vmem:[#allocation28_spill] sm:$0xff] }
 0x55c   :  { %14592 = vst [vmem:[#allocation149_spill] sm:$0xff] %v13158_v42  ;;  %14593 = vst [vmem:[#allocation150_spill] sm:$0xff] %v13166_v4  ;;  %v6151_v62 = vadd.f32 %v6150_v31, %v6001_v25  ;;  %v6251_v2 = vmul.f32 %v13155_v10, %v6001_v25  ;;  %v14275_v22 = vand.u32 4294901760, %v14594_v43  ;;  %v14282_v12 = vand.u32 4294901760, %v14598_v32 }
 0x55d   :  { %v6336_v8 = vadd.f32 %v6335_v49, %v6250_v23  ;;  %v5676_v44 = vpop.f32.mrb[68].mxu0  ;;  %v6703_v49 = vsub.f32 %v14595_v52, %v14276_v16  ;;  %v14601_v23 = vld [vmem:[#allocation29_spill] sm:$0xff]  ;;  %v14603_v13 = vand.u32 4294901760, %v14596_v40  ;;  %v14295_v50 = vand.u32 4294901760, %v14609_v61 }
 0x55e   :  { %v6401_v20 = vadd.f32 %v6400_v3, %v6251_v2  ;;  %v13179_v38 = vadd.f32 %v5676_v44, %v14599_v47  ;;  %v5678_v26 = vpop.f32.mrb[69].mxu0  ;;  %v6696_v31 = vsub.f32 %v14594_v43, %v14275_v22  ;;  %v14604_v44 = vand.u32 4294901760, %v14597_v58 }
 0x55f   :  { %v13188_v25 = vadd.f32 %v5678_v26, %v14601_v23  ;;  %v5680_v15 = vpop.f32.mrb[70].mxu0  ;;  %v6584_v3 = vsub.f32 %v14596_v40, %v14603_v13  ;;  %v6710_v2 = vsub.f32 %v14598_v32, %v14282_v12  ;;  %v14605_v26 = vld [vmem:[#allocation30_spill] sm:$0xff]  ;;  %v6704_v45 = vand.u32 4294901760, %v6703_v49 }
 0x560   :  { %14600 = vst [vmem:[#allocation83_spill] sm:$0xff] %v13179_v38  ;;  %v6591_v47 = vsub.f32 %v14597_v58, %v14604_v44  ;;  %v6087_v22 = vadd.f32 %v13179_v38, %v6086_v24  ;;  %v6252_v16 = vmul.f32 %v13179_v38, %v13179_v38  ;;  %v13203_v23 = vadd.f32 %v5680_v15, %v14605_v26  ;;  %v5682_v10 = vpop.f32.mrb[71].mxu0  ;;  %v14607_v44 = vld [vmem:[#allocation31_spill] sm:$0xff]  ;;  %v14610_v15 = vld [vmem:[#allocation89_spill] sm:$0xff] }
 0x561   :  { %14602 = vst [vmem:[#allocation85_spill] sm:$0xff] %v13188_v25  ;;  %v6697_v48 = vand.u32 4294901760, %v6696_v31  ;;  %v6152_v13 = vadd.f32 %v13188_v25, %v6151_v62  ;;  %v6253_v5 = vmul.f32 %v13188_v25, %v13188_v25  ;;  %v13209_v28 = vadd.f32 %v5682_v10, %v14607_v44 }
 0x562   :  { %14606 = vst [vmem:[#allocation87_spill] sm:$0xff] %v13203_v23  ;;  %v6337_v12 = vadd.f32 %v6336_v8, %v6252_v16  ;;  %v6004_v24 = vsel %vm5929_vm3, %v13203_v23, 0.0  ;;  %v6585_v26 = vand.u32 4294901760, %v6584_v3  ;;  %v6592_v8 = vand.u32 4294901760, %v6591_v47 }
 0x563   :  { %14608 = vst [vmem:[#allocation28_spill] sm:$0xff] %v13209_v28  ;;  %v6402_v57 = vadd.f32 %v6401_v20, %v6253_v5  ;;  %v6088_v31 = vadd.f32 %v6087_v22, %v6004_v24  ;;  %v6254_v62 = vmul.f32 %v13203_v23, %v6004_v24  ;;  %v6005_v25 = vsel %vm5929_vm3, %v13209_v28, 0.0  ;;  %v14611_v22 = vld [vmem:[#allocation32_spill] sm:$0xff] }
 0x564   :  { %v6153_v10 = vadd.f32 %v6152_v13, %v6005_v25  ;;  %v6255_v49 = vmul.f32 %v13209_v28, %v6005_v25  ;;  %v8779_v16 = vpack.c.bf16 %v6704_v45, %v6697_v48  ;;  %v6711_v1 = vand.u32 4294901760, %v6710_v2  ;;  %v14614_v13 = vld [vmem:[#allocation91_spill] sm:$0xff]  ;;  %v14615_v25 = vld [vmem:[#allocation33_spill] sm:$0xff] }
 0x565   :  { %v6338_v44 = vadd.f32 %v6337_v12, %v6254_v62  ;;  %v5686_v11 = vpop.f32.mrb[72].mxu0  ;;  %v14294_v3 = vand.u32 4294901760, %v14610_v15  ;;  %v13226_v38 = vpack.c.bf16 %v6592_v8, %v6585_v26  ;;  %v14297_v23 = vand.u32 4294901760, %v14614_v13  ;;  %v14618_v62 = vld [vmem:[#allocation34_spill] sm:$0xff] }
 0x566   :  { %v6403_v5 = vadd.f32 %v6402_v57, %v6255_v49  ;;  %v13224_v20 = vadd.f32 %v5686_v11, %v14611_v22  ;;  %v5688_v24 = vpop.f32.mrb[73].mxu0  ;;  %8780 = vmatprep.subr.bf16.mxu1 %v8779_v16  ;;  %v6717_v12 = vsub.f32 %v14609_v61, %v14295_v50  ;;  %v14617_v11 = vld [vmem:[#allocation97_spill] sm:$0xff] }
 0x567   :  { %14613 = vst [vmem:[#allocation30_spill] sm:$0xff] %v13226_v38  ;;  %v13230_v48 = vadd.f32 %v5688_v24, %v14615_v25  ;;  %v5690_v45 = vpop.f32.mrb[74].mxu0  ;;  %v6598_v57 = vsub.f32 %v14610_v15, %v14294_v3  ;;  %v6605_v8 = vsub.f32 %v14614_v13, %v14297_v23  ;;  %v14620_v25 = vld [vmem:[#allocation35_spill] sm:$0xff]  ;;  %v14623_v54 = vand.u32 4294901760, %v14617_v11 }
 0x568   :  { %14612 = vst [vmem:[#allocation29_spill] sm:$0xff] %v13224_v20  ;;  %v6089_v2 = vadd.f32 %v13224_v20, %v6088_v31  ;;  %v6256_v26 = vmul.f32 %v13224_v20, %v13224_v20  ;;  %v13243_v49 = vadd.f32 %v5690_v45, %v14618_v62  ;;  %v5692_v16 = vpop.f32.mrb[75].mxu0  ;;  %v6718_v31 = vand.u32 4294901760, %v6717_v12  ;;  %v14626_v20 = vld [vmem:[#allocation36_spill] sm:$0xff] }
 0x569   :  { %14616 = vst [vmem:[#allocation31_spill] sm:$0xff] %v13230_v48  ;;  %v6154_v22 = vadd.f32 %v13230_v48, %v6153_v10  ;;  %v6257_v24 = vmul.f32 %v13230_v48, %v13230_v48  ;;  %v13252_v3 = vadd.f32 %v5692_v16, %v14620_v25  ;;  %v6599_v47 = vand.u32 4294901760, %v6598_v57 }
 0x56a   :  { %14619 = vst [vmem:[#allocation88_spill] sm:$0xff] %v13243_v49  ;;  %v6339_v50 = vadd.f32 %v6338_v44, %v6256_v26  ;;  %v6008_v45 = vsel %vm5929_vm3, %v13243_v49, 0.0  ;;  %v13264_v44 = vpack.c.bf16 %v6718_v31, %v6711_v1  ;;  %v6606_v26 = vand.u32 4294901760, %v6605_v8 }
 0x56b   :  { %14621 = vst [vmem:[#allocation89_spill] sm:$0xff] %v13252_v3  ;;  %v6404_v28 = vadd.f32 %v6403_v5, %v6257_v24  ;;  %v6090_v23 = vadd.f32 %v6089_v2, %v6008_v45  ;;  %v6258_v10 = vmul.f32 %v13243_v49, %v6008_v45  ;;  %v6009_v48 = vsel %vm5929_vm3, %v13252_v3, 0.0  ;;  %v14624_v5 = vld [vmem:[#allocation98_spill] sm:$0xff]  ;;  %v14625_v24 = vld [vmem:[#allocation100_spill] sm:$0xff] }
 0x56c   :  { %v6155_v16 = vadd.f32 %v6154_v22, %v6009_v48  ;;  %v6259_v12 = vmul.f32 %v13252_v3, %v6009_v48  ;;  %14622 = vst [vmem:[#allocation32_spill] sm:$0xff] %v13264_v44  ;;  %v6724_v57 = vsub.f32 %v14617_v11, %v14623_v54  ;;  %v14308_v2 = vand.u32 4294901760, %v14624_v5  ;;  %v14629_v48 = vld [vmem:[#allocation37_spill] sm:$0xff] }
 0x56d   :  { %v6340_v25 = vadd.f32 %v6339_v50, %v6258_v10  ;;  %v5696_v35 = vpop.f32.mrb[76].mxu0  ;;  %v14307_v45 = vand.u32 4294901760, %v14625_v24  ;;  %v13274_v55 = vpack.c.bf16 %v6606_v26, %v6599_v47  ;;  %v14312_v1 = vand.u32 4294901760, %v12552_v60  ;;  %v14631_v47 = vld [vmem:[#allocation38_spill] sm:$0xff] }
 0x56e   :  { %v6405_v62 = vadd.f32 %v6404_v28, %v6259_v12  ;;  %v13272_v49 = vadd.f32 %v5696_v35, %v14626_v20  ;;  %v5698_v22 = vpop.f32.mrb[77].mxu0  ;;  %v6725_v31 = vand.u32 4294901760, %v6724_v57  ;;  %v6731_v54 = vsub.f32 %v14624_v5, %v14308_v2 }
 0x56f   :  { %14628 = vst [vmem:[#allocation33_spill] sm:$0xff] %v13274_v55  ;;  %v13278_v50 = vadd.f32 %v5698_v22, %v14629_v48  ;;  %v5700_v8 = vpop.f32.mrb[78].mxu0  ;;  %v6612_v28 = vsub.f32 %v14625_v24, %v14307_v45  ;;  %v6619_v26 = vsub.f32 %v12552_v60, %v14312_v1  ;;  %v14633_v48 = vld [vmem:[#allocation39_spill] sm:$0xff]  ;;  %v14663_v44 = vand.u32 4294901760, %v12908_v63 }
 0x570   :  { %14627 = vst [vmem:[#allocation91_spill] sm:$0xff] %v13272_v49  ;;  %v6091_v35 = vadd.f32 %v13272_v49, %v6090_v23  ;;  %v6260_v20 = vmul.f32 %v13272_v49, %v13272_v49  ;;  %v13290_v10 = vadd.f32 %v5700_v8, %v14631_v47  ;;  %v5702_v12 = vpop.f32.mrb[79].mxu0  ;;  %v6732_v23 = vand.u32 4294901760, %v6731_v54 }
 0x571   :  { %14630 = vst [vmem:[#allocation97_spill] sm:$0xff] %v13278_v50  ;;  %v6156_v57 = vadd.f32 %v13278_v50, %v6155_v16  ;;  %v6261_v22 = vmul.f32 %v13278_v50, %v13278_v50  ;;  %v13299_v45 = vadd.f32 %v5702_v12, %v14633_v48  ;;  %v6613_v3 = vand.u32 4294901760, %v6612_v28 }
 0x572   :  { %14632 = vst [vmem:[#allocation34_spill] sm:$0xff] %v13290_v10  ;;  %v6341_v2 = vadd.f32 %v6340_v25, %v6260_v20  ;;  %v6012_v8 = vsel %vm5929_vm3, %v13290_v10, 0.0  ;;  %v13311_v25 = vpack.c.bf16 %v6732_v23, %v6725_v31  ;;  %v6620_v20 = vand.u32 4294901760, %v6619_v26  ;;  %v14638_v31 = vld [vmem:[#allocation41_spill] sm:$0xff] }
 0x573   :  { %v6406_v36 = vadd.f32 %v6405_v62, %v6261_v22  ;;  %v6092_v1 = vadd.f32 %v6091_v35, %v6012_v8  ;;  %v6262_v16 = vmul.f32 %v13290_v10, %v6012_v8  ;;  %v6013_v29 = vsel %vm5929_vm3, %v13299_v45, 0.0  ;;  %v14635_v22 = vld [vmem:[#allocation40_spill] sm:$0xff] }
 0x574   :  { %v6157_v12 = vadd.f32 %v6156_v57, %v6013_v29  ;;  %v6263_v54 = vmul.f32 %v13299_v45, %v6013_v29  ;;  %14634 = vst [vmem:[#allocation35_spill] sm:$0xff] %v13311_v25  ;;  %v14320_v28 = vand.u32 4294901760, %v12670_v19  ;;  %v14321_v62 = vand.u32 4294901760, %v12674_v59 }
 0x575   :  { %v6342_v48 = vadd.f32 %v6341_v2, %v6262_v16  ;;  %v5706_v34 = vpop.f32.mrb[80].mxu0  ;;  %v13319_v49 = vpack.c.bf16 %v6620_v20, %v6613_v3  ;;  %v14326_v29 = vand.u32 4294901760, %v12676_v53  ;;  %v6738_v26 = vsub.f32 %v12662_v39, %v14322_v27 }
 0x576   :  { %v6407_v35 = vadd.f32 %v6406_v36, %v6263_v54  ;;  %v13317_v8 = vadd.f32 %v5706_v34, %v14635_v22  ;;  %v5708_v47 = vpop.f32.mrb[81].mxu0  ;;  %v6745_v36 = vsub.f32 %v12670_v19, %v14320_v28  ;;  %v6626_v34 = vsub.f32 %v12674_v59, %v14321_v62  ;;  %v14641_v28 = vld [vmem:[#allocation43_spill] sm:$0xff] }
 0x577   :  { %14637 = vst [vmem:[#allocation100_spill] sm:$0xff] %v13319_v49  ;;  %v13323_v57 = vadd.f32 %v5708_v47, %v14638_v31  ;;  %v5710_v2 = vpop.f32.mrb[82].mxu0  ;;  %v14639_v47 = vld [vmem:[#allocation42_spill] sm:$0xff]  ;;  %v6633_v20 = vsub.f32 %v12676_v53, %v14326_v29  ;;  %v14653_v25 = vand.u32 4294901760, %v12792_v30 }
 0x578   :  { %14636 = vst [vmem:[#allocation98_spill] sm:$0xff] %v13317_v8  ;;  %v6093_v3 = vadd.f32 %v13317_v8, %v6092_v1  ;;  %v6264_v23 = vmul.f32 %v13317_v8, %v13317_v8  ;;  %v13338_v16 = vadd.f32 %v5710_v2, %v14639_v47  ;;  %v5712_v54 = vpop.f32.mrb[83].mxu0  ;;  %v6739_v1 = vand.u32 4294901760, %v6738_v26 }
 0x579   :  { %v6158_v22 = vadd.f32 %v13323_v57, %v6157_v12  ;;  %v6265_v31 = vmul.f32 %v13323_v57, %v13323_v57  ;;  %v13347_v62 = vadd.f32 %v5712_v54, %v14641_v28  ;;  %v6746_v10 = vand.u32 4294901760, %v6745_v36 }
 0x57a   :  { %14640 = vst [vmem:[#allocation36_spill] sm:$0xff] %v13338_v16  ;;  %v6343_v27 = vadd.f32 %v6342_v48, %v6264_v23  ;;  %v6016_v2 = vsel %vm5929_vm3, %v13338_v16, 0.0  ;;  %v6627_v23 = vand.u32 4294901760, %v6626_v34  ;;  %v6634_v49 = vand.u32 4294901760, %v6633_v20 }
 0x57b   :  { %v6408_v37 = vadd.f32 %v6407_v35, %v6265_v31  ;;  %v6094_v29 = vadd.f32 %v6093_v3, %v6016_v2  ;;  %v6266_v12 = vmul.f32 %v13338_v16, %v6016_v2  ;;  %v6017_v52 = vsel %vm5929_vm3, %v13347_v62, 0.0  ;;  %v14643_v3 = vld [vmem:[#allocation44_spill] sm:$0xff] }
 0x57c   :  { %v6159_v28 = vadd.f32 %v6158_v22, %v6017_v52  ;;  %v6267_v26 = vmul.f32 %v13347_v62, %v6017_v52  ;;  %v13359_v48 = vpack.c.bf16 %v6746_v10, %v6739_v1  ;;  %v14331_v47 = vand.u32 4294901760, %v12778_v17  ;;  %v14645_v52 = vld [vmem:[#allocation45_spill] sm:$0xff] }
 0x57d   :  { %v6344_v54 = vadd.f32 %v6343_v27, %v6266_v12  ;;  %v5716_v43 = vpop.f32.mrb[84].mxu0  ;;  %v14330_v35 = vand.u32 4294901760, %v12786_v0  ;;  %v14333_v8 = vand.u32 4294901760, %v12790_v6  ;;  %v13371_v27 = vpack.c.bf16 %v6634_v49, %v6627_v23  ;;  %v14648_v12 = vld [vmem:[#allocation46_spill] sm:$0xff] }
 0x57e   :  { %14642 = vst [vmem:[#allocation37_spill] sm:$0xff] %v13359_v48  ;;  %v6409_v36 = vadd.f32 %v6408_v37, %v6267_v26  ;;  %v13364_v31 = vadd.f32 %v5716_v43, %v14643_v3  ;;  %v5718_v2 = vpop.f32.mrb[85].mxu0  ;;  %v6752_v20 = vsub.f32 %v12778_v17, %v14331_v47 }
 0x57f   :  { %v13369_v10 = vadd.f32 %v5718_v2, %v14645_v52  ;;  %v5720_v34 = vpop.f32.mrb[86].mxu0  ;;  %14647 = vst [vmem:[#allocation40_spill] sm:$0xff] %v13371_v27  ;;  %v6759_v37 = vsub.f32 %v12786_v0, %v14330_v35  ;;  %v6640_v49 = vsub.f32 %v12790_v6, %v14333_v8  ;;  %v14650_v52 = vld [vmem:[#allocation47_spill] sm:$0xff] }
 0x580   :  { %14644 = vst [vmem:[#allocation38_spill] sm:$0xff] %v13364_v31  ;;  %v6095_v43 = vadd.f32 %v13364_v31, %v6094_v29  ;;  %v6268_v1 = vmul.f32 %v13364_v31, %v13364_v31  ;;  %v13383_v26 = vadd.f32 %v5720_v34, %v14648_v12  ;;  %v5722_v3 = vpop.f32.mrb[87].mxu0  ;;  %v6753_v29 = vand.u32 4294901760, %v6752_v20  ;;  %v14660_v31 = vld [vmem:[#allocation51_spill] sm:$0xff] }
 0x581   :  { %14646 = vst [vmem:[#allocation39_spill] sm:$0xff] %v13369_v10  ;;  %v6160_v23 = vadd.f32 %v13369_v10, %v6159_v28  ;;  %v6269_v2 = vmul.f32 %v13369_v10, %v13369_v10  ;;  %v13392_v35 = vadd.f32 %v5722_v3, %v14650_v52  ;;  %v6760_v22 = vand.u32 4294901760, %v6759_v37 }
 0x582   :  { %14649 = vst [vmem:[#allocation41_spill] sm:$0xff] %v13383_v26  ;;  %v6345_v47 = vadd.f32 %v6344_v54, %v6268_v1  ;;  %v6020_v34 = vsel %vm5929_vm3, %v13383_v26, 0.0  ;;  %v6641_v1 = vand.u32 4294901760, %v6640_v49  ;;  %v6647_v37 = vsub.f32 %v12792_v30, %v14653_v25  ;;  %v14656_v49 = vld [vmem:[#allocation49_spill] sm:$0xff] }
 0x583   :  { %14651 = vst [vmem:[#allocation42_spill] sm:$0xff] %v13392_v35  ;;  %v6410_v16 = vadd.f32 %v6409_v36, %v6269_v2  ;;  %v6096_v8 = vadd.f32 %v6095_v43, %v6020_v34  ;;  %v6270_v28 = vmul.f32 %v13383_v26, %v6020_v34  ;;  %v6021_v27 = vsel %vm5929_vm3, %v13392_v35, 0.0  ;;  %v14654_v34 = vld [vmem:[#allocation48_spill] sm:$0xff] }
 0x584   :  { %v6161_v3 = vadd.f32 %v6160_v23, %v6021_v27  ;;  %v6271_v20 = vmul.f32 %v13392_v35, %v6021_v27  ;;  %v13404_v54 = vpack.c.bf16 %v6760_v22, %v6753_v29  ;;  %v14334_v36 = vand.u32 4294901760, %v12894_v18 }
 0x585   :  { %v6346_v52 = vadd.f32 %v6345_v47, %v6270_v28  ;;  %v5726_v48 = vpop.f32.mrb[88].mxu0  ;;  %v14336_v43 = vand.u32 4294901760, %v12902_v33  ;;  %v14338_v27 = vand.u32 4294901760, %v12906_v14  ;;  %v6648_v28 = vand.u32 4294901760, %v6647_v37 }
 0x586   :  { %14652 = vst [vmem:[#allocation43_spill] sm:$0xff] %v13404_v54  ;;  %v6411_v2 = vadd.f32 %v6410_v16, %v6271_v20  ;;  %v13412_v12 = vadd.f32 %v5726_v48, %v14654_v34  ;;  %v5728_v23 = vpop.f32.mrb[89].mxu0  ;;  %v6766_v25 = vsub.f32 %v12894_v18, %v14334_v36  ;;  %v14658_v34 = vld [vmem:[#allocation50_spill] sm:$0xff] }
 0x587   :  { %v13417_v47 = vadd.f32 %v5728_v23, %v14656_v49  ;;  %v5730_v29 = vpop.f32.mrb[90].mxu0  ;;  %v6773_v16 = vsub.f32 %v12902_v33, %v14336_v43  ;;  %v6654_v37 = vsub.f32 %v12906_v14, %v14338_v27 }
 0x588   :  { %14655 = vst [vmem:[#allocation44_spill] sm:$0xff] %v13412_v12  ;;  %v6097_v48 = vadd.f32 %v13412_v12, %v6096_v8  ;;  %v6272_v20 = vmul.f32 %v13412_v12, %v13412_v12  ;;  %v13429_v22 = vadd.f32 %v5730_v29, %v14658_v34  ;;  %v5732_v23 = vpop.f32.mrb[91].mxu0  ;;  %v13440_v8 = vpack.c.bf16 %v6648_v28, %v6641_v1 }
 0x589   :  { %14657 = vst [vmem:[#allocation45_spill] sm:$0xff] %v13417_v47  ;;  %v6162_v49 = vadd.f32 %v13417_v47, %v6161_v3  ;;  %v6273_v36 = vmul.f32 %v13417_v47, %v13417_v47  ;;  %v13438_v43 = vadd.f32 %v5732_v23, %v14660_v31  ;;  %v6767_v54 = vand.u32 4294901760, %v6766_v25 }
 0x58a   :  { %14659 = vst [vmem:[#allocation46_spill] sm:$0xff] %v13429_v22  ;;  %14662 = vst [vmem:[#allocation48_spill] sm:$0xff] %v13440_v8  ;;  %v6347_v26 = vadd.f32 %v6346_v52, %v6272_v20  ;;  %v6024_v29 = vsel %vm5929_vm3, %v13429_v22, 0.0  ;;  %v6774_v52 = vand.u32 4294901760, %v6773_v16  ;;  %v6655_v28 = vand.u32 4294901760, %v6654_v37  ;;  %v14667_v37 = vld [vmem:[#allocation53_spill] sm:$0xff] }
 0x58b   :  { %14661 = vst [vmem:[#allocation47_spill] sm:$0xff] %v13438_v43  ;;  %v6412_v27 = vadd.f32 %v6411_v2, %v6273_v36  ;;  %v6098_v55 = vadd.f32 %v6097_v48, %v6024_v29  ;;  %v6274_v3 = vmul.f32 %v13429_v22, %v6024_v29  ;;  %v6025_v31 = vsel %vm5929_vm3, %v13438_v43, 0.0  ;;  %v14664_v48 = vld [vmem:[#allocation52_spill] sm:$0xff] }
 0x58c   :  { %v6163_v23 = vadd.f32 %v6162_v49, %v6025_v31  ;;  %v6275_v1 = vmul.f32 %v13438_v43, %v6025_v31  ;;  %v6661_v34 = vsub.f32 %v12908_v63, %v14663_v44  ;;  %v14340_v36 = vand.u32 4294901760, %v13010_v46 }
 0x58d   :  { %v6348_v20 = vadd.f32 %v6347_v26, %v6274_v3  ;;  %v5736_v8 = vpop.f32.mrb[92].mxu0  ;;  %v14341_v2 = vand.u32 4294901760, %v13018_v51  ;;  %v13460_v49 = vpack.c.bf16 %v6774_v52, %v6767_v54  ;;  %v14343_v16 = vand.u32 4294901760, %v13022_v9 }
 0x58e   :  { %v6413_v25 = vadd.f32 %v6412_v27, %v6275_v1  ;;  %v13458_v29 = vadd.f32 %v5736_v8, %v14664_v48  ;;  %v5738_v12 = vpop.f32.mrb[93].mxu0  ;;  %v6662_v31 = vand.u32 4294901760, %v6661_v34  ;;  %v6780_v44 = vsub.f32 %v13010_v46, %v14340_v36  ;;  %v14669_v1 = vld [vmem:[#allocation54_spill] sm:$0xff]  ;;  %v14671_v36 = vld [vmem:[#allocation55_spill] sm:$0xff] }
 0x58f   :  { %14666 = vst [vmem:[#allocation50_spill] sm:$0xff] %v13460_v49  ;;  %v13464_v26 = vadd.f32 %v5738_v12, %v14667_v37  ;;  %v5740_v3 = vpop.f32.mrb[94].mxu0  ;;  %v6787_v27 = vsub.f32 %v13018_v51, %v14341_v2  ;;  %v6668_v34 = vsub.f32 %v13022_v9, %v14343_v16 }
 0x590   :  { %14665 = vst [vmem:[#allocation49_spill] sm:$0xff] %v13458_v29  ;;  %v6099_v8 = vadd.f32 %v13458_v29, %v6098_v55  ;;  %v6276_v54 = vmul.f32 %v13458_v29, %v13458_v29  ;;  %v13476_v52 = vadd.f32 %v5740_v3, %v14669_v1  ;;  %v5742_v12 = vpop.f32.mrb[95].mxu0  ;;  %v13487_v55 = vpack.c.bf16 %v6662_v31, %v6655_v28 }
 0x591   :  { %14668 = vst [vmem:[#allocation51_spill] sm:$0xff] %v13464_v26  ;;  %v6164_v48 = vadd.f32 %v13464_v26, %v6163_v23  ;;  %v6277_v37 = vmul.f32 %v13464_v26, %v13464_v26  ;;  %v13485_v2 = vadd.f32 %v5742_v12, %v14671_v36  ;;  %v6781_v49 = vand.u32 4294901760, %v6780_v44 }
 0x592   :  { %14670 = vst [vmem:[#allocation52_spill] sm:$0xff] %v13476_v52  ;;  %14673 = vst [vmem:[#allocation54_spill] sm:$0xff] %v13487_v55  ;;  %v6349_v22 = vadd.f32 %v6348_v20, %v6276_v54  ;;  %v6028_v3 = vsel %vm5929_vm3, %v13476_v52, 0.0  ;;  %v6788_v20 = vand.u32 4294901760, %v6787_v27  ;;  %v6669_v31 = vand.u32 4294901760, %v6668_v34 }
 0x593   :  { %14672 = vst [vmem:[#allocation53_spill] sm:$0xff] %v13485_v2  ;;  %v6414_v16 = vadd.f32 %v6413_v25, %v6277_v37  ;;  %v6100_v38 = vadd.f32 %v6099_v8, %v6028_v3  ;;  %v6278_v23 = vmul.f32 %v13476_v52, %v6028_v3  ;;  %v6029_v36 = vsel %vm5929_vm3, %v13485_v2, 0.0  ;;  %v14674_v8 = vld [vmem:[#allocation56_spill] sm:$0xff] }
 0x594   :  { %v6165_v12 = vadd.f32 %v6164_v48, %v6029_v36  ;;  %v6279_v28 = vmul.f32 %v13485_v2, %v6029_v36  ;;  %v14348_v26 = vand.u32 4294901760, %v13024_v41  ;;  %v14347_v1 = vand.u32 4294901760, %v13139_v21  ;;  %v14677_v36 = vld [vmem:[#allocation57_spill] sm:$0xff] }
 0x595   :  { %v6350_v54 = vadd.f32 %v6349_v22, %v6278_v23  ;;  %v5746_v55 = vpop.f32.mrb[96].mxu0  ;;  %v14349_v25 = vand.u32 4294901760, %v13141_v56  ;;  %v13505_v29 = vpack.c.bf16 %v6788_v20, %v6781_v49  ;;  %v14353_v48 = vand.u32 4294901760, %v13158_v42 }
 0x596   :  { %v6415_v44 = vadd.f32 %v6414_v16, %v6279_v28  ;;  %v13503_v37 = vadd.f32 %v5746_v55, %v14674_v8  ;;  %v5748_v3 = vpop.f32.mrb[97].mxu0  ;;  %v6675_v34 = vsub.f32 %v13024_v41, %v14348_v26  ;;  %v6794_v16 = vsub.f32 %v13139_v21, %v14347_v1  ;;  %v14679_v28 = vld [vmem:[#allocation58_spill] sm:$0xff]  ;;  %v14681_v26 = vld [vmem:[#allocation59_spill] sm:$0xff] }
 0x597   :  { %14676 = vst [vmem:[#allocation56_spill] sm:$0xff] %v13505_v29  ;;  %v13509_v27 = vadd.f32 %v5748_v3, %v14677_v36  ;;  %v5750_v22 = vpop.f32.mrb[98].mxu0  ;;  %v6801_v55 = vsub.f32 %v13141_v56, %v14349_v25  ;;  %v6682_v3 = vsub.f32 %v13158_v42, %v14353_v48 }
 0x598   :  { %14675 = vst [vmem:[#allocation55_spill] sm:$0xff] %v13503_v37  ;;  %v6101_v49 = vadd.f32 %v13503_v37, %v6100_v38  ;;  %v6280_v23 = vmul.f32 %v13503_v37, %v13503_v37  ;;  %v13524_v20 = vadd.f32 %v5750_v22, %v14679_v28  ;;  %v5752_v8 = vpop.f32.mrb[99].mxu0  ;;  %v6676_v38 = vand.u32 4294901760, %v6675_v34  ;;  %v14685_v37 = vld [vmem:[#allocation61_spill] sm:$0xff] }
 0x599   :  { %14678 = vst [vmem:[#allocation57_spill] sm:$0xff] %v13509_v27  ;;  %v6166_v36 = vadd.f32 %v13509_v27, %v6165_v12  ;;  %v6281_v1 = vmul.f32 %v13509_v27, %v13509_v27  ;;  %v13533_v25 = vadd.f32 %v5752_v8, %v14681_v26  ;;  %v6795_v29 = vand.u32 4294901760, %v6794_v16 }
 0x59a   :  { %14680 = vst [vmem:[#allocation58_spill] sm:$0xff] %v13524_v20  ;;  %v6351_v52 = vadd.f32 %v6350_v54, %v6280_v23  ;;  %v6032_v22 = vsel %vm5929_vm3, %v13524_v20, 0.0  ;;  %v13545_v54 = vpack.c.bf16 %v6676_v38, %v6669_v31  ;;  %v6802_v23 = vand.u32 4294901760, %v6801_v55 }
 0x59b   :  { %14682 = vst [vmem:[#allocation59_spill] sm:$0xff] %v13533_v25  ;;  %v6416_v2 = vadd.f32 %v6415_v44, %v6281_v1  ;;  %v6102_v48 = vadd.f32 %v6101_v49, %v6032_v22  ;;  %v6282_v12 = vmul.f32 %v13524_v20, %v6032_v22  ;;  %v6033_v27 = vsel %vm5929_vm3, %v13533_v25, 0.0  ;;  %v14683_v1 = vld [vmem:[#allocation60_spill] sm:$0xff] }
 0x59c   :  { %v6167_v26 = vadd.f32 %v6166_v36, %v6033_v27  ;;  %v6283_v34 = vmul.f32 %v13533_v25, %v6033_v27  ;;  %v6683_v47 = vand.u32 4294901760, %v6682_v3  ;;  %v14361_v28 = vand.u32 4294901760, %v13166_v4  ;;  %v14687_v3 = vld [vmem:[#allocation62_spill] sm:$0xff] }
 0x59d   :  { %v6352_v8 = vadd.f32 %v6351_v52, %v6282_v12  ;;  %v5756_v43 = vpop.f32.mrb[100].mxu0  ;;  %v13551_v22 = vpack.c.bf16 %v6802_v23, %v6795_v29 }
 0x59e   :  { %v6417_v16 = vadd.f32 %v6416_v2, %v6283_v34  ;;  %v13549_v44 = vadd.f32 %v5756_v43, %v14683_v1  ;;  %v5758_v49 = vpop.f32.mrb[101].mxu0  ;;  %v6689_v52 = vsub.f32 %v13166_v4, %v14361_v28  ;;  %v14689_v1 = vld [vmem:[#allocation63_spill] sm:$0xff] }
 0x59f   :  { %v13556_v27 = vadd.f32 %v5758_v49, %v14685_v37  ;;  %v5760_v31 = vpop.f32.mrb[102].mxu0 }
 0x5a0   :  { %14684 = vst [vmem:[#allocation60_spill] sm:$0xff] %v13549_v44  ;;  %v6103_v29 = vadd.f32 %v13549_v44, %v6102_v48  ;;  %v6284_v55 = vmul.f32 %v13549_v44, %v13549_v44  ;;  %v13569_v38 = vadd.f32 %v5760_v31, %v14687_v3  ;;  %v5762_v37 = vpop.f32.mrb[103].mxu0  ;;  %v6690_v28 = vand.u32 4294901760, %v6689_v52 }
 0x5a1   :  { %14686 = vst [vmem:[#allocation61_spill] sm:$0xff] %v13556_v27  ;;  %v6168_v34 = vadd.f32 %v13556_v27, %v6167_v26  ;;  %v6285_v23 = vmul.f32 %v13556_v27, %v13556_v27  ;;  %v13577_v49 = vadd.f32 %v5762_v37, %v14689_v1 }
 0x5a2   :  { %14688 = vst [vmem:[#allocation62_spill] sm:$0xff] %v13569_v38  ;;  %v6353_v48 = vadd.f32 %v6352_v8, %v6284_v55  ;;  %v6036_v43 = vsel %vm5929_vm3, %v13569_v38, 0.0  ;;  %v13591_v55 = vpack.c.bf16 %v6690_v28, %v6683_v47  ;;  %v14695_v28 = vld [vmem:[#allocation66_spill] sm:$0xff] }
 0x5a3   :  { %14690 = vst [vmem:[#allocation63_spill] sm:$0xff] %v13577_v49  ;;  %v6418_v12 = vadd.f32 %v6417_v16, %v6285_v23  ;;  %v6104_v26 = vadd.f32 %v6103_v29, %v6036_v43  ;;  %v6286_v2 = vmul.f32 %v13569_v38, %v6036_v43  ;;  %v6037_v37 = vsel %vm5929_vm3, %v13577_v49, 0.0  ;;  %v14697_v29 = vld [vmem:[#allocation67_spill] sm:$0xff] }
 0x5a4   :  { %v6169_v52 = vadd.f32 %v6168_v34, %v6037_v37  ;;  %v6287_v8 = vmul.f32 %v13577_v49, %v6037_v37  ;;  %v14691_v34 = vld [vmem:[#allocation64_spill] sm:$0xff] }
 0x5a5   :  { %v6354_v31 = vadd.f32 %v6353_v48, %v6286_v2  ;;  %v5766_v36 = vpop.f32.mrb[104].mxu0  ;;  %v14693_v48 = vld [vmem:[#allocation65_spill] sm:$0xff]  ;;  %v14712_v49 = vld [vmem:[#allocation72_spill] sm:$0xff] }
 0x5a6   :  { %v6419_v23 = vadd.f32 %v6418_v12, %v6287_v8  ;;  %v13602_v3 = vadd.f32 %v5766_v36, %v14691_v34  ;;  %v5768_v47 = vpop.f32.mrb[105].mxu0 }
 0x5a7   :  { %v13609_v37 = vadd.f32 %v5768_v47, %v14693_v48  ;;  %v5770_v16 = vpop.f32.mrb[106].mxu0 }
 0x5a8   :  { %14692 = vst [vmem:[#allocation64_spill] sm:$0xff] %v13602_v3  ;;  %v6105_v8 = vadd.f32 %v13602_v3, %v6104_v26  ;;  %v6288_v34 = vmul.f32 %v13602_v3, %v13602_v3  ;;  %v13621_v2 = vadd.f32 %v5770_v16, %v14695_v28  ;;  %v5772_v47 = vpop.f32.mrb[107].mxu0  ;;  %v14701_v3 = vld [vmem:[#allocation68_spill] sm:$0xff] }
 0x5a9   :  { %14694 = vst [vmem:[#allocation65_spill] sm:$0xff] %v13609_v37  ;;  %v6170_v43 = vadd.f32 %v13609_v37, %v6169_v52  ;;  %v6289_v12 = vmul.f32 %v13609_v37, %v13609_v37  ;;  %v13629_v1 = vadd.f32 %v5772_v47, %v14697_v29 }
 0x5aa   :  { %14696 = vst [vmem:[#allocation66_spill] sm:$0xff] %v13621_v2  ;;  %v6355_v36 = vadd.f32 %v6354_v31, %v6288_v34  ;;  %v6040_v26 = vsel %vm5929_vm3, %v13621_v2, 0.0 }
 0x5ab   :  { %14698 = vst [vmem:[#allocation67_spill] sm:$0xff] %v13629_v1  ;;  %v6420_v28 = vadd.f32 %v6419_v23, %v6289_v12  ;;  %v6106_v44 = vadd.f32 %v6105_v8, %v6040_v26  ;;  %v6290_v48 = vmul.f32 %v13621_v2, %v6040_v26  ;;  %v6041_v52 = vsel %vm5929_vm3, %v13629_v1, 0.0 }
 0x5ac   :  { %v6171_v38 = vadd.f32 %v6170_v43, %v6041_v52  ;;  %v6291_v29 = vmul.f32 %v13629_v1, %v6041_v52 }
 0x5ad   :  { %v6356_v34 = vadd.f32 %v6355_v36, %v6290_v48  ;;  %v5776_v47 = vpop.f32.mrb[108].mxu0  ;;  %v14706_v48 = vld [vmem:[#allocation69_spill] sm:$0xff] }
 0x5ae   :  { %v6421_v16 = vadd.f32 %v6420_v28, %v6291_v29  ;;  %v13650_v2 = vadd.f32 %v5776_v47, %v14701_v3  ;;  %v5778_v43 = vpop.f32.mrb[109].mxu0  ;;  %v14708_v47 = vld [vmem:[#allocation70_spill] sm:$0xff] }
 0x5af   :  { %v13657_v50 = vadd.f32 %v5778_v43, %v14706_v48  ;;  %v5780_v20 = vpop.f32.mrb[110].mxu0  ;;  %v14710_v48 = vld [vmem:[#allocation71_spill] sm:$0xff] }
 0x5b0   :  { %14702 = vst [vmem:[#allocation68_spill] sm:$0xff] %v13650_v2  ;;  %v6107_v3 = vadd.f32 %v13650_v2, %v6106_v44  ;;  %v6292_v29 = vmul.f32 %v13650_v2, %v13650_v2  ;;  %v13667_v4 = vadd.f32 %v5780_v20, %v14708_v47  ;;  %v5782_v26 = vpop.f32.mrb[111].mxu0 }
 0x5b1   :  { %14707 = vst [vmem:[#allocation69_spill] sm:$0xff] %v13657_v50  ;;  %v6172_v36 = vadd.f32 %v13657_v50, %v6171_v38  ;;  %v6293_v43 = vmul.f32 %v13657_v50, %v13657_v50  ;;  %v13673_v31 = vadd.f32 %v5782_v26, %v14710_v48  ;;  %v14720_v50 = vld [vmem:[#allocation76_spill] sm:$0xff] }
 0x5b2   :  { %14709 = vst [vmem:[#allocation70_spill] sm:$0xff] %v13667_v4  ;;  %v6357_v23 = vadd.f32 %v6356_v34, %v6292_v29  ;;  %v6044_v44 = vsel %vm5929_vm3, %v13667_v4, 0.0 }
 0x5b3   :  { %14711 = vst [vmem:[#allocation71_spill] sm:$0xff] %v13673_v31  ;;  %v6422_v37 = vadd.f32 %v6421_v16, %v6293_v43  ;;  %v6108_v20 = vadd.f32 %v6107_v3, %v6044_v44  ;;  %v6294_v47 = vmul.f32 %v13667_v4, %v6044_v44  ;;  %v6045_v38 = vsel %vm5929_vm3, %v13673_v31, 0.0  ;;  %v14714_v3 = vld [vmem:[#allocation73_spill] sm:$0xff] }
 0x5b4   :  { %v6173_v1 = vadd.f32 %v6172_v36, %v6045_v38  ;;  %v6295_v26 = vmul.f32 %v13673_v31, %v6045_v38  ;;  %v14716_v38 = vld [vmem:[#allocation74_spill] sm:$0xff] }
 0x5b5   :  { %v6358_v29 = vadd.f32 %v6357_v23, %v6294_v47  ;;  %v5786_v48 = vpop.f32.mrb[112].mxu0 }
 0x5b6   :  { %v6423_v27 = vadd.f32 %v6422_v37, %v6295_v26  ;;  %v13688_v25 = vadd.f32 %v5786_v48, %v14712_v49  ;;  %v5788_v16 = vpop.f32.mrb[113].mxu0  ;;  %v14718_v37 = vld [vmem:[#allocation75_spill] sm:$0xff] }
 0x5b7   :  { %v13691_v43 = vadd.f32 %v5788_v16, %v14714_v3  ;;  %v5790_v44 = vpop.f32.mrb[114].mxu0 }
 0x5b8   :  { %14713 = vst [vmem:[#allocation72_spill] sm:$0xff] %v13688_v25  ;;  %v6109_v28 = vadd.f32 %v13688_v25, %v6108_v20  ;;  %v6296_v36 = vmul.f32 %v13688_v25, %v13688_v25  ;;  %v13697_v2 = vadd.f32 %v5790_v44, %v14716_v38  ;;  %v5792_v34 = vpop.f32.mrb[115].mxu0 }
 0x5b9   :  { %14715 = vst [vmem:[#allocation73_spill] sm:$0xff] %v13691_v43  ;;  %v6174_v23 = vadd.f32 %v13691_v43, %v6173_v1  ;;  %v6297_v49 = vmul.f32 %v13691_v43, %v13691_v43  ;;  %v13703_v47 = vadd.f32 %v5792_v34, %v14718_v37 }
 0x5ba   :  { %14717 = vst [vmem:[#allocation74_spill] sm:$0xff] %v13697_v2  ;;  %v6359_v26 = vadd.f32 %v6358_v29, %v6296_v36  ;;  %v6048_v20 = vsel %vm5929_vm3, %v13697_v2, 0.0 }
 0x5bb   :  { %14719 = vst [vmem:[#allocation75_spill] sm:$0xff] %v13703_v47  ;;  %v6424_v16 = vadd.f32 %v6423_v27, %v6297_v49  ;;  %v6110_v3 = vadd.f32 %v6109_v28, %v6048_v20  ;;  %v6298_v44 = vmul.f32 %v13697_v2, %v6048_v20  ;;  %v6049_v1 = vsel %vm5929_vm3, %v13703_v47, 0.0  ;;  %v14722_v28 = vld [vmem:[#allocation77_spill] sm:$0xff] }
 0x5bc   :  { %v6175_v38 = vadd.f32 %v6174_v23, %v6049_v1  ;;  %v6299_v34 = vmul.f32 %v13703_v47, %v6049_v1  ;;  %v14724_v1 = vld [vmem:[#allocation78_spill] sm:$0xff] }
 0x5bd   :  { %v6360_v36 = vadd.f32 %v6359_v26, %v6298_v44  ;;  %v5796_v37 = vpop.f32.mrb[116].mxu0 }
 0x5be   :  { %v6425_v4 = vadd.f32 %v6424_v16, %v6299_v34  ;;  %v13718_v31 = vadd.f32 %v5796_v37, %v14720_v50  ;;  %v5798_v27 = vpop.f32.mrb[117].mxu0  ;;  %v14726_v16 = vld [vmem:[#allocation79_spill] sm:$0xff] }
 0x5bf   :  { %v13721_v49 = vadd.f32 %v5798_v27, %v14722_v28  ;;  %v5800_v20 = vpop.f32.mrb[118].mxu0 }
 0x5c0   :  { %14721 = vst [vmem:[#allocation76_spill] sm:$0xff] %v13718_v31  ;;  %v6111_v48 = vadd.f32 %v13718_v31, %v6110_v3  ;;  %v6300_v23 = vmul.f32 %v13718_v31, %v13718_v31  ;;  %v13727_v25 = vadd.f32 %v5800_v20, %v14724_v1  ;;  %v5802_v29 = vpop.f32.mrb[119].mxu0 }
 0x5c1   :  { %14723 = vst [vmem:[#allocation77_spill] sm:$0xff] %v13721_v49  ;;  %v6176_v26 = vadd.f32 %v13721_v49, %v6175_v38  ;;  %v6301_v50 = vmul.f32 %v13721_v49, %v13721_v49  ;;  %v13733_v44 = vadd.f32 %v5802_v29, %v14726_v16 }
 0x5c2   :  { %14725 = vst [vmem:[#allocation78_spill] sm:$0xff] %v13727_v25  ;;  %v6361_v34 = vadd.f32 %v6360_v36, %v6300_v23  ;;  %v6052_v3 = vsel %vm5929_vm3, %v13727_v25, 0.0 }
 0x5c3   :  { %14727 = vst [vmem:[#allocation79_spill] sm:$0xff] %v13733_v44  ;;  %v6426_v27 = vadd.f32 %v6425_v4, %v6301_v50  ;;  %v6112_v28 = vadd.f32 %v6111_v48, %v6052_v3  ;;  %v6302_v20 = vmul.f32 %v13727_v25, %v6052_v3  ;;  %v6053_v38 = vsel %vm5929_vm3, %v13733_v44, 0.0 }
 0x5c4   :  { %v6177_v1 = vadd.f32 %v6176_v26, %v6053_v38  ;;  %v6303_v29 = vmul.f32 %v13733_v44, %v6053_v38  ;;  %v14780_v44 = vand.u32 4294901760, %v14609_v61 }
 0x5c5   :  { %v6113_v23 = vrot.slane %v6112_v28, 4  ;;  %v6362_v16 = vadd.f32 %v6361_v34, %v6302_v20 }
 0x5c6   :  { %v6178_v2 = vrot.slane %v6177_v1, 4  ;;  %v6427_v43 = vadd.f32 %v6426_v27, %v6303_v29 }
 0x5c7   :  { %v6114_v47 = vadd.f32 %v6113_v23, %v6112_v28  ;;  %v6363_v37 = vrot.slane %v6362_v16, 4  ;;  %v14729_v23 = vld [vmem:[#allocation32_spill] sm:$0xff] }
 0x5c8   :  { %v6179_v4 = vadd.f32 %v6178_v2, %v6177_v1  ;;  %v6428_v48 = vrot.slane %v6427_v43, 4 }
 0x5c9   :  { %v6115_v50 = vrot.slane %v6114_v47, 2  ;;  %v6364_v3 = vadd.f32 %v6363_v37, %v6362_v16  ;;  %v14730_v16 = vld [vmem:[#allocation33_spill] sm:$0xff] }
 0x5ca   :  { %v6180_v31 = vrot.slane %v6179_v4, 2  ;;  %v6429_v25 = vadd.f32 %v6428_v48, %v6427_v43  ;;  %v14732_v48 = vld [vmem:[#allocation100_spill] sm:$0xff] }
 0x5cb   :  { %v6116_v7 = vadd.f32 %v6115_v50, %v6114_v47  ;;  %v6365_v52 = vrot.slane %v6364_v3, 2  ;;  %v14733_v50 = vld [vmem:[#allocation37_spill] sm:$0xff] }
 0x5cc   :  { %v6181_v26 = vadd.f32 %v6180_v31, %v6179_v4  ;;  %v6430_v42 = vrot.slane %v6429_v25, 2  ;;  %v14731_v4 = vld [vmem:[#allocation35_spill] sm:$0xff] }
 0x5cd   :  { %v6117_v38 = vrot.slane %v6116_v7, 1  ;;  %v6366_v12 = vadd.f32 %v6365_v52, %v6364_v3  ;;  %v14734_v3 = vld [vmem:[#allocation40_spill] sm:$0xff] }
 0x5ce   :  { %v6182_v8 = vrot.slane %v6181_v26, 1  ;;  %v6431_v36 = vadd.f32 %v6430_v42, %v6429_v25 }
 0x5cf   :  { %v6367_v49 = vrot.slane %v6366_v12, 1  ;;  %v6118_v20 = vadd.f32 %v6117_v38, %v6116_v7  ;;  %v14735_v7 = vld [vmem:[#allocation43_spill] sm:$0xff]  ;;  %v14737_v38 = vld [vmem:[#allocation50_spill] sm:$0xff] }
 0x5d0   :  { %v6432_v34 = vrot.slane %v6431_v36, 1  ;;  %v6183_v28 = vadd.f32 %v6182_v8, %v6181_v26  ;;  %v14736_v26 = vld [vmem:[#allocation48_spill] sm:$0xff] }
 0x5d1   :  { %v6368_v27 = vadd.f32 %v6367_v49, %v6366_v12 }
 0x5d2   :  { %v6433_v29 = vadd.f32 %v6432_v34, %v6431_v36  ;;  %v14728_v36 = vld [vmem:[#allocation30_spill] sm:$0xff] }
 0x5d3   :  { %v6434_v2 = vsel %vm342_vm0, %v6118_v20, %v6368_v27  ;;  %v14738_v34 = vld [vmem:[#allocation54_spill] sm:$0xff]  ;;  %v14739_v20 = vld [vmem:[#allocation56_spill] sm:$0xff]  ;;  %v14740_v27 = vld [vmem:[#allocation81_spill] sm:$0xff] }
 0x5d4   :  { %v13748_v1 = vand.u32 4294901760, %v6434_v2  ;;  %v6435_v43 = vsel %vm342_vm0, %v6183_v28, %v6433_v29  ;;  %v14741_v28 = vld [vmem:[#allocation82_spill] sm:$0xff] }
 0x5d5   :  { %v13751_v47 = vand.u32 4294901760, %v6435_v43  ;;  %v8811_v29 = vpack.c.bf16 %v14741_v28, %v14740_v27 }
 0x5d6   :  { %v13754_v31 = vsub.f32 %v6434_v2, %v13748_v1  ;;  %v14742_v2 = vpack.c.bf16 %v14597_v58, %v14596_v40 }
 0x5d7   :  { %v6565_v52 = vsub.f32 %v6435_v43, %v13751_v47  ;;  %v14743_v43 = vpack.c.bf16 %v14609_v61, %v14598_v32  ;;  %v14786_v61 = vand.u32 4294901760, %v14625_v24 }
 0x5d8   :  { %v14388_v42 = vand.u32 4294901760, %v13754_v31  ;;  %v14781_v35 = vand.u32 4294901760, %v13754_v31 }
 0x5d9   :  { %v6566_v25 = vand.u32 4294901760, %v6565_v52 }
 0x5da   :  { %v6573_v12 = vsub.f32 %v13754_v31, %v14388_v42  ;;  %v14779_v42 = vand.u32 4294901760, %v14598_v32 }
 0x5db   :  { %v6567_v8 = vsub.f32 %v6565_v52, %v6566_v25 }
 0x5dc   :  { %v6574_v37 = vand.u32 4294901760, %v6573_v12  ;;  %v14747_v12 = vpack.c.bf16 %v12670_v19, %v12662_v39  ;;  %v8879_v10 = vpack.c.bf16 %v14780_v44, %v14779_v42  ;;  %v14787_v44 = vand.u32 4294901760, %v12552_v60 }
 0x5dd   :  { %v6568_v49 = vand.u32 4294901760, %v6567_v8  ;;  %v14749_v8 = vpack.c.bf16 %v12786_v0, %v12778_v17 }
 0x5df   :  { %6569 = vmatprep.mubr.f32.mxu1 %v6568_v49  ;;  %v14750_v49 = vpack.c.bf16 %v12792_v30, %v12790_v6 }
 0x5e0   :  { %6575 = vmatmul.mubr.f32.vlgmr.msra.gmra.mrb[120].mxu1 %v6574_v37  ;;  %v14751_v37 = vpack.c.bf16 %v12902_v33, %v12894_v18 }
 0x5e1   :  { %8782 = vmatpush3.bf16.msra.mxu1 %v14728_v36  ;;  %6805 = vmatprep.mubr.f32.mxu1 %v13751_v47  ;;  %v14752_v36 = vpack.c.bf16 %v12908_v63, %v12906_v14 }
 0x5e2   :  { %8784 = vmatprep.subr.bf16.mxu1 %v14729_v23  ;;  %v14753_v23 = vpack.c.bf16 %v13018_v51, %v13010_v46 }
 0x5e5   :  { %8786 = vmatpush3.bf16.msra.mxu1 %v14730_v16  ;;  %v14754_v16 = vpack.c.bf16 %v13024_v41, %v13022_v9 }
 0x5e6   :  { %8788 = vmatprep.subr.bf16.mxu1 %v14731_v4  ;;  %v14755_v4 = vpack.c.bf16 %v13141_v56, %v13139_v21 }
 0x5e9   :  { %8790 = vmatpush3.bf16.msra.mxu1 %v14732_v48  ;;  %v14756_v48 = vld [vmem:[#allocation150_spill] sm:$0xff] }
 0x5ea   :  { %8792 = vmatprep.subr.bf16.mxu1 %v14733_v50  ;;  %v14757_v50 = vld [vmem:[#allocation149_spill] sm:$0xff] }
 0x5ed   :  { %8794 = vmatpush3.bf16.msra.mxu1 %v14734_v3  ;;  %v14758_v3 = vpack.c.bf16 %v14756_v48, %v14757_v50 }
 0x5ee   :  { %8796 = vmatprep.subr.bf16.mxu1 %v14735_v7  ;;  %v14759_v7 = vld [vmem:[#allocation80_spill] sm:$0xff] }
 0x5f1   :  { %8798 = vmatpush3.bf16.msra.mxu1 %v14736_v26  ;;  %v14760_v26 = vld [vmem:[#allocation84_spill] sm:$0xff] }
 0x5f2   :  { %8800 = vmatprep.subr.bf16.mxu1 %v14737_v38  ;;  %v14761_v38 = vld [vmem:[#allocation86_spill] sm:$0xff] }
 0x5f5   :  { %8802 = vmatpush3.bf16.msra.mxu1 %v14738_v34  ;;  %v14762_v34 = vld [vmem:[#allocation90_spill] sm:$0xff] }
 0x5f6   :  { %8804 = vmatprep.subr.bf16.mxu1 %v14739_v20  ;;  %v14763_v20 = vld [vmem:[#allocation96_spill] sm:$0xff] }
 0x5f9   :  { %8806 = vmatpush3.bf16.msra.mxu1 %v13545_v54  ;;  %v14744_v54 = vpack.c.bf16 %v14614_v13, %v14610_v15 }
 0x5fa   :  { %8808 = vmatprep.subr.bf16.mxu1 %v13551_v22  ;;  %v14745_v22 = vpack.c.bf16 %v14624_v5, %v14617_v11 }
 0x5fd   :  { %8810 = vmatpush3.bf16.msra.mxu1 %v13591_v55  ;;  %v14746_v55 = vpack.c.bf16 %v12552_v60, %v14625_v24  ;;  %v14793_v24 = vand.u32 4294901760, %v12786_v0  ;;  %v14794_v60 = vand.u32 4294901760, %v12790_v6  ;;  %v14800_v0 = vand.u32 4294901760, %v13010_v46 }
 0x5fe   :  { %8812 = vmatprep.subr.bf16.mxu1 %v8811_v29  ;;  %v14764_v29 = vld [vmem:[#allocation99_spill] sm:$0xff]  ;;  %v14801_v6 = vand.u32 4294901760, %v13018_v51  ;;  %v14807_v46 = vand.u32 4294901760, %v14756_v48  ;;  %v10018_v51 = vld [vmem:[%s14188_s2 + $0x4] ss:$16 sps:$4 sm:$0xff]  }
 0x600   :  { %6807 = vmatmul.mubr.f32.vlgmr.msra.gmra.mrb[122].mxu1 %v13748_v1 }
 0x601   :  { %8814 = vmatpush3.bf16.msra.mxu1 %v14742_v2  ;;  %6942 = vmatprep.mubr.f32.mxu1 %v6565_v52  ;;  %v14748_v52 = vpack.c.bf16 %v12676_v53, %v12674_v59  ;;  %v14765_v2 = vld [vmem:[#allocation113_spill] sm:$0xff] }
 0x602   :  { %8816 = vmatprep.subr.bf16.mxu1 %v14743_v43  ;;  %v14766_v43 = vld [vmem:[#allocation114_spill] sm:$0xff] }
 0x605   :  { %8818 = vmatpush3.bf16.msra.mxu1 %v14744_v54  ;;  %v14767_v54 = vld [vmem:[#allocation127_spill] sm:$0xff] }
 0x606   :  { %8820 = vmatprep.subr.bf16.mxu1 %v14745_v22  ;;  %v14768_v22 = vld [vmem:[#allocation128_spill] sm:$0xff] }
 0x609   :  { %8822 = vmatpush3.bf16.msra.mxu1 %v14746_v55  ;;  %v14769_v55 = vld [vmem:[#allocation141_spill] sm:$0xff] }
 0x60a   :  { %8824 = vmatprep.subr.bf16.mxu1 %v14747_v12  ;;  %v14770_v12 = vld [vmem:[#allocation142_spill] sm:$0xff] }
 0x60d   :  { %8826 = vmatpush3.bf16.msra.mxu1 %v14748_v52  ;;  %v14772_v52 = vld [vmem:[#allocation146_spill] sm:$0xff] }
 0x60e   :  { %8828 = vmatprep.subr.bf16.mxu1 %v14749_v8  ;;  %v14773_v8 = vld [vmem:[#allocation147_spill] sm:$0xff] }
 0x611   :  { %8830 = vmatpush3.bf16.msra.mxu1 %v14750_v49  ;;  %v14774_v49 = vand.u32 4294901760, %v14740_v27  ;;  %v14782_v27 = vand.u32 4294901760, %v14610_v15  ;;  %v14789_v15 = vand.u32 4294901760, %v12670_v19  ;;  %v14796_v19 = vand.u32 4294901760, %v12894_v18 }
 0x612   :  { %8832 = vmatprep.subr.bf16.mxu1 %v14751_v37  ;;  %v14775_v37 = vand.u32 4294901760, %v14741_v28  ;;  %v14783_v28 = vand.u32 4294901760, %v14614_v13  ;;  %v14790_v13 = vand.u32 4294901760, %v12674_v59  ;;  %v14797_v59 = vand.u32 4294901760, %v12902_v33 }
 0x613   :  { %v14803_v18 = vand.u32 4294901760, %v13024_v41  ;;  %v14804_v33 = vand.u32 4294901760, %v13139_v21  ;;  %v14809_v41 = vld [vmem:[#allocation93_spill] sm:$0xff] }
 0x615   :  { %8834 = vmatpush3.bf16.msra.mxu1 %v14752_v36  ;;  %v8875_v36 = vpack.c.bf16 %v14775_v37, %v14774_v49  ;;  %v14785_v49 = vand.u32 4294901760, %v14624_v5  ;;  %v14792_v5 = vand.u32 4294901760, %v12778_v17  ;;  %v14799_v17 = vand.u32 4294901760, %v12908_v63 }
 0x616   :  { %8836 = vmatprep.subr.bf16.mxu1 %v14753_v23  ;;  %v14776_v23 = vld [vmem:[#allocation148_spill] sm:$0xff]  ;;  %v14806_v63 = vand.u32 4294901760, %v14757_v50 }
 0x617   :  { %v8891_v37 = vpack.c.bf16 %v14793_v24, %v14792_v5  ;;  %v14814_v50 = vld [vmem:[#allocation104_spill] sm:$0xff]  ;;  %v14844_v5 = vld [vmem:[#allocation126_spill] sm:$0xff] }
 0x618   :  { %v14845_v24 = vld [vmem:[#allocation124_spill] sm:$0xff] }
 0x619   :  { %8838 = vmatpush3.bf16.msra.mxu1 %v14754_v16  ;;  %v14777_v16 = vand.u32 4294901760, %v14596_v40  ;;  %v8881_v40 = vpack.c.bf16 %v14783_v28, %v14782_v27 }
 0x61a   :  { %8840 = vmatprep.subr.bf16.mxu1 %v14755_v4  ;;  %v14778_v4 = vand.u32 4294901760, %v14597_v58  ;;  %v14784_v58 = vand.u32 4294901760, %v14617_v11  ;;  %v14791_v11 = vand.u32 4294901760, %v12676_v53  ;;  %v14798_v53 = vand.u32 4294901760, %v12906_v14 }
 0x61b   :  { %v14805_v14 = vand.u32 4294901760, %v13141_v56  ;;  %v14811_v56 = vld [vmem:[#allocation94_spill] sm:$0xff] }
 0x61c   :  { %v8883_v32 = vpack.c.bf16 %v14785_v49, %v14784_v58  ;;  %v14832_v58 = vld [vmem:[#allocation118_spill] sm:$0xff]  ;;  %v14833_v49 = vld [vmem:[#allocation116_spill] sm:$0xff] }
 0x61d   :  { %8842 = vmatpush3.bf16.msra.mxu1 %v14758_v3  ;;  %v8877_v3 = vpack.c.bf16 %v14778_v4, %v14777_v16  ;;  %v8895_v16 = vpack.c.bf16 %v14797_v59, %v14796_v19  ;;  %v8897_v4 = vpack.c.bf16 %v14799_v17, %v14798_v53  ;;  %v8903_v28 = vpack.c.bf16 %v14805_v14, %v14804_v33  ;;  %v14850_v19 = vld [vmem:[#allocation132_spill] sm:$0xff]  ;;  %v14851_v59 = vld [vmem:[#allocation130_spill] sm:$0xff]  ;;  %v14853_v53 = vld [vmem:[#allocation131_spill] sm:$0xff] }
 0x61e   :  { %8844 = vmatprep.subr.bf16.mxu1 %v14759_v7  ;;  %v14854_v17 = vld [vmem:[#allocation129_spill] sm:$0xff]  ;;  %v14862_v33 = vld [vmem:[#allocation140_spill] sm:$0xff]  ;;  %v14863_v14 = vld [vmem:[#allocation138_spill] sm:$0xff] }
 0x620   :  { %6945 = vmatmul.mubr.f32.vlgmr.msra.gmra.mrb[124].mxu1 %v13754_v31  ;;  %v14788_v31 = vand.u32 4294901760, %v12662_v39  ;;  %v14795_v39 = vand.u32 4294901760, %v12792_v30  ;;  %v14802_v30 = vand.u32 4294901760, %v13022_v9  ;;  %v14808_v9 = vld [vmem:[#allocation95_spill] sm:$0xff] }
 0x621   :  { %8846 = vmatpush3.bf16.msra.mxu1 %v14760_v26  ;;  %7049 = vmatprep.mubr.f32.mxu1 %v6566_v25  ;;  %v14771_v25 = vld [vmem:[#allocation145_spill] sm:$0xff]  ;;  %v14810_v21 = vpack.c.bf16 %v14808_v9, %v14809_v41  ;;  %v14869_v9 = vld [vmem:[#allocation144_spill] sm:$0xff] }
 0x622   :  { %8848 = vmatprep.subr.bf16.mxu1 %v14761_v38  ;;  %v8887_v42 = vpack.c.bf16 %v14789_v15, %v14788_v31  ;;  %v8901_v27 = vpack.c.bf16 %v14803_v18, %v14802_v30  ;;  %v14838_v31 = vld [vmem:[#allocation122_spill] sm:$0xff]  ;;  %v14839_v15 = vld [vmem:[#allocation120_spill] sm:$0xff]  ;;  %v14859_v30 = vld [vmem:[#allocation135_spill] sm:$0xff] }
 0x623   :  { %v14860_v18 = vld [vmem:[#allocation133_spill] sm:$0xff] }
 0x625   :  { %8850 = vmatpush3.bf16.msra.mxu1 %v14762_v34 }
 0x626   :  { %8852 = vmatprep.subr.bf16.mxu1 %v14763_v20 }
 0x629   :  { %8854 = vmatpush3.bf16.msra.mxu1 %v14764_v29 }
 0x62a   :  { %8856 = vmatprep.subr.bf16.mxu1 %v14765_v2 }
 0x62d   :  { %8858 = vmatpush3.bf16.msra.mxu1 %v14766_v43 }
 0x62e   :  { %8860 = vmatprep.subr.bf16.mxu1 %v14767_v54 }
 0x631   :  { %8862 = vmatpush3.bf16.msra.mxu1 %v14768_v22 }
 0x632   :  { %8864 = vmatprep.subr.bf16.mxu1 %v14769_v55 }
 0x635   :  { %8866 = vmatpush3.bf16.msra.mxu1 %v14770_v12 }
 0x636   :  { %8868 = vmatprep.subr.bf16.mxu1 %v14771_v25 }
 0x639   :  { %8870 = vmatpush3.bf16.msra.mxu1 %v14772_v52 }
 0x63a   :  { %8872 = vmatprep.subr.bf16.mxu1 %v14773_v8 }
 0x63d   :  { %8874 = vmatpush3.bf16.msra.mxu1 %v14776_v23 }
 0x63e   :  { %8876 = vmatprep.subr.bf16.mxu1 %v8875_v36  ;;  %v8893_v36 = vpack.c.bf16 %v14795_v39, %v14794_v60  ;;  %v14847_v60 = vld [vmem:[#allocation125_spill] sm:$0xff]  ;;  %v14848_v39 = vld [vmem:[#allocation123_spill] sm:$0xff] }
 0x640   :  { %7053 = vmatmul.mubr.f32.vlgmr.msra.gmra.mrb[126].mxu1 %v14781_v35  ;;  %v8885_v35 = vpack.c.bf16 %v14787_v44, %v14786_v61  ;;  %v14835_v61 = vld [vmem:[#allocation117_spill] sm:$0xff]  ;;  %v14836_v44 = vld [vmem:[#allocation115_spill] sm:$0xff] }
 0x641   :  { %8878 = vmatpush3.bf16.msra.mxu1 %v8877_v3  ;;  %7219 = vmatprep.mubr.f32.mxu1 %v13751_v47  ;;  %v8899_v3 = vpack.c.bf16 %v14801_v6, %v14800_v0  ;;  %v14856_v0 = vld [vmem:[#allocation136_spill] sm:$0xff]  ;;  %v14857_v6 = vld [vmem:[#allocation134_spill] sm:$0xff] }
 0x642   :  { %8880 = vmatprep.subr.bf16.mxu1 %v8879_v10  ;;  %v8889_v10 = vpack.c.bf16 %v14791_v11, %v14790_v13  ;;  %v14841_v13 = vld [vmem:[#allocation121_spill] sm:$0xff]  ;;  %v14842_v11 = vld [vmem:[#allocation119_spill] sm:$0xff] }
 0x645   :  { %8882 = vmatpush3.bf16.msra.mxu1 %v8881_v40  ;;  %v8905_v40 = vpack.c.bf16 %v14807_v46, %v14806_v63  ;;  %v14865_v63 = vld [vmem:[#allocation139_spill] sm:$0xff]  ;;  %v14866_v46 = vld [vmem:[#allocation137_spill] sm:$0xff] }
 0x646   :  { %8884 = vmatprep.subr.bf16.mxu1 %v8883_v32  ;;  %v14834_v32 = vpack.c.bf16 %v14832_v58, %v14833_v49  ;;  %v14890_v58 = vld [vmem:[#allocation12_spill] sm:$0xff] }
 0x649   :  { %8886 = vmatpush3.bf16.msra.mxu1 %v8885_v35  ;;  %v14837_v35 = vpack.c.bf16 %v14835_v61, %v14836_v44  ;;  %v14893_v61 = vld [vmem:[#allocation17_spill] sm:$0xff] }
 0x64a   :  { %8888 = vmatprep.subr.bf16.mxu1 %v8887_v42  ;;  %v14840_v42 = vpack.c.bf16 %v14838_v31, %v14839_v15  ;;  %v14896_v31 = vld [vmem:[#allocation16_spill] sm:$0xff] }
 0x64d   :  { %8890 = vmatpush3.bf16.msra.mxu1 %v8889_v10  ;;  %v14843_v10 = vpack.c.bf16 %v14841_v13, %v14842_v11  ;;  %v14899_v13 = vld [vmem:[#allocation21_spill] sm:$0xff] }
 0x64e   :  { %8892 = vmatprep.subr.bf16.mxu1 %v8891_v37  ;;  %v14846_v37 = vpack.c.bf16 %v14844_v5, %v14845_v24  ;;  %v14901_v5 = vld [vmem:[#allocation25_spill] sm:$0xff]  ;;  %v14902_v24 = vld [vmem:[#allocation27_spill] sm:$0xff] }
 0x651   :  { %8894 = vmatpush3.bf16.msra.mxu1 %v8893_v36  ;;  %v14849_v36 = vpack.c.bf16 %v14847_v60, %v14848_v39  ;;  %v10016_v60 = vld [vmem:[%s14188_s2] ss:$16 sps:$4 sm:$0xff]  }
 0x652   :  { %8896 = vmatprep.subr.bf16.mxu1 %v8895_v16  ;;  %v14852_v16 = vpack.c.bf16 %v14850_v19, %v14851_v59  ;;  %v14903_v39 = vld [vmem:[#allocation22_spill] sm:$0xff] }
 0x655   :  { %8898 = vmatpush3.bf16.msra.mxu1 %v8897_v4  ;;  %v14855_v4 = vpack.c.bf16 %v14853_v53, %v14854_v17  ;;  %v14907_v53 = vld [vmem:[#allocation28_spill] sm:$0xff] }
 0x656   :  { %8900 = vmatprep.subr.bf16.mxu1 %v8899_v3  ;;  %v14858_v3 = vpack.c.bf16 %v14856_v0, %v14857_v6  ;;  %v14909_v0 = vld [vmem:[#allocation24_spill] sm:$0xff] }
 0x659   :  { %8902 = vmatpush3.bf16.msra.mxu1 %v8901_v27  ;;  %v14861_v27 = vpack.c.bf16 %v14859_v30, %v14860_v18  ;;  %v14912_v30 = vld [vmem:[#allocation89_spill] sm:$0xff] }
 0x65a   :  { %8904 = vmatprep.subr.bf16.mxu1 %v8903_v28  ;;  %v14864_v28 = vpack.c.bf16 %v14862_v33, %v14863_v14  ;;  %v14913_v33 = vld [vmem:[#allocation87_spill] sm:$0xff] }
 0x65b   :  { %v14914_v14 = vld [vmem:[#allocation83_spill] sm:$0xff] }
 0x65d   :  { %8906 = vmatpush3.bf16.msra.mxu1 %v8905_v40  ;;  %v14867_v40 = vpack.c.bf16 %v14865_v63, %v14866_v46  ;;  %v10023_v63 = vld [vmem:[%s14188_s2 + $0xc] ss:$16 sps:$4 sm:$0xff]   ;;  %v14916_v46 = vld [vmem:[#allocation88_spill] sm:$0xff] }
 0x65e   :  { %8908 = vmatprep.subr.bf16.mxu1 %v14759_v7  ;;  %v14815_v7 = vld [vmem:[#allocation102_spill] sm:$0xff] }
 0x660   :  { %7221 = vmatmul.mubr.f32.vlgmr.msra.gmra.mrb[128].mxu1 %v13748_v1 }
 0x661   :  { %8910 = vmatpush3.bf16.msra.mxu1 %v14760_v26  ;;  %7323 = vmatprep.mubr.f32.mxu1 %v13751_v47  ;;  %v14812_v47 = vld [vmem:[#allocation92_spill] sm:$0xff]  ;;  %v14816_v26 = vpack.c.bf16 %v14814_v50, %v14815_v7  ;;  %v14875_v50 = vld [vmem:[#allocation5_spill] sm:$0xff] }
 0x662   :  { %8912 = vmatprep.subr.bf16.mxu1 %v14761_v38  ;;  %v14813_v48 = vpack.c.bf16 %v14811_v56, %v14812_v47  ;;  %v14817_v38 = vld [vmem:[#allocation103_spill] sm:$0xff] }
 0x663   :  { %v14872_v56 = vld [vmem:[#allocation143_spill] sm:$0xff] }
 0x665   :  { %8914 = vmatpush3.bf16.msra.mxu1 %v14762_v34  ;;  %v14818_v34 = vld [vmem:[#allocation101_spill] sm:$0xff] }
 0x666   :  { %8916 = vmatprep.subr.bf16.mxu1 %v14763_v20  ;;  %v14819_v20 = vpack.c.bf16 %v14817_v38, %v14818_v34  ;;  %v14878_v38 = vld [vmem:[#allocation4_spill] sm:$0xff] }
 0x669   :  { %8918 = vmatpush3.bf16.msra.mxu1 %v14764_v29  ;;  %v14820_v29 = vld [vmem:[#allocation108_spill] sm:$0xff] }
 0x66a   :  { %8920 = vmatprep.subr.bf16.mxu1 %v14765_v2  ;;  %v14821_v2 = vld [vmem:[#allocation106_spill] sm:$0xff] }
 0x66d   :  { %8922 = vmatpush3.bf16.msra.mxu1 %v14766_v43  ;;  %v14822_v43 = vpack.c.bf16 %v14820_v29, %v14821_v2  ;;  %v14881_v29 = vld [vmem:[#allocation9_spill] sm:$0xff] }
 0x66e   :  { %8924 = vmatprep.subr.bf16.mxu1 %v14767_v54  ;;  %v14823_v54 = vld [vmem:[#allocation107_spill] sm:$0xff] }
 0x671   :  { %8926 = vmatpush3.bf16.msra.mxu1 %v14768_v22  ;;  %v14824_v22 = vld [vmem:[#allocation105_spill] sm:$0xff] }
 0x672   :  { %8928 = vmatprep.subr.bf16.mxu1 %v14769_v55  ;;  %v14826_v55 = vld [vmem:[#allocation112_spill] sm:$0xff] }
 0x675   :  { %8930 = vmatpush3.bf16.msra.mxu1 %v14770_v12  ;;  %v14827_v12 = vld [vmem:[#allocation110_spill] sm:$0xff] }
 0x676   :  { %8932 = vmatprep.subr.bf16.mxu1 %v14771_v25  ;;  %v14828_v25 = vpack.c.bf16 %v14826_v55, %v14827_v12  ;;  %v14887_v55 = vld [vmem:[#allocation13_spill] sm:$0xff] }
 0x679   :  { %8934 = vmatpush3.bf16.msra.mxu1 %v14772_v52  ;;  %v14829_v52 = vld [vmem:[#allocation111_spill] sm:$0xff] }
 0x67a   :  { %8936 = vmatprep.subr.bf16.mxu1 %v14773_v8  ;;  %v14830_v8 = vld [vmem:[#allocation109_spill] sm:$0xff] }
 0x67d   :  { %8938 = vmatpush3.bf16.msra.mxu1 %v14776_v23  ;;  %v14831_v23 = vpack.c.bf16 %v14829_v52, %v14830_v8 }
 0x67e   :  { %7435 = vmatprep.subr.bf16.mxu1 %v14810_v21  ;;  %v14871_v21 = vld [vmem:[#allocation2_spill] sm:$0xff] }
 0x67f   :  { %v14873_v47 = vpack.c.bf16 %v14871_v21, %v14872_v56  ;;  %v14921_v21 = vld [vmem:[#allocation34_spill] sm:$0xff]  ;;  %v14922_v56 = vld [vmem:[#allocation91_spill] sm:$0xff] }
 0x680   :  { %7325 = vmatmul.mubr.f32.vlgmr.msra.gmra.mrb[130].mxu1 %v13748_v1  ;;  %v14825_v1 = vpack.c.bf16 %v14823_v54, %v14824_v22  ;;  %v14884_v54 = vld [vmem:[#allocation8_spill] sm:$0xff] }
 0x681   :  { %7436 = vmatpush1.bf16.msra.mxu1 %v14813_v48  ;;  %7467 = vmatprep.mubr.bf16.mxu1 %v10018_v51  ;;  %v14868_v51 = vld [vmem:[#allocation3_spill] sm:$0xff] }
 0x682   :  { %7437 = vmatprep.subr.bf16.mxu1 %v14816_v26  ;;  %v14870_v41 = vpack.c.bf16 %v14868_v51, %v14869_v9  ;;  %v14874_v48 = vld [vmem:[#allocation7_spill] sm:$0xff]  ;;  %v14877_v26 = vld [vmem:[#allocation6_spill] sm:$0xff]  ;;  %v14919_v9 = vld [vmem:[#allocation97_spill] sm:$0xff] }
 0x683   :  { %v14876_v7 = vpack.c.bf16 %v14874_v48, %v14875_v50  ;;  %v14879_v34 = vpack.c.bf16 %v14877_v26, %v14878_v38  ;;  %v14924_v48 = vpack.c.bf16 %v13347_v62, %v13323_v57  ;;  %v14925_v50 = vld [vmem:[#allocation36_spill] sm:$0xff]  ;;  %v14928_v38 = vld [vmem:[#allocation42_spill] sm:$0xff] }
 0x684   :  { %v14937_v57 = vld [vmem:[#allocation46_spill] sm:$0xff] }
 0x685   :  { %7438 = vmatpush1.bf16.msra.mxu1 %v14819_v20  ;;  %v14880_v20 = vld [vmem:[#allocation11_spill] sm:$0xff] }
 0x686   :  { %7439 = vmatprep.subr.bf16.mxu1 %v14822_v43  ;;  %v14882_v2 = vpack.c.bf16 %v14880_v20, %v14881_v29  ;;  %v14883_v43 = vld [vmem:[#allocation10_spill] sm:$0xff] }
 0x687   :  { %v14885_v22 = vpack.c.bf16 %v14883_v43, %v14884_v54  ;;  %v14931_v43 = vld [vmem:[#allocation41_spill] sm:$0xff]  ;;  %v14932_v54 = vld [vmem:[#allocation38_spill] sm:$0xff] }
 0x689   :  { %7440 = vmatpush1.bf16.msra.mxu1 %v14825_v1  ;;  %v14886_v1 = vld [vmem:[#allocation15_spill] sm:$0xff] }
 0x68a   :  { %7441 = vmatprep.subr.bf16.mxu1 %v14828_v25  ;;  %v14888_v12 = vpack.c.bf16 %v14886_v1, %v14887_v55  ;;  %v14934_v1 = vld [vmem:[#allocation47_spill] sm:$0xff]  ;;  %v14935_v55 = vld [vmem:[#allocation45_spill] sm:$0xff] }
 0x68d   :  { %7442 = vmatpush1.bf16.msra.mxu1 %v14831_v23  ;;  %v14889_v23 = vld [vmem:[#allocation14_spill] sm:$0xff] }
 0x68e   :  { %7443 = vmatprep.subr.bf16.mxu1 %v14834_v32  ;;  %v14891_v49 = vpack.c.bf16 %v14889_v23, %v14890_v58  ;;  %v14892_v32 = vld [vmem:[#allocation19_spill] sm:$0xff]  ;;  %v14940_v23 = vld [vmem:[#allocation53_spill] sm:$0xff] }
 0x68f   :  { %v14894_v44 = vpack.c.bf16 %v14892_v32, %v14893_v61  ;;  %v14941_v58 = vld [vmem:[#allocation51_spill] sm:$0xff]  ;;  %v14943_v32 = vld [vmem:[#allocation52_spill] sm:$0xff]  ;;  %v14944_v61 = vld [vmem:[#allocation49_spill] sm:$0xff] }
 0x691   :  { %7444 = vmatpush1.bf16.msra.mxu1 %v14837_v35  ;;  %v14895_v35 = vld [vmem:[#allocation18_spill] sm:$0xff] }
 0x692   :  { %7445 = vmatprep.subr.bf16.mxu1 %v14840_v42  ;;  %v14897_v15 = vpack.c.bf16 %v14895_v35, %v14896_v31  ;;  %v14898_v42 = vld [vmem:[#allocation23_spill] sm:$0xff]  ;;  %v14947_v31 = vld [vmem:[#allocation57_spill] sm:$0xff] }
 0x693   :  { %v14900_v11 = vpack.c.bf16 %v14898_v42, %v14899_v13  ;;  %v14946_v35 = vld [vmem:[#allocation59_spill] sm:$0xff]  ;;  %v14949_v42 = vld [vmem:[#allocation58_spill] sm:$0xff] }
 0x694   :  { %v14950_v13 = vld [vmem:[#allocation55_spill] sm:$0xff] }
 0x695   :  { %7446 = vmatpush1.bf16.msra.mxu1 %v14843_v10  ;;  %v7394_v10 = vld [vmem:[%s14188_s2 + $0x20] sm:$0x11] }
 0x696   :  { %7447 = vmatprep.subr.bf16.mxu1 %v14846_v37  ;;  %v7363_v37 = vpack.c.bf16 %v14902_v24, %v14901_v5  ;;  %v8488_v59 = vcombine.high %v7394_v10, %v7394_v10  ;;  %v14955_v24 = vld [vmem:[#allocation62_spill] sm:$0xff] }
 0x699   :  { %7448 = vmatpush1.bf16.msra.mxu1 %v14849_v36  ;;  %v14904_v36 = vld [vmem:[#allocation20_spill] sm:$0xff] }
 0x69a   :  { %7449 = vmatprep.subr.bf16.mxu1 %v14852_v16  ;;  %v14905_v19 = vpack.c.bf16 %v14903_v39, %v14904_v36  ;;  %v14906_v16 = vld [vmem:[#allocation85_spill] sm:$0xff]  ;;  %v14958_v39 = vld [vmem:[#allocation67_spill] sm:$0xff] }
 0x69b   :  { %v7365_v17 = vpack.c.bf16 %v14907_v53, %v14906_v16  ;;  %v14959_v36 = vld [vmem:[#allocation65_spill] sm:$0xff]  ;;  %v14962_v16 = vld [vmem:[#allocation64_spill] sm:$0xff] }
 0x69d   :  { %7450 = vmatpush1.bf16.msra.mxu1 %v14855_v4  ;;  %v14908_v4 = vld [vmem:[#allocation26_spill] sm:$0xff] }
 0x69e   :  { %7451 = vmatprep.subr.bf16.mxu1 %v14858_v3  ;;  %v14910_v6 = vpack.c.bf16 %v14908_v4, %v14909_v0  ;;  %v14911_v3 = vld [vmem:[#allocation31_spill] sm:$0xff]  ;;  %v14965_v4 = vld [vmem:[#allocation69_spill] sm:$0xff] }
 0x69f   :  { %v7367_v18 = vpack.c.bf16 %v14912_v30, %v14911_v3  ;;  %v14968_v3 = vld [vmem:[#allocation68_spill] sm:$0xff] }
 0x6a1   :  { %7452 = vmatpush1.bf16.msra.mxu1 %v14861_v27  ;;  %v8487_v27 = vcombine.low %v7394_v10, %v7394_v10  ;;  %v14953_v10 = vld [vmem:[#allocation61_spill] sm:$0xff] }
 0x6a2   :  { %7453 = vmatprep.subr.bf16.mxu1 %v14864_v28  ;;  %v14915_v28 = vpack.c.bf16 %v14913_v33, %v14914_v14  ;;  %v14973_v14 = vld [vmem:[#allocation74_spill] sm:$0xff] }
 0x6a5   :  { %7454 = vmatpush1.bf16.msra.mxu1 %v14867_v40  ;;  %v14917_v40 = vld [vmem:[#allocation29_spill] sm:$0xff] }
 0x6a6   :  { %7455 = vmatprep.subr.bf16.mxu1 %v14870_v41  ;;  %v14918_v51 = vpack.c.bf16 %v14916_v46, %v14917_v40  ;;  %v14920_v41 = vpack.c.bf16 %v13299_v45, %v14919_v9  ;;  %v14976_v46 = vld [vmem:[#allocation79_spill] sm:$0xff]  ;;  %v14977_v40 = vld [vmem:[#allocation77_spill] sm:$0xff] }
 0x6a7   :  { %v7395_v9 = vld [vmem:[%s14188_s2 + $0x28] sm:$0x11] }
 0x6a9   :  { %7456 = vmatpush1.bf16.msra.mxu1 %v14873_v47  ;;  %v14923_v47 = vpack.c.bf16 %v14921_v21, %v14922_v56 }
 0x6aa   :  { %7457 = vmatprep.subr.bf16.mxu1 %v14876_v7  ;;  %v14926_v7 = vld [vmem:[#allocation98_spill] sm:$0xff] }
 0x6ab   :  { %v14927_v26 = vpack.c.bf16 %v14925_v50, %v14926_v7  ;;  %v14979_v50 = vld [vmem:[#allocation78_spill] sm:$0xff]  ;;  %v14980_v7 = vld [vmem:[#allocation76_spill] sm:$0xff] }
 0x6ad   :  { %7458 = vmatpush1.bf16.msra.mxu1 %v14879_v34  ;;  %v14929_v34 = vld [vmem:[#allocation39_spill] sm:$0xff] }
 0x6ae   :  { %7459 = vmatprep.subr.bf16.mxu1 %v14882_v2  ;;  %v14930_v20 = vpack.c.bf16 %v14928_v38, %v14929_v34  ;;  %v8490_v38 = vcombine.high %v7395_v9, %v7395_v9  ;;  %v10027_v34 = vld [vmem:[%s14189_s3] sm:$0xff]  }
 0x6b1   :  { %7460 = vmatpush1.bf16.msra.mxu1 %v14885_v22  ;;  %v14933_v22 = vpack.c.bf16 %v14931_v43, %v14932_v54  ;;  %v8489_v43 = vcombine.low %v7395_v9, %v7395_v9  ;;  %v10031_v54 = vld [vmem:[%s14189_s3 + $0x10] sm:$0xff]  }
 0x6b2   :  { %7461 = vmatprep.subr.bf16.mxu1 %v14888_v12  ;;  %v14936_v12 = vpack.c.bf16 %v14934_v1, %v14935_v55  ;;  %v10033_v1 = vld [vmem:[%s14189_s3 + $0x18] sm:$0xff]   ;;  %v10034_v55 = vld [vmem:[%s14189_s3 + $0x60] sm:$0xff]  }
 0x6b3   :  { %v8541_v25 = vpop.f32.mrb[120].mxu1 }
 0x6b4   :  { %v8542_v52 = vpop.f32.mrb[121].mxu1 }
 0x6b5   :  { %v8543_v8 = vadd.f32 %v8542_v52, %v8541_v25  ;;  %7462 = vmatpush1.bf16.msra.mxu1 %v14891_v49  ;;  %v14938_v25 = vld [vmem:[#allocation44_spill] sm:$0xff]  ;;  %v14942_v49 = vpack.c.bf16 %v14940_v23, %v14941_v58 }
 0x6b6   :  { %7463 = vmatprep.subr.bf16.mxu1 %v14894_v44  ;;  %v14939_v52 = vpack.c.bf16 %v14937_v57, %v14938_v25  ;;  %v14945_v44 = vpack.c.bf16 %v14943_v32, %v14944_v61  ;;  %v10037_v57 = vld [vmem:[%s14189_s3 + $0x28] sm:$0xff]   ;;  %v10038_v25 = vld [vmem:[%s14189_s3 + $0x70] sm:$0xff]  }
 0x6b9   :  { %7464 = vmatpush1.bf16.msra.mxu1 %v14897_v15  ;;  %v14948_v15 = vpack.c.bf16 %v14946_v35, %v14947_v31  ;;  %v10039_v31 = vld [vmem:[%s14189_s3 + $0x30] sm:$0xff]  }
 0x6ba   :  { %7465 = vmatprep.subr.bf16.mxu1 %v14900_v11  ;;  %v14951_v11 = vpack.c.bf16 %v14949_v42, %v14950_v13  ;;  %v10041_v42 = vld [vmem:[%s14189_s3 + $0x38] sm:$0xff]  }
 0x6bd   :  { %7466 = vmatpush1.bf16.msra.mxu1 %v14905_v19  ;;  %v14960_v19 = vpack.c.bf16 %v14958_v39, %v14959_v36 }
 0x6be   :  { %7486 = vmatprep.subr.bf16.mxu1 %v7363_v37  ;;  %v14956_v37 = vld [vmem:[#allocation60_spill] sm:$0xff] }
 0x6c0   :  { %7468 = vmatmul.mubr.bf16.vlgmr.msra.gmra.mrb[132].mxu1 %v10016_v60  ;;  %v14957_v60 = vpack.c.bf16 %v14955_v24, %v14956_v37 }
 0x6c1   :  { %7487 = vmatpush1.bf16.msra.mxu1 %v14910_v6  ;;  %7477 = vmatprep.mubr.bf16.mxu1 %v8488_v59  ;;  %v14961_v59 = vld [vmem:[#allocation66_spill] sm:$0xff] }
 0x6c2   :  { %7488 = vmatprep.subr.bf16.mxu1 %v7365_v17  ;;  %v14963_v53 = vpack.c.bf16 %v14961_v59, %v14962_v16  ;;  %v14964_v17 = vld [vmem:[#allocation71_spill] sm:$0xff]  ;;  %v14967_v6 = vld [vmem:[#allocation70_spill] sm:$0xff] }
 0x6c3   :  { %v14966_v0 = vpack.c.bf16 %v14964_v17, %v14965_v4  ;;  %v14969_v30 = vpack.c.bf16 %v14967_v6, %v14968_v3 }
 0x6c5   :  { %7489 = vmatpush1.bf16.msra.mxu1 %v14915_v28  ;;  %v14974_v28 = vld [vmem:[#allocation72_spill] sm:$0xff] }
 0x6c6   :  { %7490 = vmatprep.subr.bf16.mxu1 %v7367_v18  ;;  %v14970_v18 = vld [vmem:[#allocation75_spill] sm:$0xff] }
 0x6c8   :  { %7478 = vmatmul.mubr.bf16.gmra.mrb[136].mxu1 %v8487_v27  ;;  %v14971_v27 = vld [vmem:[#allocation73_spill] sm:$0xff] }
 0x6c9   :  { %7491 = vmatpush1.bf16.msra.mxu1 %v14918_v51  ;;  %8491 = vmatprep.mubr.msk.bf16.mxu1 %vm7428_vm4, %v10023_v63  ;;  %v14972_v33 = vpack.c.bf16 %v14970_v18, %v14971_v27  ;;  %v14975_v63 = vpack.c.bf16 %v14973_v14, %v14974_v28  ;;  %v14978_v51 = vpack.c.bf16 %v14976_v46, %v14977_v40 }
 0x6ca   :  { %7492 = vmatprep.subr.bf16.mxu1 %v14920_v41  ;;  %v10026_v41 = vld [vmem:[%s14189_s3 + $0x40] sm:$0xff]  }
 0x6cd   :  { %7493 = vmatpush1.bf16.msra.mxu1 %v14923_v47  ;;  %v10021_v47 = vld [vmem:[%s14188_s2 + $0x8] ss:$16 sps:$4 sm:$0xff]  }
 0x6ce   :  { %7494 = vmatprep.subr.bf16.mxu1 %v14924_v48 }
 0x6d1   :  { %7495 = vmatpush1.bf16.msra.mxu1 %v14927_v26  ;;  %v14981_v26 = vpack.c.bf16 %v14979_v50, %v14980_v7 }
 0x6d2   :  { %7496 = vmatprep.subr.bf16.mxu1 %v14930_v20  ;;  %v10028_v20 = vld [vmem:[%s14189_s3 + $0x48] sm:$0xff]  }
 0x6d3   :  { %v8576_v29 = vpop.f32.mrb[122].mxu1 }
 0x6d4   :  { %v8577_v2 = vpop.f32.mrb[123].mxu1 }
 0x6d5   :  { %v8578_v45 = vadd.f32 %v8577_v2, %v8576_v29  ;;  %7497 = vmatpush1.bf16.msra.mxu1 %v14933_v22  ;;  %v10029_v2 = vld [vmem:[%s14189_s3 + $0x8] sm:$0xff]   ;;  %v10032_v22 = vld [vmem:[%s14189_s3 + $0x58] sm:$0xff]  }
 0x6d6   :  { %7498 = vmatprep.subr.bf16.mxu1 %v14936_v12  ;;  %v10035_v12 = vld [vmem:[%s14189_s3 + $0x20] sm:$0xff]  }
 0x6d7   :  { %v6809_v62 = vadd.f32 %v8578_v45, %v8543_v8  ;;  %v14952_v8 = vld [vmem:[#allocation63_spill] sm:$0xff]  ;;  %v10030_v45 = vld [vmem:[%s14189_s3 + $0x50] sm:$0xff]  }
 0x6d8   :  { %v14954_v5 = vpack.c.bf16 %v14952_v8, %v14953_v10 }
 0x6d9   :  { %7499 = vmatpush1.bf16.msra.mxu1 %v14939_v52 }
 0x6da   :  { %7500 = vmatprep.subr.bf16.mxu1 %v14942_v49 }
 0x6dd   :  { %7501 = vmatpush1.bf16.msra.mxu1 %v14945_v44 }
 0x6de   :  { %7502 = vmatprep.subr.bf16.mxu1 %v14948_v15  ;;  %v10040_v15 = vld [vmem:[%s14189_s3 + $0x78] sm:$0xff]  }
 0x6e1   :  { %7503 = vmatpush1.bf16.msra.mxu1 %v14951_v11 }
 0x6e2   :  { %7504 = vmatprep.subr.bf16.mxu1 %v14954_v5 }
 0x6e5   :  { %7505 = vmatpush1.bf16.msra.mxu1 %v14957_v60 }
 0x6e6   :  { %7506 = vmatprep.subr.bf16.mxu1 %v14960_v19 }
 0x6e9   :  { %7507 = vmatpush1.bf16.msra.mxu1 %v14963_v53 }
 0x6ea   :  { %7508 = vmatprep.subr.bf16.mxu1 %v14966_v0 }
 0x6ed   :  { %7509 = vmatpush1.bf16.msra.mxu1 %v14969_v30 }
 0x6ee   :  { %7510 = vmatprep.subr.bf16.mxu1 %v14972_v33 }
 0x6f1   :  { %7511 = vmatpush1.bf16.msra.mxu1 %v14975_v63 }
 0x6f2   :  { %7512 = vmatprep.subr.bf16.mxu1 %v14978_v51 }
 0x6f3   :  { %v8611_v21 = vpop.f32.mrb[124].mxu1 }
 0x6f4   :  { %v8612_v56 = vpop.f32.mrb[125].mxu1 }
 0x6f5   :  { %v8613_v48 = vadd.f32 %v8612_v56, %v8611_v21  ;;  %7513 = vmatpush1.bf16.msra.mxu1 %v14981_v26 }
 0x6f6   :  { %8719 = vmatprep.subr.bf16.mxu1 %v10026_v41 }
 0x6f7   :  { %v6947_v29 = vadd.f32 %v8613_v48, %v6809_v62  ;;  %v10036_v62 = vld [vmem:[%s14189_s3 + $0x68] sm:$0xff]  }
 0x6f8   :  { %7519 = vmatmul.mubr.bf16.vlgmr.msra.gmra.mrb[132].mxu1 %v10021_v47 }
 0x6f9   :  { %8492 = vmatprep.mubr.msk.bf16.mxu1 %vm7428_vm4, %v8490_v38  ;;  %8720 = vmatpush3.bf16.msra.mxu1 %v10027_v34 }
 0x6fa   :  { %8721 = vmatprep.subr.bf16.mxu1 %v10028_v20 }
 0x6fd   :  { %8722 = vmatpush3.bf16.msra.mxu1 %v10029_v2 }
 0x6fe   :  { %8723 = vmatprep.subr.bf16.mxu1 %v10030_v45 }
 0x700   :  { %7529 = vmatmul.mubr.bf16.gmra.mrb[136].mxu1 %v8489_v43 }
 0x701   :  { %8724 = vmatpush3.bf16.msra.mxu1 %v10031_v54 }
 0x702   :  { %8725 = vmatprep.subr.bf16.mxu1 %v10032_v22 }
 0x705   :  { %8726 = vmatpush3.bf16.msra.mxu1 %v10033_v1 }
 0x706   :  { %8727 = vmatprep.subr.bf16.mxu1 %v10034_v55 }
 0x709   :  { %8728 = vmatpush3.bf16.msra.mxu1 %v10035_v12 }
 0x70a   :  { %8729 = vmatprep.subr.bf16.mxu1 %v10036_v62 }
 0x70d   :  { %8730 = vmatpush3.bf16.msra.mxu1 %v10037_v57 }
 0x70e   :  { %8731 = vmatprep.subr.bf16.mxu1 %v10038_v25 }
 0x711   :  { %8732 = vmatpush3.bf16.msra.mxu1 %v10039_v31 }
 0x712   :  { %8733 = vmatprep.subr.bf16.mxu1 %v10040_v15 }
 0x713   :  { %v8646_v52 = vpop.f32.mrb[126].mxu1 }
 0x714   :  { %v8647_v23 = vpop.f32.mrb[127].mxu1 }
 0x715   :  { %v8648_v58 = vadd.f32 %v8647_v23, %v8646_v52  ;;  %8734 = vmatpush3.bf16.msra.mxu1 %v10041_v42 }
 0x717   :  { %v7055_v49 = vadd.f32 %v8648_v58, %v6947_v29 }
 0x733   :  { %v8681_v32 = vpop.f32.mrb[128].mxu1 }
 0x734   :  { %v8682_v61 = vpop.f32.mrb[129].mxu1 }
 0x735   :  { %v8683_v44 = vadd.f32 %v8682_v61, %v8681_v32 }
 0x737   :  { %v7223_v35 = vadd.f32 %v8683_v44, %v7055_v49 }
 0x753   :  { %v8716_v13 = vpop.f32.mrb[130].mxu1 }
 0x754   :  { %v8717_v11 = vpop.f32.mrb[131].mxu1 }
 0x755   :  { %v8718_v8 = vadd.f32 %v8717_v11, %v8716_v13 }
 0x757   :  { %v7327_v10 = vadd.f32 %v8718_v8, %v7223_v35 }
 0x759   :  { %7720 = vst [vmem:[%s14190_s5 + $0x12] sm:$0x3] %v7327_v10 }
 0x7cb   :  { %v7520_v5 = vpop.f32.mrb[132].mxu1 }
 0x7cc   :  { %v7522_v24 = vpop.f32.mrb[133].mxu1 }
 0x7cd   :  { %v7524_v37 = vpop.f32.mrb[134].mxu1 }
 0x7ce   :  { %v7537_v60 = vpack.c.bf16 %v7524_v37, %v7520_v5  ;;  %v7526_v39 = vpop.f32.mrb[135].mxu1 }
 0x7cf   :  { %v7538_v36 = vpack.c.bf16 %v7526_v39, %v7522_v24 }
 0x7d1   :  { %7701 = vmatprep.mubr.bf16.mxu1 %v7538_v36 }
 0x7d2   :  { %7702 = vmatmul.mubr.bf16.vlgmr.msra.gmra.mrb[140].mxu1 %v7537_v60 }
 0x7d3   :  { %v7530_v19 = vpop.f32.mrb[136].mxu1 }
 0x7d4   :  { %v7532_v59 = vpop.f32.mrb[137].mxu1  ;;  %v7539_v4 = vpack.c.bf16 %v7530_v19, %v7530_v19 }
 0x7d5   :  { %v7540_v16 = vpack.c.bf16 %v7532_v59, %v7532_v59  ;;  %v7534_v53 = vpop.f32.mrb[138].mxu1 }
 0x7d6   :  { %v7535_v17 = vpop.f32.mrb[139].mxu1 }
 0x7d7   :  { %7709 = vmatprep.mubr.bf16.mxu1 %v7540_v16 }
 0x7da   :  { %7710 = vmatmul.mubr.bf16.gmra.mrb[144].mxu1 %v7539_v4 }
 0x8a5   :  { %v8735_v0 = vpop.f32.mrb[140].mxu1 }
 0x8a6   :  { %v8736_v6 = vpop.f32.mrb[141].mxu1 }
 0x8a7   :  { %v8737_v3 = vadd.f32 %v8736_v6, %v8735_v0  ;;  %v8738_v30 = vpop.f32.mrb[142].mxu1 }
 0x8a8   :  { %v8739_v18 = vpop.f32.mrb[143].mxu1 }
 0x8a9   :  { %7717 = vst [vmem:[%s14190_s5] sm:$0xff] %v8737_v3  ;;  %v8740_v27 = vadd.f32 %v8739_v18, %v8738_v30 }
 0x8ab   :  { %7718 = vst [vmem:[%s14190_s5 + $0x8] sm:$0xff] %v8740_v27 }
 0x8ad   :  { %v8741_v33 = vpop.f32.mrb[144].mxu1 }
 0x8ae   :  { %v8742_v14 = vpop.f32.mrb[145].mxu1 }
 0x8af   :  { %v8743_v28 = vadd.f32 %v8742_v14, %v8741_v33  ;;  %v8744_v63 = vpop.f32.mrb[146].mxu1 }
 0x8b0   :  { %v8745_v46 = vpop.f32.mrb[147].mxu1 }
 0x8b1   :  { %7719 = vst [vmem:[%s14190_s5 + $0x10] sm:$0x3] %v8743_v28 }

</bundles_post_ra>
